<compile_context>
chip_gen: v7x
topology: tpu7x:2x2x1
jax: 0.10.0
libtpu: 0.0.40
codegen_flags: <defaults>
</compile_context>

<pallas_src>
import functools

import jax
import jax.numpy as jnp
from jax.experimental import pallas as pl
from jax.experimental.pallas import tpu as pltpu


_VMEM_LIMIT = 48 * 1024 * 1024   # cap only; per-call peak ~18 MiB, safe on v7x's 64 MiB


def round_up(x, m):
    return (x + m - 1) // m * m


# Layer geometry (input 3x508x508):
#   conv1: 508 -> 504 -> pool 252 ; conv2: 252 -> 248 -> 124 ; conv3: 124 -> 120 -> 60
# KP = 5*Cin padded to a multiple of 16 (bf16 sublane pack) so all in-kernel
# sublane views stay aligned; Wp = conv-output width padded to a lane multiple.
_CONV_CFGS = (
    dict(name="conv1", OC=6,  Cin=3,  KP=16, R=8, OH=504, OW=504, Wp=512),
    dict(name="conv2", OC=16, Cin=6,  KP=32, R=8, OH=248, OW=248, Wp=256),
    dict(name="conv3", OC=16, Cin=16, KP=80, R=8, OH=120, OW=120, Wp=128),
)


# ---------------------------------------------------------------------------
# Pallas kernels
# ---------------------------------------------------------------------------

def conv_pool_kernel(xp_ref, w_ref, b_ref, o_ref, *, R, KP, OC):
    """Fused conv (block-Toeplitz matmul) + bias + ReLU + row-pair max-pool.

    xp_ref: (1, H*KP, Wp) bf16 -- whole packed image, resident in VMEM.
    w_ref : (R*OC, (R+4)*KP) bf16 block-Toeplitz weight (R adjacent output rows).
    b_ref : (OC, 1) f32.
    o_ref : (1, R//2, OC, Wp) -- R//2 row-pooled output rows, lane-dense (Wp>=128).

    The matmul operand for this row block is a FREE contiguous-sublane view of
    xp (no im2col materialization); the wide spatial axis is the MXU lane/N dim.
    """
    i = pl.program_id(1)
    kt = (R + 4) * KP
    row0 = pl.multiple_of(i * (R * KP), 128)
    rhs = xp_ref[0, pl.ds(row0, kt), :]                                  # (Kt, Wp) bf16
    acc = jnp.dot(w_ref[...], rhs, preferred_element_type=jnp.float32)   # (R*OC, Wp) f32
    bias = b_ref[...]                                                    # (OC, 1)
    # relu(max_rows(conv) + b) == maxpool_rows(relu(conv + b)) since ReLU is monotone.
    for j in range(R // 2):
        top = acc[(2 * j) * OC:(2 * j + 1) * OC, :]
        bot = acc[(2 * j + 1) * OC:(2 * j + 2) * OC, :]
        m = jnp.maximum(top, bot) + bias
        o_ref[0, j] = jnp.maximum(m, 0.0).astype(o_ref.dtype)


def lin1_partial_kernel(a_ref, w_ref, o_ref, acc_ref):
    """Partial sums of x @ W1 over one half of K (grid axis 0 = K half, parallel)."""
    k = pl.program_id(1)

    @pl.when(k == 0)
    def _():
        acc_ref[...] = jnp.zeros_like(acc_ref)

    acc_ref[...] += jnp.dot(a_ref[...], w_ref[...],
                            preferred_element_type=jnp.float32)

    @pl.when(k == pl.num_programs(1) - 1)
    def _():
        o_ref[0] = acc_ref[...]


def head_kernel(p_ref, b1_ref, w2_ref, b2_ref, o_ref):
    """Combine the two lin1 K-halves, add bias, ReLU, then lin2 (fused)."""
    h = p_ref[0] + p_ref[1] + b1_ref[...]          # (8, 64) f32
    h = jnp.maximum(h, 0.0)
    o_ref[...] = (jnp.dot(h, w2_ref[...], preferred_element_type=jnp.float32)
                  + b2_ref[...])


# ---------------------------------------------------------------------------
# XLA-side layout plumbing (cheap, ~1-5x small-activation traffic)
# ---------------------------------------------------------------------------

def pack_taps(x, Wp, KP):
    """x: (B, H, C, W) -> (B, H*KP, Wp) with row h*KP + kw*C + c = x[b, h, c, w+kw]."""
    B, H, C, W = x.shape
    x = jnp.pad(x, ((0, 0), (0, 0), (0, 0), (0, Wp + 4 - W)))
    taps = jnp.stack([x[..., kw:kw + Wp] for kw in range(5)], axis=2)   # (B,H,5,C,Wp)
    taps = taps.reshape(B, H, 5 * C, Wp)
    if KP > 5 * C:
        taps = jnp.pad(taps, ((0, 0), (0, 0), (0, KP - 5 * C), (0, 0)))
    return taps.reshape(B, H * KP, Wp)


def pool_cols(y, OW):
    """Column half of the 2x2 max-pool (rows were pooled in-kernel)."""
    return jnp.maximum(y[..., 0:OW:2], y[..., 1:OW:2])


def make_toeplitz_weight(w, R, KP):
    """w: (OC, Cin, 5, 5) (PyTorch layout) -> (R*OC, (R+4)*KP) block-Toeplitz.

    Row r*OC+oc, column (r+kh)*KP + kw*Cin + c holds w[oc, c, kh, kw]; zeros elsewhere.
    """
    OC, Cin, K, _ = w.shape
    wr = jnp.transpose(w, (0, 2, 3, 1)).reshape(OC, K, K * Cin)     # [oc, kh, kw*Cin+c]
    wr = jnp.pad(wr, ((0, 0), (0, 0), (0, KP - K * Cin)))           # (OC, 5, KP)
    rows = [jnp.pad(wr, ((0, 0), (r, R - 1 - r), (0, 0))).reshape(OC, (R + 4) * KP)
            for r in range(R)]
    return jnp.stack(rows, axis=0).reshape(R * OC, (R + 4) * KP)


# ---------------------------------------------------------------------------
# pallas_call wrappers
# ---------------------------------------------------------------------------

def conv_layer(xp, w_toep, bias, *, OC, KP, R, OH, Wp, out_dtype=jnp.bfloat16):
    B, HKP, _ = xp.shape
    nblk = OH // R
    PH = OH // 2
    Kt = (R + 4) * KP
    kern = functools.partial(conv_pool_kernel, R=R, KP=KP, OC=OC)
    return pl.pallas_call(
        kern,
        out_shape=jax.ShapeDtypeStruct((B, PH, OC, Wp), out_dtype),
        grid_spec=pltpu.PrefetchScalarGridSpec(
            num_scalar_prefetch=0,
            grid=(B, nblk),
            in_specs=[
                # whole packed image (2.5-8.3 MB bf16) stays resident across the
                # inner row-block axis (block index depends only on b).
                pl.BlockSpec((1, HKP, Wp), lambda b, i: (b, 0, 0)),
                pl.BlockSpec((R * OC, Kt), lambda b, i: (0, 0)),
                pl.BlockSpec((OC, 1), lambda b, i: (0, 0)),
            ],
            out_specs=pl.BlockSpec((1, R // 2, OC, Wp), lambda b, i: (b, i, 0, 0)),
        ),
        compiler_params=pltpu.CompilerParams(
            dimension_semantics=("parallel", "parallel"),
            vmem_limit_bytes=_VMEM_LIMIT),
    )(xp, w_toep, bias)


def linear_head(x, w1, b1, w2, b2):
    """relu(x @ W1 + b1) @ W2 + b2, all in Pallas; K reduction split 2-way (v7x)."""
    B, K = x.shape
    x = x.astype(jnp.bfloat16)
    Mp = 8
    xpad = jnp.pad(x, ((0, Mp - B), (0, 0)))
    N1 = w1.shape[1]
    NSPLIT = 2
    tk = 9600                      # 2 * 3 * 9600 == 57600, multiple of 128
    NK = K // (NSPLIT * tk)

    partial = pl.pallas_call(
        lin1_partial_kernel,
        out_shape=jax.ShapeDtypeStruct((NSPLIT, Mp, N1), jnp.float32),
        grid_spec=pltpu.PrefetchScalarGridSpec(
            num_scalar_prefetch=0,
            grid=(NSPLIT, NK),
            in_specs=[
                pl.BlockSpec((Mp, tk), lambda i, k: (0, i * NK + k)),
                pl.BlockSpec((tk, N1), lambda i, k: (i * NK + k, 0)),
            ],
            out_specs=pl.BlockSpec((1, Mp, N1), lambda i, k: (i, 0, 0)),
            scratch_shapes=[pltpu.VMEM((Mp, N1), jnp.float32)],
        ),
        compiler_params=pltpu.CompilerParams(
            dimension_semantics=("parallel", "arbitrary"),
            vmem_limit_bytes=_VMEM_LIMIT),
    )(xpad, w1)

    N2 = w2.shape[1]
    out = pl.pallas_call(
        head_kernel,
        out_shape=jax.ShapeDtypeStruct((Mp, N2), jnp.float32),
        grid_spec=pltpu.PrefetchScalarGridSpec(
            num_scalar_prefetch=0,
            grid=(1,),
            in_specs=[
                pl.BlockSpec((NSPLIT, Mp, N1), lambda i: (0, 0, 0)),
                pl.BlockSpec((1, N1), lambda i: (0, 0)),
                pl.BlockSpec((N1, N2), lambda i: (0, 0)),
                pl.BlockSpec((1, N2), lambda i: (0, 0)),
            ],
            out_specs=pl.BlockSpec((Mp, N2), lambda i: (0, 0)),
        ),
        compiler_params=pltpu.CompilerParams(vmem_limit_bytes=_VMEM_LIMIT),
    )(partial, b1, w2, b2)
    return out[:B]


# ---------------------------------------------------------------------------
# Model
# ---------------------------------------------------------------------------

def init_params(key, n_classes=10):
    ks = jax.random.split(key, 10)

    def u(k, shape, fan_in):
        bound = 1.0 / jnp.sqrt(float(fan_in))
        return jax.random.uniform(k, shape, jnp.float32, -bound, bound)

    p = {}
    p["conv1_w"] = u(ks[0], (6, 3, 5, 5), 3 * 25)
    p["conv1_b"] = u(ks[1], (6,), 3 * 25)
    p["conv2_w"] = u(ks[2], (16, 6, 5, 5), 6 * 25)
    p["conv2_b"] = u(ks[3], (16,), 6 * 25)
    p["conv3_w"] = u(ks[4], (16, 16, 5, 5), 16 * 25)
    p["conv3_b"] = u(ks[5], (16,), 16 * 25)
    # lin1 weight stored as (in, out); row order is PyTorch's NCHW flatten (c, h, w).
    p["lin1_w"] = u(ks[6], (57600, 64), 57600)
    p["lin1_b"] = u(ks[7], (64,), 57600)
    p["lin2_w"] = u(ks[8], (64, n_classes), 64)
    p["lin2_b"] = u(ks[9], (n_classes,), 64)
    return p


def prepare_params(p):
    """One-time conversion to kernel-ready layouts (Toeplitz conv weights, etc.)."""
    q = {}
    for cfg in _CONV_CFGS:
        n = cfg["name"]
        q[n + "_w"] = make_toeplitz_weight(p[n + "_w"], cfg["R"],
                                           cfg["KP"]).astype(jnp.bfloat16)
        q[n + "_b"] = p[n + "_b"].reshape(cfg["OC"], 1).astype(jnp.float32)
    # Activations are carried as (B, H, C, W) and flattened in (h, c, w) order, so
    # permute lin1's rows from the NCHW (c, h, w) order once here (review #7).
    w1 = p["lin1_w"].reshape(16, 60, 60, -1).transpose(1, 0, 2, 3).reshape(57600, -1)
    q["lin1_w"] = w1.astype(jnp.bfloat16)
    q["lin1_b"] = p["lin1_b"].reshape(1, -1).astype(jnp.float32)
    q["lin2_w"] = p["lin2_w"].astype(jnp.float32)
    q["lin2_b"] = p["lin2_b"].reshape(1, -1).astype(jnp.float32)
    return q


def simple_cnn_forward(params, x_nchw):
    # External interface is NCHW f32 (PyTorch); internally (B, H, C, W) bf16.
    x = jnp.transpose(x_nchw, (0, 2, 1, 3)).astype(jnp.bfloat16)
    for cfg in _CONV_CFGS:
        xp = pack_taps(x, cfg["Wp"], cfg["KP"])
        y = conv_layer(xp, params[cfg["name"] + "_w"], params[cfg["name"] + "_b"],
                       OC=cfg["OC"], KP=cfg["KP"], R=cfg["R"],
                       OH=cfg["OH"], Wp=cfg["Wp"])
        x = pool_cols(y, cfg["OW"])          # (B, PH, OC, PW)
    B = x.shape[0]
    flat = x.reshape(B, -1)                  # (h, c, w) order, matches permuted lin1_w
    return linear_head(flat, params["lin1_w"], params["lin1_b"],
                       params["lin2_w"], params["lin2_b"])


if __name__ == "__main__":
    n_classes = 10
    key = jax.random.PRNGKey(0)
    pkey, xkey = jax.random.split(key)

    params = prepare_params(init_params(pkey, n_classes=n_classes))

    # Input shape implied by Linear(57600, 64): (B, 3, 508, 508)
    #   508 -conv5-> 504 -pool-> 252 -conv5-> 248 -pool-> 124 -conv5-> 120 -pool-> 60
    #   16 * 60 * 60 = 57600
    x = jax.random.normal(xkey, (2, 3, 508, 508), jnp.float32)

    fwd = jax.jit(simple_cnn_forward)
    out = jax.block_until_ready(fwd(params, x))
    assert out.shape == (2, n_classes), out.shape
    assert bool(jnp.all(jnp.isfinite(out)))
    print("KERNEL_OK")
</pallas_src>

<mosaic_0001>
module attributes {stable_mosaic.version = 11 : i64} {
  func.func @conv_pool_kernel(%arg0: i32, %arg1: i32, %arg2: memref<1x8128x512xbf16, #tpu.memory_space<vmem>>, %arg3: memref<48x192xbf16, #tpu.memory_space<vmem>>, %arg4: memref<6x1xf32, #tpu.memory_space<vmem>>, %arg5: memref<1x4x6x512xbf16, #tpu.memory_space<vmem>>) attributes {dimension_semantics = [#tpu.dimension_semantics<parallel>, #tpu.dimension_semantics<parallel>], iteration_bounds = array<i64: 2, 63>, scalar_prefetch = 0 : i64, scratch_operands = 0 : i64, tpu.core_type = #tpu.core_type<tc>, window_params = [{transform_indices = @transform_0, window_bounds = array<i64: 1, 8128, 512>}, {pipeline_mode = #tpu.pipeline_mode<synchronous>, transform_indices = @transform_1, window_bounds = array<i64: 48, 192>}, {pipeline_mode = #tpu.pipeline_mode<synchronous>, transform_indices = @transform_2, window_bounds = array<i64: 6, 1>}, {transform_indices = @transform_3, window_bounds = array<i64: 1, 4, 6, 512>}]} {
    %c128_i32 = arith.constant 128 : i32
    %0 = arith.muli %arg1, %c128_i32 : i32
    %1 = tpu.assume_multiple %0, 128 : i32
    %c0 = arith.constant 0 : index
    %2 = arith.index_cast %1 : i32 to index
    %c0_0 = arith.constant 0 : index
    %3 = vector.load %arg2[%c0, %2, %c0_0] : memref<1x8128x512xbf16, #tpu.memory_space<vmem>>, vector<1x192x512xbf16>
    %4 = vector.shape_cast %3 : vector<1x192x512xbf16> to vector<192x512xbf16>
    %c0_1 = arith.constant 0 : index
    %c0_2 = arith.constant 0 : index
    %5 = vector.load %arg3[%c0_1, %c0_2] : memref<48x192xbf16, #tpu.memory_space<vmem>>, vector<48x192xbf16>
    %cst = arith.constant dense<0.000000e+00> : vector<48x512xf32>
    %6 = tpu.matmul %5, %4, %cst {dimension_numbers = #tpu.dot_dimension_numbers<[1], [0], [0], [1], [0, 0, 1, 1], [], []>} : vector<48x192xbf16>, vector<192x512xbf16>, vector<48x512xf32> -> vector<48x512xf32>
    %c0_3 = arith.constant 0 : index
    %c0_4 = arith.constant 0 : index
    %7 = vector.load %arg4[%c0_3, %c0_4] : memref<6x1xf32, #tpu.memory_space<vmem>>, vector<6x1xf32>
    %8 = vector.extract_strided_slice %6 {offsets = [0, 0], sizes = [6, 512], strides = [1, 1]} : vector<48x512xf32> to vector<6x512xf32>
    %9 = vector.extract_strided_slice %6 {offsets = [6, 0], sizes = [6, 512], strides = [1, 1]} : vector<48x512xf32> to vector<6x512xf32>
    %10 = arith.maximumf %8, %9 : vector<6x512xf32>
    %11 = vector.broadcast %7 : vector<6x1xf32> to vector<6x512xf32>
    %12 = arith.addf %10, %11 : vector<6x512xf32>
    %cst_5 = arith.constant 0.000000e+00 : f32
    %13 = vector.broadcast %cst_5 : f32 to vector<6x512xf32>
    %14 = arith.maximumf %12, %13 : vector<6x512xf32>
    %15 = arith.truncf %14 : vector<6x512xf32> to vector<6x512xbf16>
    %c0_6 = arith.constant 0 : index
    %c0_7 = arith.constant 0 : index
    %c0_8 = arith.constant 0 : index
    %c0_9 = arith.constant 0 : index
    %16 = vector.load %arg5[%c0_6, %c0_7, %c0_8, %c0_9] : memref<1x4x6x512xbf16, #tpu.memory_space<vmem>>, vector<1x1x6x512xbf16>
    %17 = vector.shape_cast %16 : vector<1x1x6x512xbf16> to vector<6x512xbf16>
    %18 = vector.shape_cast %15 : vector<6x512xbf16> to vector<1x1x6x512xbf16>
    tpu.vector_store %arg5[%c0_6, %c0_7, %c0_8, %c0_9], %18 {strides = array<i32>} : memref<1x4x6x512xbf16, #tpu.memory_space<vmem>>, vector<1x1x6x512xbf16>,
    %19 = vector.extract_strided_slice %6 {offsets = [12, 0], sizes = [6, 512], strides = [1, 1]} : vector<48x512xf32> to vector<6x512xf32>
    %20 = vector.extract_strided_slice %6 {offsets = [18, 0], sizes = [6, 512], strides = [1, 1]} : vector<48x512xf32> to vector<6x512xf32>
    %21 = arith.maximumf %19, %20 : vector<6x512xf32>
    %22 = vector.broadcast %7 : vector<6x1xf32> to vector<6x512xf32>
    %23 = arith.addf %21, %22 : vector<6x512xf32>
    %cst_10 = arith.constant 0.000000e+00 : f32
    %24 = vector.broadcast %cst_10 : f32 to vector<6x512xf32>
    %25 = arith.maximumf %23, %24 : vector<6x512xf32>
    %26 = arith.truncf %25 : vector<6x512xf32> to vector<6x512xbf16>
    %c0_11 = arith.constant 0 : index
    %c1 = arith.constant 1 : index
    %c0_12 = arith.constant 0 : index
    %c0_13 = arith.constant 0 : index
    %27 = vector.load %arg5[%c0_11, %c1, %c0_12, %c0_13] : memref<1x4x6x512xbf16, #tpu.memory_space<vmem>>, vector<1x1x6x512xbf16>
    %28 = vector.shape_cast %27 : vector<1x1x6x512xbf16> to vector<6x512xbf16>
    %29 = vector.shape_cast %26 : vector<6x512xbf16> to vector<1x1x6x512xbf16>
    tpu.vector_store %arg5[%c0_11, %c1, %c0_12, %c0_13], %29 {strides = array<i32>} : memref<1x4x6x512xbf16, #tpu.memory_space<vmem>>, vector<1x1x6x512xbf16>,
    %30 = vector.extract_strided_slice %6 {offsets = [24, 0], sizes = [6, 512], strides = [1, 1]} : vector<48x512xf32> to vector<6x512xf32>
    %31 = vector.extract_strided_slice %6 {offsets = [30, 0], sizes = [6, 512], strides = [1, 1]} : vector<48x512xf32> to vector<6x512xf32>
    %32 = arith.maximumf %30, %31 : vector<6x512xf32>
    %33 = vector.broadcast %7 : vector<6x1xf32> to vector<6x512xf32>
    %34 = arith.addf %32, %33 : vector<6x512xf32>
    %cst_14 = arith.constant 0.000000e+00 : f32
    %35 = vector.broadcast %cst_14 : f32 to vector<6x512xf32>
    %36 = arith.maximumf %34, %35 : vector<6x512xf32>
    %37 = arith.truncf %36 : vector<6x512xf32> to vector<6x512xbf16>
    %c0_15 = arith.constant 0 : index
    %c2 = arith.constant 2 : index
    %c0_16 = arith.constant 0 : index
    %c0_17 = arith.constant 0 : index
    %38 = vector.load %arg5[%c0_15, %c2, %c0_16, %c0_17] : memref<1x4x6x512xbf16, #tpu.memory_space<vmem>>, vector<1x1x6x512xbf16>
    %39 = vector.shape_cast %38 : vector<1x1x6x512xbf16> to vector<6x512xbf16>
    %40 = vector.shape_cast %37 : vector<6x512xbf16> to vector<1x1x6x512xbf16>
    tpu.vector_store %arg5[%c0_15, %c2, %c0_16, %c0_17], %40 {strides = array<i32>} : memref<1x4x6x512xbf16, #tpu.memory_space<vmem>>, vector<1x1x6x512xbf16>,
    %41 = vector.extract_strided_slice %6 {offsets = [36, 0], sizes = [6, 512], strides = [1, 1]} : vector<48x512xf32> to vector<6x512xf32>
    %42 = vector.extract_strided_slice %6 {offsets = [42, 0], sizes = [6, 512], strides = [1, 1]} : vector<48x512xf32> to vector<6x512xf32>
    %43 = arith.maximumf %41, %42 : vector<6x512xf32>
    %44 = vector.broadcast %7 : vector<6x1xf32> to vector<6x512xf32>
    %45 = arith.addf %43, %44 : vector<6x512xf32>
    %cst_18 = arith.constant 0.000000e+00 : f32
    %46 = vector.broadcast %cst_18 : f32 to vector<6x512xf32>
    %47 = arith.maximumf %45, %46 : vector<6x512xf32>
    %48 = arith.truncf %47 : vector<6x512xf32> to vector<6x512xbf16>
    %c0_19 = arith.constant 0 : index
    %c3 = arith.constant 3 : index
    %c0_20 = arith.constant 0 : index
    %c0_21 = arith.constant 0 : index
    %49 = vector.load %arg5[%c0_19, %c3, %c0_20, %c0_21] : memref<1x4x6x512xbf16, #tpu.memory_space<vmem>>, vector<1x1x6x512xbf16>
    %50 = vector.shape_cast %49 : vector<1x1x6x512xbf16> to vector<6x512xbf16>
    %51 = vector.shape_cast %48 : vector<6x512xbf16> to vector<1x1x6x512xbf16>
    tpu.vector_store %arg5[%c0_19, %c3, %c0_20, %c0_21], %51 {strides = array<i32>} : memref<1x4x6x512xbf16, #tpu.memory_space<vmem>>, vector<1x1x6x512xbf16>,
    return
  }
  func.func @transform_0(%arg0: i32, %arg1: i32) -> (i32, i32, i32) {
    %c0_i32 = arith.constant 0 : i32
    %c0_i32_0 = arith.constant 0 : i32
    %c0_i32_1 = arith.constant 0 : i32
    return %arg0, %c0_i32, %c0_i32_0 : i32, i32, i32
  }
  func.func @transform_1(%arg0: i32, %arg1: i32) -> (i32, i32) {
    %c0_i32 = arith.constant 0 : i32
    %c0_i32_0 = arith.constant 0 : i32
    %c0_i32_1 = arith.constant 0 : i32
    return %c0_i32, %c0_i32_0 : i32, i32
  }
  func.func @transform_2(%arg0: i32, %arg1: i32) -> (i32, i32) {
    %c0_i32 = arith.constant 0 : i32
    %c0_i32_0 = arith.constant 0 : i32
    %c0_i32_1 = arith.constant 0 : i32
    return %c0_i32, %c0_i32_0 : i32, i32
  }
  func.func @transform_3(%arg0: i32, %arg1: i32) -> (i32, i32, i32, i32) {
    %c0_i32 = arith.constant 0 : i32
    %c0_i32_0 = arith.constant 0 : i32
    %c0_i32_1 = arith.constant 0 : i32
    return %arg0, %arg1, %c0_i32, %c0_i32_0 : i32, i32, i32, i32
  }
}

module attributes {stable_mosaic.version = 11 : i64} {
  func.func @conv_pool_kernel(%arg0: i32, %arg1: i32, %arg2: memref<1x8064x256xbf16, #tpu.memory_space<vmem>>, %arg3: memref<128x384xbf16, #tpu.memory_space<vmem>>, %arg4: memref<16x1xf32, #tpu.memory_space<vmem>>, %arg5: memref<1x4x16x256xbf16, #tpu.memory_space<vmem>>) attributes {dimension_semantics = [#tpu.dimension_semantics<parallel>, #tpu.dimension_semantics<parallel>], iteration_bounds = array<i64: 2, 31>, scalar_prefetch = 0 : i64, scratch_operands = 0 : i64, tpu.core_type = #tpu.core_type<tc>, window_params = [{transform_indices = @transform_0, window_bounds = array<i64: 1, 8064, 256>}, {pipeline_mode = #tpu.pipeline_mode<synchronous>, transform_indices = @transform_1, window_bounds = array<i64: 128, 384>}, {pipeline_mode = #tpu.pipeline_mode<synchronous>, transform_indices = @transform_2, window_bounds = array<i64: 16, 1>}, {transform_indices = @transform_3, window_bounds = array<i64: 1, 4, 16, 256>}]} {
    %c256_i32 = arith.constant 256 : i32
    %0 = arith.muli %arg1, %c256_i32 : i32
    %1 = tpu.assume_multiple %0, 128 : i32
    %c0 = arith.constant 0 : index
    %2 = arith.index_cast %1 : i32 to index
    %c0_0 = arith.constant 0 : index
    %3 = vector.load %arg2[%c0, %2, %c0_0] : memref<1x8064x256xbf16, #tpu.memory_space<vmem>>, vector<1x384x256xbf16>
    %4 = vector.shape_cast %3 : vector<1x384x256xbf16> to vector<384x256xbf16>
    %c0_1 = arith.constant 0 : index
    %c0_2 = arith.constant 0 : index
    %5 = vector.load %arg3[%c0_1, %c0_2] : memref<128x384xbf16, #tpu.memory_space<vmem>>, vector<128x384xbf16>
    %cst = arith.constant dense<0.000000e+00> : vector<128x256xf32>
    %6 = tpu.matmul %5, %4, %cst {dimension_numbers = #tpu.dot_dimension_numbers<[1], [0], [0], [1], [0, 0, 1, 1], [], []>} : vector<128x384xbf16>, vector<384x256xbf16>, vector<128x256xf32> -> vector<128x256xf32>
    %c0_3 = arith.constant 0 : index
    %c0_4 = arith.constant 0 : index
    %7 = vector.load %arg4[%c0_3, %c0_4] : memref<16x1xf32, #tpu.memory_space<vmem>>, vector<16x1xf32>
    %8 = vector.extract_strided_slice %6 {offsets = [0, 0], sizes = [16, 256], strides = [1, 1]} : vector<128x256xf32> to vector<16x256xf32>
    %9 = vector.extract_strided_slice %6 {offsets = [16, 0], sizes = [16, 256], strides = [1, 1]} : vector<128x256xf32> to vector<16x256xf32>
    %10 = arith.maximumf %8, %9 : vector<16x256xf32>
    %11 = vector.broadcast %7 : vector<16x1xf32> to vector<16x256xf32>
    %12 = arith.addf %10, %11 : vector<16x256xf32>
    %cst_5 = arith.constant 0.000000e+00 : f32
    %13 = vector.broadcast %cst_5 : f32 to vector<16x256xf32>
    %14 = arith.maximumf %12, %13 : vector<16x256xf32>
    %15 = arith.truncf %14 : vector<16x256xf32> to vector<16x256xbf16>
    %c0_6 = arith.constant 0 : index
    %c0_7 = arith.constant 0 : index
    %c0_8 = arith.constant 0 : index
    %c0_9 = arith.constant 0 : index
    %16 = vector.load %arg5[%c0_6, %c0_7, %c0_8, %c0_9] : memref<1x4x16x256xbf16, #tpu.memory_space<vmem>>, vector<1x1x16x256xbf16>
    %17 = vector.shape_cast %16 : vector<1x1x16x256xbf16> to vector<16x256xbf16>
    %18 = vector.shape_cast %15 : vector<16x256xbf16> to vector<1x1x16x256xbf16>
    tpu.vector_store %arg5[%c0_6, %c0_7, %c0_8, %c0_9], %18 {strides = array<i32>} : memref<1x4x16x256xbf16, #tpu.memory_space<vmem>>, vector<1x1x16x256xbf16>,
    %19 = vector.extract_strided_slice %6 {offsets = [32, 0], sizes = [16, 256], strides = [1, 1]} : vector<128x256xf32> to vector<16x256xf32>
    %20 = vector.extract_strided_slice %6 {offsets = [48, 0], sizes = [16, 256], strides = [1, 1]} : vector<128x256xf32> to vector<16x256xf32>
    %21 = arith.maximumf %19, %20 : vector<16x256xf32>
    %22 = vector.broadcast %7 : vector<16x1xf32> to vector<16x256xf32>
    %23 = arith.addf %21, %22 : vector<16x256xf32>
    %cst_10 = arith.constant 0.000000e+00 : f32
    %24 = vector.broadcast %cst_10 : f32 to vector<16x256xf32>
    %25 = arith.maximumf %23, %24 : vector<16x256xf32>
    %26 = arith.truncf %25 : vector<16x256xf32> to vector<16x256xbf16>
    %c0_11 = arith.constant 0 : index
    %c1 = arith.constant 1 : index
    %c0_12 = arith.constant 0 : index
    %c0_13 = arith.constant 0 : index
    %27 = vector.load %arg5[%c0_11, %c1, %c0_12, %c0_13] : memref<1x4x16x256xbf16, #tpu.memory_space<vmem>>, vector<1x1x16x256xbf16>
    %28 = vector.shape_cast %27 : vector<1x1x16x256xbf16> to vector<16x256xbf16>
    %29 = vector.shape_cast %26 : vector<16x256xbf16> to vector<1x1x16x256xbf16>
    tpu.vector_store %arg5[%c0_11, %c1, %c0_12, %c0_13], %29 {strides = array<i32>} : memref<1x4x16x256xbf16, #tpu.memory_space<vmem>>, vector<1x1x16x256xbf16>,
    %30 = vector.extract_strided_slice %6 {offsets = [64, 0], sizes = [16, 256], strides = [1, 1]} : vector<128x256xf32> to vector<16x256xf32>
    %31 = vector.extract_strided_slice %6 {offsets = [80, 0], sizes = [16, 256], strides = [1, 1]} : vector<128x256xf32> to vector<16x256xf32>
    %32 = arith.maximumf %30, %31 : vector<16x256xf32>
    %33 = vector.broadcast %7 : vector<16x1xf32> to vector<16x256xf32>
    %34 = arith.addf %32, %33 : vector<16x256xf32>
    %cst_14 = arith.constant 0.000000e+00 : f32
    %35 = vector.broadcast %cst_14 : f32 to vector<16x256xf32>
    %36 = arith.maximumf %34, %35 : vector<16x256xf32>
    %37 = arith.truncf %36 : vector<16x256xf32> to vector<16x256xbf16>
    %c0_15 = arith.constant 0 : index
    %c2 = arith.constant 2 : index
    %c0_16 = arith.constant 0 : index
    %c0_17 = arith.constant 0 : index
    %38 = vector.load %arg5[%c0_15, %c2, %c0_16, %c0_17] : memref<1x4x16x256xbf16, #tpu.memory_space<vmem>>, vector<1x1x16x256xbf16>
    %39 = vector.shape_cast %38 : vector<1x1x16x256xbf16> to vector<16x256xbf16>
    %40 = vector.shape_cast %37 : vector<16x256xbf16> to vector<1x1x16x256xbf16>
    tpu.vector_store %arg5[%c0_15, %c2, %c0_16, %c0_17], %40 {strides = array<i32>} : memref<1x4x16x256xbf16, #tpu.memory_space<vmem>>, vector<1x1x16x256xbf16>,
    %41 = vector.extract_strided_slice %6 {offsets = [96, 0], sizes = [16, 256], strides = [1, 1]} : vector<128x256xf32> to vector<16x256xf32>
    %42 = vector.extract_strided_slice %6 {offsets = [112, 0], sizes = [16, 256], strides = [1, 1]} : vector<128x256xf32> to vector<16x256xf32>
    %43 = arith.maximumf %41, %42 : vector<16x256xf32>
    %44 = vector.broadcast %7 : vector<16x1xf32> to vector<16x256xf32>
    %45 = arith.addf %43, %44 : vector<16x256xf32>
    %cst_18 = arith.constant 0.000000e+00 : f32
    %46 = vector.broadcast %cst_18 : f32 to vector<16x256xf32>
    %47 = arith.maximumf %45, %46 : vector<16x256xf32>
    %48 = arith.truncf %47 : vector<16x256xf32> to vector<16x256xbf16>
    %c0_19 = arith.constant 0 : index
    %c3 = arith.constant 3 : index
    %c0_20 = arith.constant 0 : index
    %c0_21 = arith.constant 0 : index
    %49 = vector.load %arg5[%c0_19, %c3, %c0_20, %c0_21] : memref<1x4x16x256xbf16, #tpu.memory_space<vmem>>, vector<1x1x16x256xbf16>
    %50 = vector.shape_cast %49 : vector<1x1x16x256xbf16> to vector<16x256xbf16>
    %51 = vector.shape_cast %48 : vector<16x256xbf16> to vector<1x1x16x256xbf16>
    tpu.vector_store %arg5[%c0_19, %c3, %c0_20, %c0_21], %51 {strides = array<i32>} : memref<1x4x16x256xbf16, #tpu.memory_space<vmem>>, vector<1x1x16x256xbf16>,
    return
  }
  func.func @transform_0(%arg0: i32, %arg1: i32) -> (i32, i32, i32) {
    %c0_i32 = arith.constant 0 : i32
    %c0_i32_0 = arith.constant 0 : i32
    %c0_i32_1 = arith.constant 0 : i32
    return %arg0, %c0_i32, %c0_i32_0 : i32, i32, i32
  }
  func.func @transform_1(%arg0: i32, %arg1: i32) -> (i32, i32) {
    %c0_i32 = arith.constant 0 : i32
    %c0_i32_0 = arith.constant 0 : i32
    %c0_i32_1 = arith.constant 0 : i32
    return %c0_i32, %c0_i32_0 : i32, i32
  }
  func.func @transform_2(%arg0: i32, %arg1: i32) -> (i32, i32) {
    %c0_i32 = arith.constant 0 : i32
    %c0_i32_0 = arith.constant 0 : i32
    %c0_i32_1 = arith.constant 0 : i32
    return %c0_i32, %c0_i32_0 : i32, i32
  }
  func.func @transform_3(%arg0: i32, %arg1: i32) -> (i32, i32, i32, i32) {
    %c0_i32 = arith.constant 0 : i32
    %c0_i32_0 = arith.constant 0 : i32
    %c0_i32_1 = arith.constant 0 : i32
    return %arg0, %arg1, %c0_i32, %c0_i32_0 : i32, i32, i32, i32
  }
}

module attributes {stable_mosaic.version = 11 : i64} {
  func.func @conv_pool_kernel(%arg0: i32, %arg1: i32, %arg2: memref<1x9920x128xbf16, #tpu.memory_space<vmem>>, %arg3: memref<128x960xbf16, #tpu.memory_space<vmem>>, %arg4: memref<16x1xf32, #tpu.memory_space<vmem>>, %arg5: memref<1x4x16x128xbf16, #tpu.memory_space<vmem>>) attributes {dimension_semantics = [#tpu.dimension_semantics<parallel>, #tpu.dimension_semantics<parallel>], iteration_bounds = array<i64: 2, 15>, scalar_prefetch = 0 : i64, scratch_operands = 0 : i64, tpu.core_type = #tpu.core_type<tc>, window_params = [{transform_indices = @transform_0, window_bounds = array<i64: 1, 9920, 128>}, {pipeline_mode = #tpu.pipeline_mode<synchronous>, transform_indices = @transform_1, window_bounds = array<i64: 128, 960>}, {pipeline_mode = #tpu.pipeline_mode<synchronous>, transform_indices = @transform_2, window_bounds = array<i64: 16, 1>}, {transform_indices = @transform_3, window_bounds = array<i64: 1, 4, 16, 128>}]} {
    %c640_i32 = arith.constant 640 : i32
    %0 = arith.muli %arg1, %c640_i32 : i32
    %1 = tpu.assume_multiple %0, 128 : i32
    %c0 = arith.constant 0 : index
    %2 = arith.index_cast %1 : i32 to index
    %c0_0 = arith.constant 0 : index
    %3 = vector.load %arg2[%c0, %2, %c0_0] : memref<1x9920x128xbf16, #tpu.memory_space<vmem>>, vector<1x960x128xbf16>
    %4 = vector.shape_cast %3 : vector<1x960x128xbf16> to vector<960x128xbf16>
    %c0_1 = arith.constant 0 : index
    %c0_2 = arith.constant 0 : index
    %5 = vector.load %arg3[%c0_1, %c0_2] : memref<128x960xbf16, #tpu.memory_space<vmem>>, vector<128x960xbf16>
    %cst = arith.constant dense<0.000000e+00> : vector<128x128xf32>
    %6 = tpu.matmul %5, %4, %cst {dimension_numbers = #tpu.dot_dimension_numbers<[1], [0], [0], [1], [0, 0, 1, 1], [], []>} : vector<128x960xbf16>, vector<960x128xbf16>, vector<128x128xf32> -> vector<128x128xf32>
    %c0_3 = arith.constant 0 : index
    %c0_4 = arith.constant 0 : index
    %7 = vector.load %arg4[%c0_3, %c0_4] : memref<16x1xf32, #tpu.memory_space<vmem>>, vector<16x1xf32>
    %8 = vector.extract_strided_slice %6 {offsets = [0, 0], sizes = [16, 128], strides = [1, 1]} : vector<128x128xf32> to vector<16x128xf32>
    %9 = vector.extract_strided_slice %6 {offsets = [16, 0], sizes = [16, 128], strides = [1, 1]} : vector<128x128xf32> to vector<16x128xf32>
    %10 = arith.maximumf %8, %9 : vector<16x128xf32>
    %11 = vector.broadcast %7 : vector<16x1xf32> to vector<16x128xf32>
    %12 = arith.addf %10, %11 : vector<16x128xf32>
    %cst_5 = arith.constant 0.000000e+00 : f32
    %13 = vector.broadcast %cst_5 : f32 to vector<16x128xf32>
    %14 = arith.maximumf %12, %13 : vector<16x128xf32>
    %15 = arith.truncf %14 : vector<16x128xf32> to vector<16x128xbf16>
    %c0_6 = arith.constant 0 : index
    %c0_7 = arith.constant 0 : index
    %c0_8 = arith.constant 0 : index
    %c0_9 = arith.constant 0 : index
    %16 = vector.load %arg5[%c0_6, %c0_7, %c0_8, %c0_9] : memref<1x4x16x128xbf16, #tpu.memory_space<vmem>>, vector<1x1x16x128xbf16>
    %17 = vector.shape_cast %16 : vector<1x1x16x128xbf16> to vector<16x128xbf16>
    %18 = vector.shape_cast %15 : vector<16x128xbf16> to vector<1x1x16x128xbf16>
    tpu.vector_store %arg5[%c0_6, %c0_7, %c0_8, %c0_9], %18 {strides = array<i32>} : memref<1x4x16x128xbf16, #tpu.memory_space<vmem>>, vector<1x1x16x128xbf16>,
    %19 = vector.extract_strided_slice %6 {offsets = [32, 0], sizes = [16, 128], strides = [1, 1]} : vector<128x128xf32> to vector<16x128xf32>
    %20 = vector.extract_strided_slice %6 {offsets = [48, 0], sizes = [16, 128], strides = [1, 1]} : vector<128x128xf32> to vector<16x128xf32>
    %21 = arith.maximumf %19, %20 : vector<16x128xf32>
    %22 = vector.broadcast %7 : vector<16x1xf32> to vector<16x128xf32>
    %23 = arith.addf %21, %22 : vector<16x128xf32>
    %cst_10 = arith.constant 0.000000e+00 : f32
    %24 = vector.broadcast %cst_10 : f32 to vector<16x128xf32>
    %25 = arith.maximumf %23, %24 : vector<16x128xf32>
    %26 = arith.truncf %25 : vector<16x128xf32> to vector<16x128xbf16>
    %c0_11 = arith.constant 0 : index
    %c1 = arith.constant 1 : index
    %c0_12 = arith.constant 0 : index
    %c0_13 = arith.constant 0 : index
    %27 = vector.load %arg5[%c0_11, %c1, %c0_12, %c0_13] : memref<1x4x16x128xbf16, #tpu.memory_space<vmem>>, vector<1x1x16x128xbf16>
    %28 = vector.shape_cast %27 : vector<1x1x16x128xbf16> to vector<16x128xbf16>
    %29 = vector.shape_cast %26 : vector<16x128xbf16> to vector<1x1x16x128xbf16>
    tpu.vector_store %arg5[%c0_11, %c1, %c0_12, %c0_13], %29 {strides = array<i32>} : memref<1x4x16x128xbf16, #tpu.memory_space<vmem>>, vector<1x1x16x128xbf16>,
    %30 = vector.extract_strided_slice %6 {offsets = [64, 0], sizes = [16, 128], strides = [1, 1]} : vector<128x128xf32> to vector<16x128xf32>
    %31 = vector.extract_strided_slice %6 {offsets = [80, 0], sizes = [16, 128], strides = [1, 1]} : vector<128x128xf32> to vector<16x128xf32>
    %32 = arith.maximumf %30, %31 : vector<16x128xf32>
    %33 = vector.broadcast %7 : vector<16x1xf32> to vector<16x128xf32>
    %34 = arith.addf %32, %33 : vector<16x128xf32>
    %cst_14 = arith.constant 0.000000e+00 : f32
    %35 = vector.broadcast %cst_14 : f32 to vector<16x128xf32>
    %36 = arith.maximumf %34, %35 : vector<16x128xf32>
    %37 = arith.truncf %36 : vector<16x128xf32> to vector<16x128xbf16>
    %c0_15 = arith.constant 0 : index
    %c2 = arith.constant 2 : index
    %c0_16 = arith.constant 0 : index
    %c0_17 = arith.constant 0 : index
    %38 = vector.load %arg5[%c0_15, %c2, %c0_16, %c0_17] : memref<1x4x16x128xbf16, #tpu.memory_space<vmem>>, vector<1x1x16x128xbf16>
    %39 = vector.shape_cast %38 : vector<1x1x16x128xbf16> to vector<16x128xbf16>
    %40 = vector.shape_cast %37 : vector<16x128xbf16> to vector<1x1x16x128xbf16>
    tpu.vector_store %arg5[%c0_15, %c2, %c0_16, %c0_17], %40 {strides = array<i32>} : memref<1x4x16x128xbf16, #tpu.memory_space<vmem>>, vector<1x1x16x128xbf16>,
    %41 = vector.extract_strided_slice %6 {offsets = [96, 0], sizes = [16, 128], strides = [1, 1]} : vector<128x128xf32> to vector<16x128xf32>
    %42 = vector.extract_strided_slice %6 {offsets = [112, 0], sizes = [16, 128], strides = [1, 1]} : vector<128x128xf32> to vector<16x128xf32>
    %43 = arith.maximumf %41, %42 : vector<16x128xf32>
    %44 = vector.broadcast %7 : vector<16x1xf32> to vector<16x128xf32>
    %45 = arith.addf %43, %44 : vector<16x128xf32>
    %cst_18 = arith.constant 0.000000e+00 : f32
    %46 = vector.broadcast %cst_18 : f32 to vector<16x128xf32>
    %47 = arith.maximumf %45, %46 : vector<16x128xf32>
    %48 = arith.truncf %47 : vector<16x128xf32> to vector<16x128xbf16>
    %c0_19 = arith.constant 0 : index
    %c3 = arith.constant 3 : index
    %c0_20 = arith.constant 0 : index
    %c0_21 = arith.constant 0 : index
    %49 = vector.load %arg5[%c0_19, %c3, %c0_20, %c0_21] : memref<1x4x16x128xbf16, #tpu.memory_space<vmem>>, vector<1x1x16x128xbf16>
    %50 = vector.shape_cast %49 : vector<1x1x16x128xbf16> to vector<16x128xbf16>
    %51 = vector.shape_cast %48 : vector<16x128xbf16> to vector<1x1x16x128xbf16>
    tpu.vector_store %arg5[%c0_19, %c3, %c0_20, %c0_21], %51 {strides = array<i32>} : memref<1x4x16x128xbf16, #tpu.memory_space<vmem>>, vector<1x1x16x128xbf16>,
    return
  }
  func.func @transform_0(%arg0: i32, %arg1: i32) -> (i32, i32, i32) {
    %c0_i32 = arith.constant 0 : i32
    %c0_i32_0 = arith.constant 0 : i32
    %c0_i32_1 = arith.constant 0 : i32
    return %arg0, %c0_i32, %c0_i32_0 : i32, i32, i32
  }
  func.func @transform_1(%arg0: i32, %arg1: i32) -> (i32, i32) {
    %c0_i32 = arith.constant 0 : i32
    %c0_i32_0 = arith.constant 0 : i32
    %c0_i32_1 = arith.constant 0 : i32
    return %c0_i32, %c0_i32_0 : i32, i32
  }
  func.func @transform_2(%arg0: i32, %arg1: i32) -> (i32, i32) {
    %c0_i32 = arith.constant 0 : i32
    %c0_i32_0 = arith.constant 0 : i32
    %c0_i32_1 = arith.constant 0 : i32
    return %c0_i32, %c0_i32_0 : i32, i32
  }
  func.func @transform_3(%arg0: i32, %arg1: i32) -> (i32, i32, i32, i32) {
    %c0_i32 = arith.constant 0 : i32
    %c0_i32_0 = arith.constant 0 : i32
    %c0_i32_1 = arith.constant 0 : i32
    return %arg0, %arg1, %c0_i32, %c0_i32_0 : i32, i32, i32, i32
  }
}

module attributes {stable_mosaic.version = 11 : i64} {
  func.func @lin1_partial_kernel(%arg0: i32, %arg1: i32, %arg2: memref<8x9600xbf16, #tpu.memory_space<vmem>>, %arg3: memref<9600x64xbf16, #tpu.memory_space<vmem>>, %arg4: memref<1x8x64xf32, #tpu.memory_space<vmem>>, %arg5: memref<8x64xf32, #tpu.memory_space<vmem>>) attributes {dimension_semantics = [#tpu.dimension_semantics<parallel>, #tpu.dimension_semantics<arbitrary>], iteration_bounds = array<i64: 2, 3>, scalar_prefetch = 0 : i64, scratch_operands = 1 : i64, tpu.core_type = #tpu.core_type<tc>, window_params = [{transform_indices = @transform_0, window_bounds = array<i64: 8, 9600>}, {transform_indices = @transform_1, window_bounds = array<i64: 9600, 64>}, {transform_indices = @transform_2, window_bounds = array<i64: 1, 8, 64>}]} {
    %c0_i32 = arith.constant 0 : i32
    %0 = arith.cmpi eq, %arg1, %c0_i32 : i32
    %1 = arith.extui %0 : i1 to i32
    %c0_i32_0 = arith.constant 0 : i32
    %2 = arith.cmpi ne, %1, %c0_i32_0 : i32
    scf.if %2 {
      %cst_9 = arith.constant 0.000000e+00 : f32
      %12 = vector.broadcast %cst_9 : f32 to vector<8x64xf32>
      %c0_10 = arith.constant 0 : index
      %c0_11 = arith.constant 0 : index
      %13 = vector.load %arg5[%c0_10, %c0_11] : memref<8x64xf32, #tpu.memory_space<vmem>>, vector<8x64xf32>
      tpu.vector_store %arg5[%c0_10, %c0_11], %12 {strides = array<i32>} : memref<8x64xf32, #tpu.memory_space<vmem>>, vector<8x64xf32>,
    } else {
    }
    %c0 = arith.constant 0 : index
    %c0_1 = arith.constant 0 : index
    %3 = vector.load %arg5[%c0, %c0_1] : memref<8x64xf32, #tpu.memory_space<vmem>>, vector<8x64xf32>
    %c0_2 = arith.constant 0 : index
    %c0_3 = arith.constant 0 : index
    %4 = vector.load %arg2[%c0_2, %c0_3] : memref<8x9600xbf16, #tpu.memory_space<vmem>>, vector<8x9600xbf16>
    %c0_4 = arith.constant 0 : index
    %c0_5 = arith.constant 0 : index
    %5 = vector.load %arg3[%c0_4, %c0_5] : memref<9600x64xbf16, #tpu.memory_space<vmem>>, vector<9600x64xbf16>
    %cst = arith.constant dense<0.000000e+00> : vector<8x64xf32>
    %6 = tpu.matmul %4, %5, %cst {dimension_numbers = #tpu.dot_dimension_numbers<[1], [0], [0], [1], [0, 0, 1, 1], [], []>} : vector<8x9600xbf16>, vector<9600x64xbf16>, vector<8x64xf32> -> vector<8x64xf32>
    %7 = arith.addf %3, %6 : vector<8x64xf32>
    %c0_6 = arith.constant 0 : index
    %c0_7 = arith.constant 0 : index
    %8 = vector.load %arg5[%c0_6, %c0_7] : memref<8x64xf32, #tpu.memory_space<vmem>>, vector<8x64xf32>
    tpu.vector_store %arg5[%c0_6, %c0_7], %7 {strides = array<i32>} : memref<8x64xf32, #tpu.memory_space<vmem>>, vector<8x64xf32>,
    %c2_i32 = arith.constant 2 : i32
    %9 = arith.cmpi eq, %arg1, %c2_i32 : i32
    %10 = arith.extui %9 : i1 to i32
    %c0_i32_8 = arith.constant 0 : i32
    %11 = arith.cmpi ne, %10, %c0_i32_8 : i32
    scf.if %11 {
      %c0_9 = arith.constant 0 : index
      %c0_10 = arith.constant 0 : index
      %12 = vector.load %arg5[%c0_9, %c0_10] : memref<8x64xf32, #tpu.memory_space<vmem>>, vector<8x64xf32>
      %c0_11 = arith.constant 0 : index
      %c0_12 = arith.constant 0 : index
      %c0_13 = arith.constant 0 : index
      %13 = vector.load %arg4[%c0_11, %c0_12, %c0_13] : memref<1x8x64xf32, #tpu.memory_space<vmem>>, vector<1x8x64xf32>
      %14 = vector.shape_cast %13 : vector<1x8x64xf32> to vector<8x64xf32>
      %15 = vector.shape_cast %12 : vector<8x64xf32> to vector<1x8x64xf32>
      tpu.vector_store %arg4[%c0_11, %c0_12, %c0_13], %15 {strides = array<i32>} : memref<1x8x64xf32, #tpu.memory_space<vmem>>, vector<1x8x64xf32>,
    } else {
    }
    return
  }
  func.func @transform_0(%arg0: i32, %arg1: i32) -> (i32, i32) {
    %c3_i32 = arith.constant 3 : i32
    %0 = arith.muli %arg0, %c3_i32 : i32
    %1 = arith.addi %0, %arg1 : i32
    %c0_i32 = arith.constant 0 : i32
    %c0_i32_0 = arith.constant 0 : i32
    return %c0_i32, %1 : i32, i32
  }
  func.func @transform_1(%arg0: i32, %arg1: i32) -> (i32, i32) {
    %c3_i32 = arith.constant 3 : i32
    %0 = arith.muli %arg0, %c3_i32 : i32
    %1 = arith.addi %0, %arg1 : i32
    %c0_i32 = arith.constant 0 : i32
    %c0_i32_0 = arith.constant 0 : i32
    return %1, %c0_i32 : i32, i32
  }
  func.func @transform_2(%arg0: i32, %arg1: i32) -> (i32, i32, i32) {
    %c0_i32 = arith.constant 0 : i32
    %c0_i32_0 = arith.constant 0 : i32
    %c0_i32_1 = arith.constant 0 : i32
    return %arg0, %c0_i32, %c0_i32_0 : i32, i32, i32
  }
}

module attributes {stable_mosaic.version = 11 : i64} {
  func.func @head_kernel(%arg0: i32, %arg1: memref<2x8x64xf32, #tpu.memory_space<vmem>>, %arg2: memref<1x64xf32, #tpu.memory_space<vmem>>, %arg3: memref<64x10xf32, #tpu.memory_space<vmem>>, %arg4: memref<1x10xf32, #tpu.memory_space<vmem>>, %arg5: memref<8x10xf32, #tpu.memory_space<vmem>>) attributes {dimension_semantics = [#tpu.dimension_semantics<arbitrary>], iteration_bounds = array<i64: 1>, scalar_prefetch = 0 : i64, scratch_operands = 0 : i64, tpu.core_type = #tpu.core_type<tc>, window_params = [{pipeline_mode = #tpu.pipeline_mode<synchronous>, transform_indices = @transform_0, window_bounds = array<i64: 2, 8, 64>}, {pipeline_mode = #tpu.pipeline_mode<synchronous>, transform_indices = @transform_1, window_bounds = array<i64: 1, 64>}, {pipeline_mode = #tpu.pipeline_mode<synchronous>, transform_indices = @transform_2, window_bounds = array<i64: 64, 10>}, {pipeline_mode = #tpu.pipeline_mode<synchronous>, transform_indices = @transform_3, window_bounds = array<i64: 1, 10>}, {pipeline_mode = #tpu.pipeline_mode<synchronous>, transform_indices = @transform_4, window_bounds = array<i64: 8, 10>}]} {
    %c0 = arith.constant 0 : index
    %c0_0 = arith.constant 0 : index
    %c0_1 = arith.constant 0 : index
    %0 = vector.load %arg1[%c0, %c0_0, %c0_1] : memref<2x8x64xf32, #tpu.memory_space<vmem>>, vector<1x8x64xf32>
    %1 = vector.shape_cast %0 : vector<1x8x64xf32> to vector<8x64xf32>
    %c1 = arith.constant 1 : index
    %c0_2 = arith.constant 0 : index
    %c0_3 = arith.constant 0 : index
    %2 = vector.load %arg1[%c1, %c0_2, %c0_3] : memref<2x8x64xf32, #tpu.memory_space<vmem>>, vector<1x8x64xf32>
    %3 = vector.shape_cast %2 : vector<1x8x64xf32> to vector<8x64xf32>
    %4 = arith.addf %1, %3 : vector<8x64xf32>
    %c0_4 = arith.constant 0 : index
    %c0_5 = arith.constant 0 : index
    %5 = vector.load %arg2[%c0_4, %c0_5] : memref<1x64xf32, #tpu.memory_space<vmem>>, vector<1x64xf32>
    %6 = vector.broadcast %5 : vector<1x64xf32> to vector<8x64xf32>
    %7 = arith.addf %4, %6 : vector<8x64xf32>
    %cst = arith.constant 0.000000e+00 : f32
    %8 = vector.broadcast %cst : f32 to vector<8x64xf32>
    %9 = arith.maximumf %7, %8 : vector<8x64xf32>
    %c0_6 = arith.constant 0 : index
    %c0_7 = arith.constant 0 : index
    %10 = vector.load %arg3[%c0_6, %c0_7] : memref<64x10xf32, #tpu.memory_space<vmem>>, vector<64x10xf32>
    %cst_8 = arith.constant dense<0.000000e+00> : vector<8x10xf32>
    %11 = tpu.matmul %9, %10, %cst_8 {dimension_numbers = #tpu.dot_dimension_numbers<[1], [0], [0], [1], [0, 0, 1, 1], [], []>} : vector<8x64xf32>, vector<64x10xf32>, vector<8x10xf32> -> vector<8x10xf32>
    %c0_9 = arith.constant 0 : index
    %c0_10 = arith.constant 0 : index
    %12 = vector.load %arg4[%c0_9, %c0_10] : memref<1x10xf32, #tpu.memory_space<vmem>>, vector<1x10xf32>
    %13 = vector.broadcast %12 : vector<1x10xf32> to vector<8x10xf32>
    %14 = arith.addf %11, %13 : vector<8x10xf32>
    %c0_11 = arith.constant 0 : index
    %c0_12 = arith.constant 0 : index
    %15 = vector.load %arg5[%c0_11, %c0_12] : memref<8x10xf32, #tpu.memory_space<vmem>>, vector<8x10xf32>
    tpu.vector_store %arg5[%c0_11, %c0_12], %14 {strides = array<i32>} : memref<8x10xf32, #tpu.memory_space<vmem>>, vector<8x10xf32>,
    return
  }
  func.func @transform_0(%arg0: i32) -> (i32, i32, i32) {
    %c0_i32 = arith.constant 0 : i32
    %c0_i32_0 = arith.constant 0 : i32
    %c0_i32_1 = arith.constant 0 : i32
    %c0_i32_2 = arith.constant 0 : i32
    return %c0_i32, %c0_i32_0, %c0_i32_1 : i32, i32, i32
  }
  func.func @transform_1(%arg0: i32) -> (i32, i32) {
    %c0_i32 = arith.constant 0 : i32
    %c0_i32_0 = arith.constant 0 : i32
    %c0_i32_1 = arith.constant 0 : i32
    return %c0_i32, %c0_i32_0 : i32, i32
  }
  func.func @transform_2(%arg0: i32) -> (i32, i32) {
    %c0_i32 = arith.constant 0 : i32
    %c0_i32_0 = arith.constant 0 : i32
    %c0_i32_1 = arith.constant 0 : i32
    return %c0_i32, %c0_i32_0 : i32, i32
  }
  func.func @transform_3(%arg0: i32) -> (i32, i32) {
    %c0_i32 = arith.constant 0 : i32
    %c0_i32_0 = arith.constant 0 : i32
    %c0_i32_1 = arith.constant 0 : i32
    return %c0_i32, %c0_i32_0 : i32, i32
  }
  func.func @transform_4(%arg0: i32) -> (i32, i32) {
    %c0_i32 = arith.constant 0 : i32
    %c0_i32_0 = arith.constant 0 : i32
    %c0_i32_1 = arith.constant 0 : i32
    return %c0_i32, %c0_i32_0 : i32, i32
  }
}

</mosaic_0001>

<bundles_post_ra>
// kernel: simple_cnn_forward.5
= control target key start
LH: loop header
LB: loop body
LE: loop exit
PB: predicated region body
PF: predicated region fallthrough
CT: control target
= control target key end

     0   :  { %8 = vsyncpa [#allocation3], 0  ;;  %s1697_s0 = inlined_call_operand.vmem [shape: bf16[2,8128,512], index: 0, kind: input, shape index: {}]   ;;  %s1698_s1 = inlined_call_operand.vmem [shape: bf16[48,192], index: 1, kind: input, shape index: {}]   ;;  %s1699_s2 = inlined_call_operand.vmem [shape: f32[6,1], index: 2, kind: input, shape index: {}]   ;;  %s1700_s3 = inlined_call_operand.hbm [shape: bf16[2,252,6,512], index: 3, kind: output, shape index: {}]  }
   0x1   :  { %10 = vsyncpa [#allocation3 + $0x1], 0  ;;  %s1392_s12 = smov 0   ;;  %s1394_s13 = smov 0  }
   0x2   :  { %s1396_s14 = smov 0   ;;  %s1398_s15 = smov 0  }
   0x3   :  { %s1400_s16 = smov 0   ;;  %s1402_s17 = smov 0  }
   0x4   :  { %s1404_s18 = smov 0   ;;  %s1406_s19 = smov 0  }
   0x5 LB: > { %s1002_s20 = sadd.s32 4294967295, %s1366_s19   ;;  %s1003_s21 = sadd.s32 4294967294, %s1366_s19   ;;  %s1366_s19 = sphi %s1406_s19, %s16_s19   ;;  %s1362_s18 = sphi %s1404_s18, %s1711_s18   ;;  %s1358_s17 = sphi %s1402_s17, %s1710_s17   ;;  %s1354_s16 = sphi %s1400_s16, %s1709_s16   ;;  %s1350_s15 = sphi %s1398_s15, %s1708_s15   ;;  %s1346_s14 = sphi %s1396_s14, %s1707_s14   ;;  %s1342_s13 = sphi %s1394_s13, %s1706_s13   ;;  %s1338_s12 = sphi %s1392_s12, %s1705_s12  }
   0x6   : > { %s25_s22 = sadd.s32 1, %s1358_s17  ;;  %s28_s23 = sadd.s32 1, %s1362_s18 }
   0x7   : > { %p26_p0 = scmp.ge.s32.totalorder %s25_s22, 63  ;;  %p115_p1 = scmp.ne.s32.totalorder %s1346_s14, %s1342_s13 }
   0x8   : > { %p116_p2 = scmp.eq.s32.totalorder %s1002_s20, 125  ;;  %p121_p5 = scmp.ne.s32.totalorder %s1342_s13, %s1338_s12 }
   0x9   : > { %s1713_s22 = smov (%p26_p0, %s25_s22), 0  ;;  %s1715_s23 = smov (!%p26_p0, %s28_s23), %s1362_s18 }
   0xa   : > { %s101_s24 = ssub.s32 %s1358_s17, %s1713_s22  ;;  %p1443_p3 = por %p116_p2, %p115_p1 }
   0xb   : > { %p30_p4 = scmp.ge.s32.totalorder %s1715_s23, 2  ;;  %p122_p6 = scmp.eq.s32.totalorder %s1003_s21, 125 }
   0xc   : > { %p1006_p7 = scmp.ge.s32.totalorder %s1366_s19, 1  ;;  %p154_p9 = scmp.lt.s32.totalorder %s1366_s19, 127 }
   0xd   : > { %s1717_s23 = smov (%p30_p4, %s1715_s23), 0  ;;  %p1452_p8 = por %p122_p6, %p121_p5 }
   0xe   : > { %s100_s27 = ssub.s32 %s1362_s18, %s1717_s23  ;;  %s105_s28 = sadd.s32 1, %s1346_s14 }
   0xf   : > { %s102_s29 = sor.u32 %s101_s24, %s100_s27  ;;  %p155_p10 = pnand %p1006_p7, %p154_p9 }
  0x10   : > { %p103_p11 = scmp.eq.s32.totalorder %s102_s29, 0  ;;  %p178_p12 = scmp.lt.s32.totalorder (!%p155_p10), %s1354_s16, 1  ;;  %v1265_v0 = vld [vmem:[%s1698_s1 + $0x4] ss:$8 sps:$4 sm:$0xff] (!%p155_p10)   ;;  %vm512_vm0 = vcmask (!%p155_p10), 523264   ;;  %v1368_v2 = vmov (!%p155_p10), 0  }
  0x11   : > { %158 = sbr.rel (%p155_p10) target bundleno = 349 (0x15d), region = 32  ;;  %s1009_s4 = sshll.u32 (!%p155_p10), %s1350_s15, 7  ;;  %1066 = vmatprep.mubr.msk.bf16.mxu0 (!%p155_p10), %vm512_vm0, %v1265_v0  ;;  %1069 = vmatprep.mubr.msk.bf16.mxu1 (!%p155_p10), %vm512_vm0, %v1265_v0  ;;  %v648_v1 = vld [vmem:[%s1699_s2] sm:$0x3f] (!%p155_p10)  ;;  %v1266_v52 = vld [vmem:[%s1698_s1 + $0x14] ss:$8 sps:$4 sm:$0xff] (!%p155_p10)  }
  0x12   : > { %s1461_s30 = scalar_select %p103_p11, %s1346_s14, %s105_s28  }
  0x13   : > { %s186_s5 = sshra.s32 (!%p155_p10), %s1009_s4, 3  ;;  %1190 = vset.pattern.permute.xlu0 (!%p155_p10), %v1368_v2  ;;  %v1263_v51 = vld [vmem:[%s1698_s1] ss:$8 sps:$4 sm:$0xff] (!%p155_p10)   ;;  %v1268_v53 = vld [vmem:[%s1698_s1 + $0x10] ss:$8 sps:$4 sm:$0xff] (!%p155_p10)   ;;  %vm657_vm1 = vcmask (!%p155_p10), 1041408  }
  0x14   : > { %s1100_s10 = sshll.u32 (!%p155_p10), %s186_s5, 4  ;;  %680 = vperm.xlu0 (!%p155_p10), %1190, %v648_v1   ;;  %v1269_v54 = vld [vmem:[%s1698_s1 + $0x24] ss:$8 sps:$4 sm:$0xff] (!%p155_p10)   ;;  %v1271_v55 = vld [vmem:[%s1698_s1 + $0x20] ss:$8 sps:$4 sm:$0xff] (!%p155_p10)   ;;  %s175_s21 = sand.u32 (!%p155_p10), 1, %s1342_s13  }
  0x15   : > { %vm768_vm2 = vcmask (!%p155_p10), 1045508   ;;  %s1560_s24 = sshll.u32 (!%p155_p10), %s175_s21, 6  ;;  %s1113_s29 = sshll.u32 (!%p155_p10), %s1350_s15, 4 }
  0x16   : > { %vm1593_vm3 = vmor (!%p155_p10), %vm657_vm1, %vm768_vm2 }
  0x18   : > { %s179_s8 = scalar_select %p178_p12, %s1354_s16, 1 }
  0x1a   : > { %s1114_s9 = smul.u32 16256, %s179_s8  ;;  %s1645_s8 = scalar_lea.sflag [#allocation3], %s175_s21 }
  0x1c   : > { %s182_s27 = scalar_lea.vmem %s1697_s0, %s1114_s9 }
  0x1d   : > { %s1477_s28 = scalar_lea.vmem %s182_s27, %s1100_s10  ;;  %s1579_s27 = scalar_lea.vmem [#allocation2], %s1560_s24 }
  0x1e   : > { %v1191_v3 = vld [vmem:[%s1477_s28 + $0x4] ss:$16 sps:$4 sm:$0xff]   ;;  %v1193_v4 = vld [vmem:[%s1477_s28 + $0xc] ss:$16 sps:$4 sm:$0xff]   ;;  %v1195_v5 = vld [vmem:[%s1477_s28] ss:$16 sps:$4 sm:$0xff]  }
  0x1f   : > { %522 = vmatprep.subr.bf16.mxu0 %v1191_v3  ;;  %v1196_v6 = vld [vmem:[%s1477_s28 + $0x8] ss:$16 sps:$4 sm:$0xff]   ;;  %585 = vmatprep.subr.bf16.mxu1 %v1193_v4  ;;  %v1197_v7 = vld [vmem:[%s1477_s28 + $0x24] ss:$16 sps:$4 sm:$0xff]   ;;  %v1199_v8 = vld [vmem:[%s1477_s28 + $0x2c] ss:$16 sps:$4 sm:$0xff]  }
  0x20   : > { %523 = vmatpush1.bf16.msra.mxu0 %v1195_v5  ;;  %586 = vmatpush1.bf16.msra.mxu1 %v1196_v6  ;;  %v1201_v9 = vld [vmem:[%s1477_s28 + $0x20] ss:$16 sps:$4 sm:$0xff]   ;;  %v1202_v10 = vld [vmem:[%s1477_s28 + $0x28] ss:$16 sps:$4 sm:$0xff]   ;;  %v1203_v11 = vld [vmem:[%s1477_s28 + $0x44] ss:$16 sps:$4 sm:$0xff]  }
  0x21   : > { %524 = vmatprep.subr.bf16.mxu0 %v1197_v7  ;;  %587 = vmatprep.subr.bf16.mxu1 %v1199_v8  ;;  %v1205_v12 = vld [vmem:[%s1477_s28 + $0x4c] ss:$16 sps:$4 sm:$0xff]   ;;  %v1207_v13 = vld [vmem:[%s1477_s28 + $0x40] ss:$16 sps:$4 sm:$0xff]   ;;  %v1208_v14 = vld [vmem:[%s1477_s28 + $0x48] ss:$16 sps:$4 sm:$0xff]  }
  0x22   : > { %v1209_v15 = vld [vmem:[%s1477_s28 + $0x64] ss:$16 sps:$4 sm:$0xff]   ;;  %v1211_v16 = vld [vmem:[%s1477_s28 + $0x6c] ss:$16 sps:$4 sm:$0xff]   ;;  %v1213_v17 = vld [vmem:[%s1477_s28 + $0x60] ss:$16 sps:$4 sm:$0xff]  }
  0x23   : > { %v1214_v18 = vld [vmem:[%s1477_s28 + $0x68] ss:$16 sps:$4 sm:$0xff]   ;;  %v1215_v19 = vld [vmem:[%s1477_s28 + $0x84] ss:$16 sps:$4 sm:$0xff]   ;;  %v1217_v20 = vld [vmem:[%s1477_s28 + $0x8c] ss:$16 sps:$4 sm:$0xff]  }
  0x24   : > { %525 = vmatpush1.bf16.msra.mxu0 %v1201_v9  ;;  %588 = vmatpush1.bf16.msra.mxu1 %v1202_v10  ;;  %v1219_v21 = vld [vmem:[%s1477_s28 + $0x80] ss:$16 sps:$4 sm:$0xff]   ;;  %v1220_v22 = vld [vmem:[%s1477_s28 + $0x88] ss:$16 sps:$4 sm:$0xff]   ;;  %v1221_v23 = vld [vmem:[%s1477_s28 + $0xa4] ss:$16 sps:$4 sm:$0xff]  }
  0x25   : > { %526 = vmatprep.subr.bf16.mxu0 %v1203_v11  ;;  %589 = vmatprep.subr.bf16.mxu1 %v1205_v12  ;;  %v1223_v24 = vld [vmem:[%s1477_s28 + $0xac] ss:$16 sps:$4 sm:$0xff]   ;;  %v1225_v25 = vld [vmem:[%s1477_s28 + $0xa0] ss:$16 sps:$4 sm:$0xff]   ;;  %v1226_v26 = vld [vmem:[%s1477_s28 + $0xa8] ss:$16 sps:$4 sm:$0xff]  }
  0x26   : > { %v1227_v27 = vld [vmem:[%s1477_s28 + $0xc4] ss:$16 sps:$4 sm:$0xff]   ;;  %v1229_v28 = vld [vmem:[%s1477_s28 + $0xcc] ss:$16 sps:$4 sm:$0xff]   ;;  %v1231_v29 = vld [vmem:[%s1477_s28 + $0xc0] ss:$16 sps:$4 sm:$0xff]  }
  0x27   : > { %v1232_v30 = vld [vmem:[%s1477_s28 + $0xc8] ss:$16 sps:$4 sm:$0xff]   ;;  %v1233_v31 = vld [vmem:[%s1477_s28 + $0xe4] ss:$16 sps:$4 sm:$0xff]   ;;  %v1235_v32 = vld [vmem:[%s1477_s28 + $0xec] ss:$16 sps:$4 sm:$0xff]  }
  0x28   : > { %527 = vmatpush1.bf16.msra.mxu0 %v1207_v13  ;;  %590 = vmatpush1.bf16.msra.mxu1 %v1208_v14  ;;  %v1237_v33 = vld [vmem:[%s1477_s28 + $0xe0] ss:$16 sps:$4 sm:$0xff]   ;;  %v1238_v34 = vld [vmem:[%s1477_s28 + $0xe8] ss:$16 sps:$4 sm:$0xff]   ;;  %v1239_v35 = vld [vmem:[%s1477_s28 + $0x104] ss:$16 sps:$4 sm:$0xff]  }
  0x29   : > { %528 = vmatprep.subr.bf16.mxu0 %v1209_v15  ;;  %591 = vmatprep.subr.bf16.mxu1 %v1211_v16  ;;  %v1241_v36 = vld [vmem:[%s1477_s28 + $0x10c] ss:$16 sps:$4 sm:$0xff]   ;;  %v1243_v37 = vld [vmem:[%s1477_s28 + $0x100] ss:$16 sps:$4 sm:$0xff]   ;;  %v1244_v38 = vld [vmem:[%s1477_s28 + $0x108] ss:$16 sps:$4 sm:$0xff]  }
  0x2a   : > { %v1245_v39 = vld [vmem:[%s1477_s28 + $0x124] ss:$16 sps:$4 sm:$0xff]   ;;  %v1247_v40 = vld [vmem:[%s1477_s28 + $0x12c] ss:$16 sps:$4 sm:$0xff]   ;;  %v1249_v41 = vld [vmem:[%s1477_s28 + $0x120] ss:$16 sps:$4 sm:$0xff]  }
  0x2b   : > { %v1250_v42 = vld [vmem:[%s1477_s28 + $0x128] ss:$16 sps:$4 sm:$0xff]   ;;  %v1251_v43 = vld [vmem:[%s1477_s28 + $0x144] ss:$16 sps:$4 sm:$0xff]   ;;  %v1253_v44 = vld [vmem:[%s1477_s28 + $0x14c] ss:$16 sps:$4 sm:$0xff]  }
  0x2c   : > { %529 = vmatpush1.bf16.msra.mxu0 %v1213_v17  ;;  %592 = vmatpush1.bf16.msra.mxu1 %v1214_v18  ;;  %v1255_v45 = vld [vmem:[%s1477_s28 + $0x140] ss:$16 sps:$4 sm:$0xff]   ;;  %v1256_v46 = vld [vmem:[%s1477_s28 + $0x148] ss:$16 sps:$4 sm:$0xff]   ;;  %v1257_v47 = vld [vmem:[%s1477_s28 + $0x164] ss:$16 sps:$4 sm:$0xff]  }
  0x2d   : > { %530 = vmatprep.subr.bf16.mxu0 %v1215_v19  ;;  %593 = vmatprep.subr.bf16.mxu1 %v1217_v20  ;;  %v1259_v48 = vld [vmem:[%s1477_s28 + $0x16c] ss:$16 sps:$4 sm:$0xff]   ;;  %v1261_v49 = vld [vmem:[%s1477_s28 + $0x160] ss:$16 sps:$4 sm:$0xff]   ;;  %v1262_v50 = vld [vmem:[%s1477_s28 + $0x168] ss:$16 sps:$4 sm:$0xff]  }
  0x2e   : > { %s1115_s28 = smul.u32 1008, %s1354_s16  ;;  %s924_s16 = sshll.u32 %s1579_s27, 4  ;;  %s1638_s16 = int_to_ptr.vmem [resolvable:$true] %s924_s16 }
  0x2f   : > { %s1272_s9 = scalar_lea.vmem %s1638_s16, 1024  ;;  %s1369_s10 = smov [#allocation2]  }
  0x30   : > { %531 = vmatpush1.bf16.msra.mxu0 %v1219_v21  ;;  %594 = vmatpush1.bf16.msra.mxu1 %v1220_v22  ;;  %s921_s4 = sadd.s32 %s1115_s28, %s1113_s29  ;;  %p1273_p13 = scmp.ne.s32.totalorder %s1638_s16, %s1272_s9 }
  0x31   : > { %532 = vmatprep.subr.bf16.mxu0 %v1221_v23  ;;  %595 = vmatprep.subr.bf16.mxu1 %v1223_v24  ;;  %s1097_s15 = sshll.u32 %s921_s4, 6  ;;  %s1276_s11 = sshll.u32 %s1369_s10, 4  ;;  %s1277_s11 = int_to_ptr.vmem [resolvable:$false] %s1276_s11 }
  0x32   : > { %s1636_s7 = scalar_lea.hbm %s1700_s3, %s1097_s15  ;;  %p1274_p0 = pnand %p1273_p13, %p1443_p3 }
  0x33   : > { %s1278_s20 = scalar_lea.vmem %s1277_s11, 2048  ;;  %p1279_p2 = scmp.lt.s32.totalorder %s1638_s16, %s1277_s11 }
  0x34   : > { %533 = vmatpush1.bf16.msra.mxu0 %v1225_v25  ;;  %596 = vmatpush1.bf16.msra.mxu1 %v1226_v26  ;;  %p1275_p1 = pneg %p1274_p0  ;;  %p1280_p4 = scmp.lt.s32.totalorder %s1278_s20, %s1272_s9 }
  0x35   : > { %534 = vmatprep.subr.bf16.mxu0 %v1227_v27  ;;  %597 = vmatprep.subr.bf16.mxu1 %v1229_v28 }
  0x36   : > { %p1281_p5 = por %p1280_p4, %p1279_p2 }
  0x38   : > { %535 = vmatpush1.bf16.msra.mxu0 %v1231_v29  ;;  %598 = vmatpush1.bf16.msra.mxu1 %v1232_v30  ;;  %p1282_p6 = pnand %p1281_p5, %p1275_p1 }
  0x39   : > { %536 = vmatprep.subr.bf16.mxu0 %v1233_v31  ;;  %599 = vmatprep.subr.bf16.mxu1 %v1235_v32 }
  0x3c   : > { %537 = vmatpush1.bf16.msra.mxu0 %v1237_v33  ;;  %600 = vmatpush1.bf16.msra.mxu1 %v1238_v34 }
  0x3d   : > { %538 = vmatprep.subr.bf16.mxu0 %v1239_v35  ;;  %601 = vmatprep.subr.bf16.mxu1 %v1241_v36 }
  0x40   : > { %539 = vmatpush1.bf16.msra.mxu0 %v1243_v37  ;;  %602 = vmatpush1.bf16.msra.mxu1 %v1244_v38 }
  0x41   : > { %540 = vmatprep.subr.bf16.mxu0 %v1245_v39  ;;  %603 = vmatprep.subr.bf16.mxu1 %v1247_v40 }
  0x44   : > { %541 = vmatpush1.bf16.msra.mxu0 %v1249_v41  ;;  %604 = vmatpush1.bf16.msra.mxu1 %v1250_v42 }
  0x45   : > { %542 = vmatprep.subr.bf16.mxu0 %v1251_v43  ;;  %605 = vmatprep.subr.bf16.mxu1 %v1253_v44 }
  0x48   : > { %543 = vmatpush1.bf16.msra.mxu0 %v1255_v45  ;;  %606 = vmatpush1.bf16.msra.mxu1 %v1256_v46 }
  0x49   : > { %544 = vmatprep.subr.bf16.mxu0 %v1257_v47  ;;  %607 = vmatprep.subr.bf16.mxu1 %v1259_v48 }
  0x4c   : > { %545 = vmatpush1.bf16.msra.mxu0 %v1261_v49  ;;  %608 = vmatpush1.bf16.msra.mxu1 %v1262_v50 }
  0x4f   : > { %555 = vmatmul.mubr.bf16.vlgmr.msra.gmra.mrb[0].mxu0 %v1263_v51  ;;  %618 = vmatmul.mubr.bf16.vlgmr.msra.gmra.mrb[0].mxu1 %v1263_v51 }
  0x50   : > { %1067 = vmatprep.mubr.msk.bf16.mxu0 %vm512_vm0, %v1266_v52  ;;  %1070 = vmatprep.mubr.msk.bf16.mxu1 %vm512_vm0, %v1266_v52 }
  0x57   : > { %565 = vmatmul.mubr.bf16.gmra.mrb[4].mxu0 %v1268_v53  ;;  %628 = vmatmul.mubr.bf16.gmra.mrb[4].mxu1 %v1268_v53 }
  0x58   : > { %1068 = vmatprep.mubr.msk.bf16.mxu0 %vm512_vm0, %v1269_v54  ;;  %1071 = vmatprep.mubr.msk.bf16.mxu1 %vm512_vm0, %v1269_v54 }
  0x5f   : > { %575 = vmatmul.mubr.bf16.gmra.mrb[8].mxu0 %v1271_v55  ;;  %638 = vmatmul.mubr.bf16.gmra.mrb[8].mxu1 %v1271_v55 }
  0x93   : > { %v1548_v10 = vpop.permute.xlu0 %680 }
  0x94   : > { %v1556_v19 = vrot.slane %v1548_v10, 4 }
 0x122   : > { %v556_v56 = vpop.f32.mrb[0].mxu0  ;;  %v619_v57 = vpop.f32.mrb[0].mxu1 }
 0x123   : > { %v558_v58 = vpop.f32.mrb[1].mxu0  ;;  %v621_v59 = vpop.f32.mrb[1].mxu1  ;;  %v658_v62 = vrot.slane %v556_v56, 6  ;;  %v664_v63 = vrot.slane %v619_v57, 6 }
 0x124   : > { %v560_v60 = vpop.f32.mrb[2].mxu0  ;;  %v623_v61 = vpop.f32.mrb[2].mxu1  ;;  %v661_v4 = vrot.slane %v558_v58, 6  ;;  %v667_v5 = vrot.slane %v621_v59, 6 }
 0x125   : > { %v659_v0 = vrot.slane %v560_v60, 6  ;;  %v665_v1 = vrot.slane %v623_v61, 6  ;;  %v562_v2 = vpop.f32.mrb[3].mxu0  ;;  %v625_v3 = vpop.f32.mrb[3].mxu1 }
 0x126   : > { %v662_v6 = vrot.slane %v562_v2, 6  ;;  %v668_v7 = vrot.slane %v625_v3, 6 }
 0x127   : > { %v660_v8 = vsel %vm657_vm1, %v658_v62, %v659_v0  ;;  %v666_v9 = vsel %vm657_vm1, %v664_v63, %v665_v1 }
 0x128   : > { %v674_v11 = vmax.f32 %v556_v56, %v660_v8  ;;  %v676_v12 = vmax.f32 %v619_v57, %v666_v9  ;;  %v663_v13 = vsel %vm657_vm1, %v661_v4, %v662_v6  ;;  %v669_v14 = vsel %vm657_vm1, %v667_v5, %v668_v7 }
 0x129   : > { %v675_v15 = vmax.f32 %v558_v58, %v663_v13  ;;  %v677_v16 = vmax.f32 %v621_v59, %v669_v14 }
 0x12a   : > { %v683_v17 = vadd.f32 %v1548_v10, %v674_v11  ;;  %v685_v18 = vadd.f32 %v1548_v10, %v676_v12  ;;  %v566_v20 = vpop.f32.mrb[4].mxu0  ;;  %v629_v21 = vpop.f32.mrb[4].mxu1 }
 0x12b   : > { %v684_v22 = vadd.f32 %v1548_v10, %v675_v15  ;;  %v686_v23 = vadd.f32 %v1548_v10, %v677_v16  ;;  %v713_v24 = vrot.slane %v566_v20, 6  ;;  %v715_v25 = vrot.slane %v629_v21, 6  ;;  %v568_v26 = vpop.f32.mrb[5].mxu0  ;;  %v631_v27 = vpop.f32.mrb[5].mxu1 }
 0x12c   : > { %v687_v28 = vmax.f32 %v683_v17, 0.0  ;;  %v689_v29 = vmax.f32 %v685_v18, 0.0  ;;  %v714_v30 = vrot.slane %v568_v26, 6  ;;  %v716_v31 = vrot.slane %v631_v27, 6  ;;  %v1564_v32 = vpop.f32.mrb[6].mxu0  ;;  %v1566_v33 = vpop.f32.mrb[6].mxu1 }
 0x12d   : > { %v688_v34 = vmax.f32 %v684_v22, 0.0  ;;  %v690_v35 = vmax.f32 %v686_v23, 0.0  ;;  %v721_v36 = vmax.f32 %v560_v60, %v713_v24  ;;  %v725_v37 = vmax.f32 %v566_v20, %v713_v24  ;;  %v1568_v38 = vpop.f32.mrb[7].mxu0  ;;  %v1570_v39 = vpop.f32.mrb[7].mxu1 }
 0x12e   : > { %v723_v40 = vmax.f32 %v623_v61, %v715_v25  ;;  %v727_v41 = vmax.f32 %v629_v21, %v715_v25  ;;  %v722_v42 = vmax.f32 %v562_v2, %v714_v30  ;;  %v726_v43 = vmax.f32 %v568_v26, %v714_v30 }
 0x12f   : > { %v1101_v44 = vpack.c.bf16 %v688_v34, %v687_v28  ;;  %v1102_v45 = vpack.c.bf16 %v690_v35, %v689_v29  ;;  %v731_v46 = vadd.f32 %v1556_v19, %v721_v36  ;;  %v735_v47 = vadd.f32 %v1556_v19, %v725_v37 }
 0x130   : > { %v733_v48 = vadd.f32 %v1556_v19, %v723_v40  ;;  %v737_v49 = vadd.f32 %v1556_v19, %v727_v41  ;;  %v732_v50 = vadd.f32 %v1556_v19, %v722_v42  ;;  %v736_v51 = vadd.f32 %v1556_v19, %v726_v43 }
 0x131   : > { %707 = vst [vmem:[%s1579_s27] sm:$0x77] %v1101_v44  ;;  %708 = vst [vmem:[%s1579_s27 + $0x8] sm:$0x77] %v1102_v45  ;;  %v739_v52 = vmax.f32 %v731_v46, 0.0  ;;  %v743_v53 = vmax.f32 %v735_v47, 0.0  ;;  %v724_v54 = vmax.f32 %v625_v3, %v716_v31  ;;  %v728_v55 = vmax.f32 %v631_v27, %v716_v31 }
 0x132   : > { %v741_v56 = vmax.f32 %v733_v48, 0.0  ;;  %v745_v57 = vmax.f32 %v737_v49, 0.0  ;;  %v740_v58 = vmax.f32 %v732_v50, 0.0  ;;  %v744_v59 = vmax.f32 %v736_v51, 0.0  ;;  %v576_v60 = vpop.f32.mrb[8].mxu0  ;;  %v639_v61 = vpop.f32.mrb[8].mxu1 }
 0x133   : > { %v734_v62 = vadd.f32 %v1556_v19, %v724_v54  ;;  %v738_v63 = vadd.f32 %v1556_v19, %v728_v55  ;;  %v791_v0 = vrot.slane %v1564_v32, 6  ;;  %v797_v1 = vrot.slane %v1566_v33, 6  ;;  %v578_v2 = vpop.f32.mrb[9].mxu0  ;;  %v1587_v4 = vpop.f32.mrb[9].mxu1 }
 0x134   : > { %v1103_v5 = vpack.c.bf16 %v740_v58, %v739_v52  ;;  %v1105_v3 = vpack.c.bf16 %v744_v59, %v743_v53  ;;  %v794_v6 = vrot.slane %v1568_v38, 6  ;;  %v800_v7 = vrot.slane %v1570_v39, 6  ;;  %v580_v8 = vpop.f32.mrb[10].mxu0  ;;  %v643_v9 = vpop.f32.mrb[10].mxu1 }
 0x135   : > { %v742_v12 = vmax.f32 %v734_v62, 0.0  ;;  %v746_v13 = vmax.f32 %v738_v63, 0.0  ;;  %v792_v14 = vrot.slane %v576_v60, 6  ;;  %v798_v15 = vrot.slane %v639_v61, 6  ;;  %v582_v16 = vpop.f32.mrb[11].mxu0  ;;  %v645_v17 = vpop.f32.mrb[11].mxu1 }
 0x136   : > { %v1078_v18 = vrot.slane %v1103_v5, 10  ;;  %v772_v20 = vrot.slane %v1105_v3, 6  ;;  %v795_v21 = vrot.slane %v578_v2, 6  ;;  %v801_v22 = vrot.slane %v1587_v4, 6 }
 0x137   : > { %v1104_v23 = vpack.c.bf16 %v742_v12, %v741_v56  ;;  %v1106_v24 = vpack.c.bf16 %v746_v13, %v745_v57  ;;  %v793_v25 = vsel %vm657_vm1, %v791_v0, %v792_v14  ;;  %v799_v26 = vsel %vm657_vm1, %v797_v1, %v798_v15 }
 0x138   : > { %v773_v27 = vsel %vm1593_vm3, %v1078_v18, %v772_v20  ;;  %v807_v28 = vmax.f32 %v1564_v32, %v793_v25  ;;  %v809_v29 = vmax.f32 %v1566_v33, %v799_v26  ;;  %v796_v30 = vsel %vm657_vm1, %v794_v6, %v795_v21 }
 0x139   : > { %1080 = vst [vmem:[%s1579_s27 + $0x10] sm:$0x77] %v773_v27  ;;  %v1079_v31 = vrot.slane %v1104_v23, 10  ;;  %v776_v34 = vrot.slane %v1106_v24, 6  ;;  %v808_v35 = vmax.f32 %v1568_v38, %v796_v30  ;;  %v802_v36 = vsel %vm657_vm1, %v800_v7, %v801_v22 }
 0x13a   : > { %v811_v37 = vadd.f32 %v807_v28, %v1548_v10  ;;  %v813_v40 = vadd.f32 %v809_v29, %v1548_v10  ;;  %v810_v41 = vmax.f32 %v1570_v39, %v802_v36  ;;  %v842_v42 = vrot.slane %v580_v8, 6 }
 0x13b   : > { %v777_v32 = vsel %vm1593_vm3, %v1079_v31, %v776_v34  ;;  %v812_v33 = vadd.f32 %v808_v35, %v1548_v10  ;;  %v844_v43 = vrot.slane %v643_v9, 6  ;;  %v843_v44 = vrot.slane %v582_v16, 6 }
 0x13c   : > { %1081 = vst [vmem:[%s1579_s27 + $0x18] sm:$0x77] %v777_v32  ;;  %v815_v45 = vmax.f32 %v811_v37, 0.0  ;;  %v817_v46 = vmax.f32 %v813_v40, 0.0  ;;  %v814_v38 = vadd.f32 %v810_v41, %v1548_v10  ;;  %v850_v47 = vmax.f32 %v576_v60, %v842_v42 }
 0x13d   : > { %v816_v48 = vmax.f32 %v812_v33, 0.0  ;;  %v854_v49 = vmax.f32 %v580_v8, %v842_v42  ;;  %v852_v50 = vmax.f32 %v639_v61, %v844_v43  ;;  %v856_v51 = vmax.f32 %v643_v9, %v844_v43 }
 0x13e   : > { %v818_v39 = vmax.f32 %v814_v38, 0.0  ;;  %v858_v52 = vadd.f32 %v850_v47, %v1556_v19  ;;  %v851_v53 = vmax.f32 %v578_v2, %v843_v44  ;;  %v855_v54 = vmax.f32 %v582_v16, %v843_v44 }
 0x13f   : > { %v1107_v55 = vpack.c.bf16 %v816_v48, %v815_v45  ;;  %v862_v56 = vadd.f32 %v854_v49, %v1556_v19  ;;  %v860_v61 = vadd.f32 %v852_v50, %v1556_v19  ;;  %v864_v62 = vadd.f32 %v856_v51, %v1556_v19 }
 0x140   : > { %v1108_v57 = vpack.c.bf16 %v818_v39, %v817_v46  ;;  %v866_v58 = vmax.f32 %v858_v52, 0.0  ;;  %v859_v10 = vadd.f32 %v851_v53, %v1556_v19  ;;  %v863_v59 = vadd.f32 %v855_v54, %v1556_v19 }
 0x141   : > { %1084 = vst [vmem:[%s1579_s27 + $0x20] sm:$0x77] %v1107_v55  ;;  %v870_v60 = vmax.f32 %v862_v56, 0.0  ;;  %v845_v63 = vrot.slane %v645_v17, 6  ;;  %v868_v7 = vmax.f32 %v860_v61, 0.0  ;;  %v872_v8 = vmax.f32 %v864_v62, 0.0 }
 0x142   : > { %1085 = vst [vmem:[%s1579_s27 + $0x28] sm:$0x77] %v1108_v57  ;;  %v867_v0 = vmax.f32 %v859_v10, 0.0  ;;  %v871_v1 = vmax.f32 %v863_v59, 0.0 }
 0x143   : > { %v853_v2 = vmax.f32 %v1587_v4, %v845_v63  ;;  %v857_v5 = vmax.f32 %v645_v17, %v845_v63 }
 0x144   : > { %v1109_v3 = vpack.c.bf16 %v867_v0, %v866_v58  ;;  %v1111_v6 = vpack.c.bf16 %v871_v1, %v870_v60 }
 0x145   : > { %v861_v9 = vadd.f32 %v853_v2, %v1556_v19  ;;  %v865_v12 = vadd.f32 %v857_v5, %v1556_v19 }
 0x146   : > { %v1090_v13 = vrot.slane %v1109_v3, 10  ;;  %v896_v14 = vrot.slane %v1111_v6, 6 }
 0x147   : > { %v869_v15 = vmax.f32 %v861_v9, 0.0  ;;  %v873_v16 = vmax.f32 %v865_v12, 0.0 }
 0x148   : > { %v897_v4 = vsel %vm1593_vm3, %v1090_v13, %v896_v14 }
 0x149   : > { %1092 = vst [vmem:[%s1579_s27 + $0x30] sm:$0x77] %v897_v4  ;;  %v1110_v17 = vpack.c.bf16 %v869_v15, %v868_v7  ;;  %v1112_v18 = vpack.c.bf16 %v873_v16, %v872_v8 }
 0x14b   : > { %v1091_v20 = vrot.slane %v1110_v17, 10  ;;  %v900_v21 = vrot.slane %v1112_v18, 6 }
 0x14d   : > { %v901_v19 = vsel %vm1593_vm3, %v1091_v20, %v900_v21 }
 0x14e   : > { %1093 = vst [vmem:[%s1579_s27 + $0x38] sm:$0x77] %v901_v19 }
 0x14f   : > { %1285 = shalt.err (!%p1282_p6)
}
 0x150   : > { %s1286_s21 = scalar_lea.hbm %s1636_s7, 1024  ;;  %s1290_s28 = scalar_lea.hbm %s1700_s3, 129024 }
 0x151   : > { %p1287_p7 = scmp.ne.s32.totalorder %s1636_s7, %s1286_s21  ;;  %p1291_p11 = scmp.lt.u32.totalorder %s1636_s7, %s1700_s3 }
 0x152   : > { %p1292_p12 = scmp.lt.u32.totalorder %s1290_s28, %s1286_s21  ;;  %p1294_p0 = scmp.lt.u32.totalorder %s1286_s21, %s1636_s7 }
 0x153   : > { %p1288_p9 = pnand %p1287_p7, %p1443_p3 }
 0x154   : > { %p1293_p13 = por %p1292_p12, %p1291_p11 }
 0x155   : > { %p1289_p10 = pneg %p1288_p9 }
 0x156   : > { %p1295_p1 = por %p1294_p0, %p1293_p13 }
 0x158   : > { %p1296_p2 = pnand %p1295_p1, %p1289_p10 }
 0x15a   : > { %1299 = shalt.err (!%p1296_p2)
}
 0x15b   : > { %s1370_s15 = smov 256   ;;  %s1371_s5 = smov 16  }
 0x15c   : > { %1116 = dma.vmem_to_hbm [thread:$0]  (%p1443_p3), %s1638_s16, 1024, %s1636_s7, %s1645_s8, %s1370_s15, %s1370_s15, %s1371_s5  }
 0x15d PF: > { %p1122_p4 = scmp.ge.s32.totalorder %s1366_s19, 2  ;;  %s939_s6 = sand.u32 1, %s1338_s12  }
 0x15e   : > { %s940_s9 = scalar_lea.sflag [#allocation3], %s939_s6 }
 0x15f   : > { %p1119_p5 = pnand %p1122_p4, %p1452_p8 }
 0x161   : > { %1333 = dma.done.wait (!%p1119_p5), %s940_s9, 1024  }
 0x162   : > { %1335 = vsyncadd (!%p1119_p5), %s940_s9, 4294966272  ;;  %s16_s19 = sadd.s32 1, %s1366_s19   ;;  %s1705_s12 = smov %s1342_s13 }
 0x163   : > { %p13_p6 = scmp.ge.s32.totalorder %s16_s19, 128   ;;  %s1706_s13 = smov %s1346_s14 }
 0x164   : > { %s1707_s14 = smov %s1461_s30  ;;  %s1708_s15 = smov %s1358_s17 }
 0x165   : > { %s1709_s16 = smov %s1362_s18  ;;  %s1710_s17 = smov %s1713_s22 }
 0x166   : > { %s1711_s18 = smov %s1717_s23  ;;  %15 = sbr.rel (!%p13_p6) target bundleno = 5 (0x5), region = 71 }
 0x16d   :  { %945 = vsyncpa [#allocation3], 1 }
 0x16e   :  { %947 = vsyncpa [#allocation3 + $0x1], 1 }

// kernel: simple_cnn_forward.6
= control target key start
LH: loop header
LB: loop body
LE: loop exit
PB: predicated region body
PF: predicated region fallthrough
CT: control target
= control target key end

     0   :  { %s1438_s12 = smov 0   ;;  %s1440_s13 = smov 0   ;;  %s1664_s0 = inlined_call_operand.vmem [shape: bf16[2,8064,256], index: 0, kind: input, shape index: {}]   ;;  %s1665_s1 = inlined_call_operand.vmem [shape: bf16[128,384], index: 1, kind: input, shape index: {}]   ;;  %s1666_s2 = inlined_call_operand.vmem [shape: f32[16,1], index: 2, kind: input, shape index: {}]   ;;  %s1667_s3 = inlined_call_operand.vmem [shape: bf16[2,124,16,256], index: 3, kind: output, shape index: {}]  }
   0x1   :  { %s1442_s14 = smov 0   ;;  %s1444_s15 = smov 0  }
   0x2   :  { %s1446_s16 = smov 0  }
   0x3 LB: > { %s22_s17 = sadd.s32 1, %s1407_s14  ;;  %s25_s18 = sadd.s32 1, %s1411_s15  ;;  %s1415_s16 = sphi %s1446_s16, %s13_s16   ;;  %s1411_s15 = sphi %s1444_s15, %s1671_s15   ;;  %s1407_s14 = sphi %s1442_s14, %s1670_s14   ;;  %s1403_s13 = sphi %s1440_s13, %s1669_s13   ;;  %s1399_s12 = sphi %s1438_s12, %s1668_s12  }
   0x4   : > { %p23_p0 = scmp.ge.s32.totalorder %s22_s17, 31  ;;  %p1092_p1 = scmp.ge.s32.totalorder %s1415_s16, 1 }
   0x5   : > { %p151_p2 = scmp.lt.s32.totalorder %s1415_s16, 63 }
   0x6   : > { %s1673_s17 = smov (%p23_p0, %s22_s17), 0  ;;  %s1675_s18 = smov (!%p23_p0, %s25_s18), %s1411_s15 }
   0x7   : > { %p152_p3 = pnand %p1092_p1, %p151_p2  ;;  %p27_p4 = scmp.ge.s32.totalorder %s1675_s18, 2 }
   0x8   : > { %p180_p5 = scmp.lt.s32.totalorder (!%p152_p3), %s1403_s13, 1  ;;  %v1417_v0 = vmov (!%p152_p3), 0   ;;  %v1348_v1 = vld [vmem:[%s1665_s1 + $0x4] ss:$12 sps:$4 sm:$0xff] (!%p152_p3)   ;;  %s1097_s22 = sshll.u32 (!%p152_p3), %s1399_s12, 8  ;;  %v878_v45 = vld [vmem:[%s1666_s2 + $0x8] sm:$0xff] (!%p152_p3) }
   0x9   : > { %s1677_s18 = smov (%p27_p4, %s1675_s18), 0  ;;  %155 = sbr.rel (%p152_p3) target bundleno = 368 (0x170), region = 32 }
   0xa   : > { %796 = vmatprep.mubr.bf16.mxu0 (!%p152_p3), %v1417_v0  ;;  %1272 = vset.pattern.permute.xlu0 (!%p152_p3), %v1417_v0  ;;  %v1345_v41 = vld [vmem:[%s1665_s1 + $0x8] ss:$12 sps:$4 sm:$0xff] (!%p152_p3)   ;;  %v877_v43 = vld [vmem:[%s1666_s2] sm:$0xff] (!%p152_p3)  ;;  %v1357_v57 = vld [vmem:[%s1665_s1 + $0x50] ss:$12 sps:$4 sm:$0xff] (!%p152_p3)   ;;  %s1094_s10 = sshll.u32 (!%p152_p3), %s1399_s12, 2 }
   0xb   : > { %683 = vmatprep.mubr.bf16.mxu1 (!%p152_p3), %v1348_v1  ;;  %885 = vperm.xlu0 (!%p152_p3), %1272, %v877_v43   ;;  %v1349_v48 = vld [vmem:[%s1665_s1 + $0x20] ss:$12 sps:$4 sm:$0xff] (!%p152_p3)   ;;  %v1353_v53 = vld [vmem:[%s1665_s1 + $0x38] ss:$12 sps:$4 sm:$0xff] (!%p152_p3)   ;;  %v1350_v56 = vld [vmem:[%s1665_s1 + $0x1c] ss:$12 sps:$4 sm:$0xff] (!%p152_p3)  }
   0xc   : > { %v1346_v55 = vld [vmem:[%s1665_s1] ss:$12 sps:$4 sm:$0xff] (!%p152_p3)   ;;  %v1352_v58 = vld [vmem:[%s1665_s1 + $0x18] ss:$12 sps:$4 sm:$0xff] (!%p152_p3)   ;;  %v1361_v60 = vld [vmem:[%s1665_s1 + $0x68] ss:$12 sps:$4 sm:$0xff] (!%p152_p3)  }
   0xd   : > { %v1354_v59 = vld [vmem:[%s1665_s1 + $0x34] ss:$12 sps:$4 sm:$0xff] (!%p152_p3)   ;;  %v1356_v61 = vld [vmem:[%s1665_s1 + $0x30] ss:$12 sps:$4 sm:$0xff] (!%p152_p3)   ;;  %v1358_v62 = vld [vmem:[%s1665_s1 + $0x4c] ss:$12 sps:$4 sm:$0xff] (!%p152_p3)  }
   0xe   : > { %v1365_v63 = vld [vmem:[%s1665_s1 + $0x80] ss:$12 sps:$4 sm:$0xff] (!%p152_p3)   ;;  %v1360_v1 = vld [vmem:[%s1665_s1 + $0x48] ss:$12 sps:$4 sm:$0xff] (!%p152_p3)   ;;  %p188_p6 = scmp.lt.s32.totalorder (!%p152_p3), %s1094_s10, 123 }
   0xf   : > { %890 = vperm.xlu0 (!%p152_p3), %1272, %v878_v45  }
  0x10   : > { %s1679_s13 = smov (!%p180_p5, %s1403_s13), 1  ;;  %s1681_s10 = smov (!%p188_p6, %s1094_s10), 123 }
  0x11   : > { %s1229_s21 = smul.u32 8064, %s1679_s13  ;;  %s1095_s11 = sshll.u32 %s1681_s10, 2 }
  0x12   : > { %s1230_s12 = smul.u32 496, %s1679_s13 }
  0x13   : > { %s184_s25 = scalar_lea.vmem %s1664_s0, %s1229_s21 }
  0x14   : > { %s1482_s26 = scalar_lea.vmem %s184_s25, %s1097_s22  ;;  %s192_s19 = sadd.s32 %s1230_s12, %s1095_s11 }
  0x15   : > { %v1273_v2 = vld [vmem:[%s1482_s26 + $0x4] ss:$8 sps:$4 sm:$0xff]   ;;  %v1275_v3 = vld [vmem:[%s1482_s26] ss:$8 sps:$4 sm:$0xff]   ;;  %v1276_v4 = vld [vmem:[%s1482_s26 + $0x14] ss:$8 sps:$4 sm:$0xff]  }
  0x16   : > { %651 = vmatprep.subr.bf16.mxu1 %v1273_v2  ;;  %v1278_v5 = vld [vmem:[%s1482_s26 + $0x10] ss:$8 sps:$4 sm:$0xff]   ;;  %v1279_v6 = vld [vmem:[%s1482_s26 + $0x24] ss:$8 sps:$4 sm:$0xff]   ;;  %v1281_v7 = vld [vmem:[%s1482_s26 + $0x20] ss:$8 sps:$4 sm:$0xff]  }
  0x17   : > { %652 = vmatpush1.bf16.msra.mxu1 %v1275_v3  ;;  %v1282_v8 = vld [vmem:[%s1482_s26 + $0x34] ss:$8 sps:$4 sm:$0xff]   ;;  %v1284_v9 = vld [vmem:[%s1482_s26 + $0x30] ss:$8 sps:$4 sm:$0xff]   ;;  %v1297_v10 = vld [vmem:[%s1482_s26 + $0x104] ss:$8 sps:$4 sm:$0xff]  }
  0x18   : > { %653 = vmatprep.subr.bf16.mxu1 %v1276_v4  ;;  %v1299_v11 = vld [vmem:[%s1482_s26 + $0x100] ss:$8 sps:$4 sm:$0xff]   ;;  %v1285_v12 = vld [vmem:[%s1482_s26 + $0x44] ss:$8 sps:$4 sm:$0xff]   ;;  %764 = vmatprep.subr.bf16.mxu0 %v1297_v10  ;;  %v1303_v13 = vld [vmem:[%s1482_s26 + $0x114] ss:$8 sps:$4 sm:$0xff]  }
  0x19   : > { %765 = vmatpush1.bf16.msra.mxu0 %v1299_v11  ;;  %v1305_v14 = vld [vmem:[%s1482_s26 + $0x110] ss:$8 sps:$4 sm:$0xff]   ;;  %v1287_v15 = vld [vmem:[%s1482_s26 + $0x40] ss:$8 sps:$4 sm:$0xff]   ;;  %v1288_v16 = vld [vmem:[%s1482_s26 + $0x54] ss:$8 sps:$4 sm:$0xff]  }
  0x1a   : > { %766 = vmatprep.subr.bf16.mxu0 %v1303_v13  ;;  %v1309_v17 = vld [vmem:[%s1482_s26 + $0x124] ss:$8 sps:$4 sm:$0xff]   ;;  %v1311_v18 = vld [vmem:[%s1482_s26 + $0x120] ss:$8 sps:$4 sm:$0xff]   ;;  %v1290_v19 = vld [vmem:[%s1482_s26 + $0x50] ss:$8 sps:$4 sm:$0xff]  }
  0x1b   : > { %654 = vmatpush1.bf16.msra.mxu1 %v1278_v5  ;;  %v1315_v20 = vld [vmem:[%s1482_s26 + $0x134] ss:$8 sps:$4 sm:$0xff]   ;;  %v1291_v21 = vld [vmem:[%s1482_s26 + $0x64] ss:$8 sps:$4 sm:$0xff]   ;;  %v1317_v22 = vld [vmem:[%s1482_s26 + $0x130] ss:$8 sps:$4 sm:$0xff]  }
  0x1c   : > { %655 = vmatprep.subr.bf16.mxu1 %v1279_v6  ;;  %v1293_v23 = vld [vmem:[%s1482_s26 + $0x60] ss:$8 sps:$4 sm:$0xff]   ;;  %v1321_v24 = vld [vmem:[%s1482_s26 + $0x144] ss:$8 sps:$4 sm:$0xff]   ;;  %v1294_v25 = vld [vmem:[%s1482_s26 + $0x74] ss:$8 sps:$4 sm:$0xff]  }
  0x1d   : > { %767 = vmatpush1.bf16.msra.mxu0 %v1305_v14  ;;  %v1323_v26 = vld [vmem:[%s1482_s26 + $0x140] ss:$8 sps:$4 sm:$0xff]   ;;  %v1296_v27 = vld [vmem:[%s1482_s26 + $0x70] ss:$8 sps:$4 sm:$0xff]   ;;  %v1327_v28 = vld [vmem:[%s1482_s26 + $0x154] ss:$8 sps:$4 sm:$0xff]  }
  0x1e   : > { %768 = vmatprep.subr.bf16.mxu0 %v1309_v17  ;;  %v1300_v29 = vld [vmem:[%s1482_s26 + $0x84] ss:$8 sps:$4 sm:$0xff]   ;;  %v1329_v30 = vld [vmem:[%s1482_s26 + $0x150] ss:$8 sps:$4 sm:$0xff]   ;;  %v1302_v31 = vld [vmem:[%s1482_s26 + $0x80] ss:$8 sps:$4 sm:$0xff]  }
  0x1f   : > { %656 = vmatpush1.bf16.msra.mxu1 %v1281_v7  ;;  %v1333_v32 = vld [vmem:[%s1482_s26 + $0x164] ss:$8 sps:$4 sm:$0xff]   ;;  %v1306_v33 = vld [vmem:[%s1482_s26 + $0x94] ss:$8 sps:$4 sm:$0xff]   ;;  %v1335_v34 = vld [vmem:[%s1482_s26 + $0x160] ss:$8 sps:$4 sm:$0xff]  }
  0x20   : > { %657 = vmatprep.subr.bf16.mxu1 %v1282_v8  ;;  %v1308_v35 = vld [vmem:[%s1482_s26 + $0x90] ss:$8 sps:$4 sm:$0xff]   ;;  %v1339_v36 = vld [vmem:[%s1482_s26 + $0x174] ss:$8 sps:$4 sm:$0xff]   ;;  %v1312_v37 = vld [vmem:[%s1482_s26 + $0xa4] ss:$8 sps:$4 sm:$0xff]  }
  0x21   : > { %769 = vmatpush1.bf16.msra.mxu0 %v1311_v18  ;;  %v1341_v38 = vld [vmem:[%s1482_s26 + $0x170] ss:$8 sps:$4 sm:$0xff]   ;;  %v1314_v39 = vld [vmem:[%s1482_s26 + $0xa0] ss:$8 sps:$4 sm:$0xff]   ;;  %v1318_v40 = vld [vmem:[%s1482_s26 + $0xb4] ss:$8 sps:$4 sm:$0xff]  }
  0x22   : > { %770 = vmatprep.subr.bf16.mxu0 %v1315_v20  ;;  %v1320_v42 = vld [vmem:[%s1482_s26 + $0xb0] ss:$8 sps:$4 sm:$0xff]   ;;  %v1324_v44 = vld [vmem:[%s1482_s26 + $0xc4] ss:$8 sps:$4 sm:$0xff]   ;;  %v1326_v46 = vld [vmem:[%s1482_s26 + $0xc0] ss:$8 sps:$4 sm:$0xff]  }
  0x23   : > { %658 = vmatpush1.bf16.msra.mxu1 %v1284_v9  ;;  %v1330_v47 = vld [vmem:[%s1482_s26 + $0xd4] ss:$8 sps:$4 sm:$0xff]   ;;  %v1332_v49 = vld [vmem:[%s1482_s26 + $0xd0] ss:$8 sps:$4 sm:$0xff]   ;;  %v1336_v50 = vld [vmem:[%s1482_s26 + $0xe4] ss:$8 sps:$4 sm:$0xff]  }
  0x24   : > { %659 = vmatprep.subr.bf16.mxu1 %v1285_v12  ;;  %v1338_v51 = vld [vmem:[%s1482_s26 + $0xe0] ss:$8 sps:$4 sm:$0xff]   ;;  %v1342_v52 = vld [vmem:[%s1482_s26 + $0xf4] ss:$8 sps:$4 sm:$0xff]   ;;  %v1344_v54 = vld [vmem:[%s1482_s26 + $0xf0] ss:$8 sps:$4 sm:$0xff]  }
  0x25   : > { %771 = vmatpush1.bf16.msra.mxu0 %v1317_v22  ;;  %v1362_v2 = vld [vmem:[%s1665_s1 + $0x64] ss:$12 sps:$4 sm:$0xff]   ;;  %v1364_v4 = vld [vmem:[%s1665_s1 + $0x60] ss:$12 sps:$4 sm:$0xff]   ;;  %v1366_v5 = vld [vmem:[%s1665_s1 + $0x7c] ss:$12 sps:$4 sm:$0xff]  }
  0x26   : > { %772 = vmatprep.subr.bf16.mxu0 %v1321_v24  ;;  %v1369_v3 = vld [vmem:[%s1665_s1 + $0x98] ss:$12 sps:$4 sm:$0xff]   ;;  %v1373_v6 = vld [vmem:[%s1665_s1 + $0xb0] ss:$12 sps:$4 sm:$0xff]   ;;  %v1370_v8 = vld [vmem:[%s1665_s1 + $0x94] ss:$12 sps:$4 sm:$0xff]  }
  0x27   : > { %660 = vmatpush1.bf16.msra.mxu1 %v1287_v15  ;;  %v1368_v7 = vld [vmem:[%s1665_s1 + $0x78] ss:$12 sps:$4 sm:$0xff]   ;;  %v1376_v10 = vld [vmem:[%s1665_s1 + $0xa8] ss:$12 sps:$4 sm:$0xff]   ;;  %s1096_s13 = sshll.u32 %s192_s19, 2 }
  0x28   : > { %661 = vmatprep.subr.bf16.mxu1 %v1288_v16  ;;  %v1374_v9 = vld [vmem:[%s1665_s1 + $0xac] ss:$12 sps:$4 sm:$0xff]   ;;  %s1627_s22 = scalar_lea.vmem %s1667_s3, %s1096_s13 }
  0x29   : > { %773 = vmatpush1.bf16.msra.mxu0 %v1323_v26 }
  0x2a   : > { %774 = vmatprep.subr.bf16.mxu0 %v1327_v28 }
  0x2b   : > { %662 = vmatpush1.bf16.msra.mxu1 %v1290_v19 }
  0x2c   : > { %663 = vmatprep.subr.bf16.mxu1 %v1291_v21 }
  0x2d   : > { %775 = vmatpush1.bf16.msra.mxu0 %v1329_v30 }
  0x2e   : > { %776 = vmatprep.subr.bf16.mxu0 %v1333_v32 }
  0x2f   : > { %664 = vmatpush1.bf16.msra.mxu1 %v1293_v23 }
  0x30   : > { %665 = vmatprep.subr.bf16.mxu1 %v1294_v25 }
  0x31   : > { %777 = vmatpush1.bf16.msra.mxu0 %v1335_v34 }
  0x32   : > { %778 = vmatprep.subr.bf16.mxu0 %v1339_v36 }
  0x33   : > { %666 = vmatpush1.bf16.msra.mxu1 %v1296_v27 }
  0x34   : > { %667 = vmatprep.subr.bf16.mxu1 %v1300_v29 }
  0x35   : > { %779 = vmatpush1.bf16.msra.mxu0 %v1341_v38 }
  0x37   : > { %668 = vmatpush1.bf16.msra.mxu1 %v1302_v31 }
  0x38   : > { %669 = vmatprep.subr.bf16.mxu1 %v1306_v33  ;;  %797 = vmatmul.mubr.bf16.vlgmr.msra.gmra.mrb[0].mxu0 %v1345_v41 }
  0x39   : > { %806 = vmatprep.mubr.bf16.mxu0 %v1417_v0 }
  0x3b   : > { %670 = vmatpush1.bf16.msra.mxu1 %v1308_v35 }
  0x3c   : > { %671 = vmatprep.subr.bf16.mxu1 %v1312_v37 }
  0x3f   : > { %672 = vmatpush1.bf16.msra.mxu1 %v1314_v39 }
  0x40   : > { %673 = vmatprep.subr.bf16.mxu1 %v1318_v40  ;;  %807 = vmatmul.mubr.bf16.gmra.mrb[4].mxu0 %v1349_v48 }
  0x41   : > { %816 = vmatprep.mubr.bf16.mxu0 %v1417_v0 }
  0x43   : > { %674 = vmatpush1.bf16.msra.mxu1 %v1320_v42 }
  0x44   : > { %675 = vmatprep.subr.bf16.mxu1 %v1324_v44 }
  0x47   : > { %676 = vmatpush1.bf16.msra.mxu1 %v1326_v46 }
  0x48   : > { %677 = vmatprep.subr.bf16.mxu1 %v1330_v47  ;;  %817 = vmatmul.mubr.bf16.gmra.mrb[8].mxu0 %v1353_v53 }
  0x49   : > { %826 = vmatprep.mubr.bf16.mxu0 %v1417_v0 }
  0x4b   : > { %678 = vmatpush1.bf16.msra.mxu1 %v1332_v49 }
  0x4c   : > { %679 = vmatprep.subr.bf16.mxu1 %v1336_v50 }
  0x4f   : > { %680 = vmatpush1.bf16.msra.mxu1 %v1338_v51 }
  0x50   : > { %681 = vmatprep.subr.bf16.mxu1 %v1342_v52  ;;  %827 = vmatmul.mubr.bf16.gmra.mrb[12].mxu0 %v1357_v57 }
  0x51   : > { %836 = vmatprep.mubr.bf16.mxu0 %v1417_v0 }
  0x53   : > { %682 = vmatpush1.bf16.msra.mxu1 %v1344_v54 }
  0x56   : > { %684 = vmatmul.mubr.bf16.vlgmr.msra.gmra.mrb[0].mxu1 %v1346_v55 }
  0x57   : > { %693 = vmatprep.mubr.bf16.mxu1 %v1350_v56 }
  0x58   : > { %837 = vmatmul.mubr.bf16.gmra.mrb[16].mxu0 %v1361_v60 }
  0x59   : > { %846 = vmatprep.mubr.bf16.mxu0 %v1417_v0 }
  0x5e   : > { %694 = vmatmul.mubr.bf16.gmra.mrb[4].mxu1 %v1352_v58 }
  0x5f   : > { %703 = vmatprep.mubr.bf16.mxu1 %v1354_v59 }
  0x60   : > { %847 = vmatmul.mubr.bf16.gmra.mrb[20].mxu0 %v1365_v63 }
  0x61   : > { %856 = vmatprep.mubr.bf16.mxu0 %v1417_v0 }
  0x66   : > { %704 = vmatmul.mubr.bf16.gmra.mrb[8].mxu1 %v1356_v61 }
  0x67   : > { %713 = vmatprep.mubr.bf16.mxu1 %v1358_v62 }
  0x68   : > { %857 = vmatmul.mubr.bf16.gmra.mrb[24].mxu0 %v1369_v3 }
  0x69   : > { %866 = vmatprep.mubr.bf16.mxu0 %v1417_v0  ;;  %v1372_v0 = vld [vmem:[%s1665_s1 + $0x90] ss:$12 sps:$4 sm:$0xff]  }
  0x6e   : > { %714 = vmatmul.mubr.bf16.gmra.mrb[12].mxu1 %v1360_v1 }
  0x6f   : > { %723 = vmatprep.mubr.bf16.mxu1 %v1362_v2 }
  0x70   : > { %867 = vmatmul.mubr.bf16.gmra.mrb[28].mxu0 %v1373_v6 }
  0x76   : > { %724 = vmatmul.mubr.bf16.gmra.mrb[16].mxu1 %v1364_v4 }
  0x77   : > { %733 = vmatprep.mubr.bf16.mxu1 %v1366_v5 }
  0x7e   : > { %734 = vmatmul.mubr.bf16.gmra.mrb[20].mxu1 %v1368_v7 }
  0x7f   : > { %743 = vmatprep.mubr.bf16.mxu1 %v1370_v8 }
  0x86   : > { %744 = vmatmul.mubr.bf16.gmra.mrb[24].mxu1 %v1372_v0 }
  0x87   : > { %753 = vmatprep.mubr.bf16.mxu1 %v1374_v9 }
  0x8a   : > { %v1615_v34 = vpop.permute.xlu0 %885 }
  0x8e   : > { %754 = vmatmul.mubr.bf16.gmra.mrb[28].mxu1 %v1376_v10  ;;  %v1618_v47 = vpop.permute.xlu0 %890 }
 0x10b   : > { %v798_v11 = vpop.f32.mrb[0].mxu0 }
 0x10c   : > { %v800_v12 = vpop.f32.mrb[1].mxu0 }
 0x10d   : > { %v802_v13 = vpop.f32.mrb[2].mxu0 }
 0x10e   : > { %v804_v14 = vpop.f32.mrb[3].mxu0 }
 0x113   : > { %v808_v15 = vpop.f32.mrb[4].mxu0 }
 0x114   : > { %v810_v16 = vpop.f32.mrb[5].mxu0 }
 0x115   : > { %v812_v17 = vpop.f32.mrb[6].mxu0 }
 0x116   : > { %v814_v18 = vpop.f32.mrb[7].mxu0 }
 0x11b   : > { %v818_v19 = vpop.f32.mrb[8].mxu0 }
 0x11c   : > { %v820_v20 = vpop.f32.mrb[9].mxu0 }
 0x11d   : > { %v822_v21 = vpop.f32.mrb[10].mxu0 }
 0x11e   : > { %v824_v22 = vpop.f32.mrb[11].mxu0 }
 0x123   : > { %v828_v30 = vpop.f32.mrb[12].mxu0 }
 0x124   : > { %v830_v32 = vpop.f32.mrb[13].mxu0 }
 0x125   : > { %v832_v33 = vpop.f32.mrb[14].mxu0 }
 0x126   : > { %v834_v35 = vpop.f32.mrb[15].mxu0 }
 0x129   : > { %v685_v23 = vpop.f32.mrb[0].mxu1 }
 0x12a   : > { %v799_v24 = vadd.f32 %v798_v11, %v685_v23  ;;  %v687_v25 = vpop.f32.mrb[1].mxu1 }
 0x12b   : > { %v801_v26 = vadd.f32 %v800_v12, %v687_v25  ;;  %v689_v27 = vpop.f32.mrb[2].mxu1  ;;  %v838_v44 = vpop.f32.mrb[16].mxu0 }
 0x12c   : > { %v803_v28 = vadd.f32 %v802_v13, %v689_v27  ;;  %v691_v29 = vpop.f32.mrb[3].mxu1  ;;  %v840_v48 = vpop.f32.mrb[17].mxu0 }
 0x12d   : > { %v805_v31 = vadd.f32 %v804_v14, %v691_v29  ;;  %v842_v51 = vpop.f32.mrb[18].mxu0 }
 0x12e   : > { %v844_v54 = vpop.f32.mrb[19].mxu0 }
 0x131   : > { %v695_v36 = vpop.f32.mrb[4].mxu1 }
 0x132   : > { %v809_v37 = vadd.f32 %v808_v15, %v695_v36  ;;  %v697_v38 = vpop.f32.mrb[5].mxu1 }
 0x133   : > { %v811_v39 = vadd.f32 %v810_v16, %v697_v38  ;;  %v699_v40 = vpop.f32.mrb[6].mxu1  ;;  %v848_v6 = vpop.f32.mrb[20].mxu0 }
 0x134   : > { %v879_v41 = vmax.f32 %v799_v24, %v809_v37  ;;  %v813_v42 = vadd.f32 %v812_v17, %v699_v40  ;;  %v701_v43 = vpop.f32.mrb[7].mxu1  ;;  %v850_v0 = vpop.f32.mrb[21].mxu0 }
 0x135   : > { %v880_v45 = vmax.f32 %v801_v26, %v811_v39  ;;  %v815_v46 = vadd.f32 %v814_v18, %v701_v43  ;;  %v852_v9 = vpop.f32.mrb[22].mxu0 }
 0x136   : > { %v893_v49 = vadd.f32 %v1615_v34, %v879_v41  ;;  %v881_v50 = vmax.f32 %v803_v28, %v813_v42  ;;  %v854_v10 = vpop.f32.mrb[23].mxu0 }
 0x137   : > { %v894_v52 = vadd.f32 %v1615_v34, %v880_v45  ;;  %v882_v53 = vmax.f32 %v805_v31, %v815_v46 }
 0x138   : > { %v897_v55 = vmax.f32 %v893_v49, 0.0  ;;  %v895_v56 = vadd.f32 %v1618_v47, %v881_v50 }
 0x139   : > { %v898_v57 = vmax.f32 %v894_v52, 0.0  ;;  %v896_v58 = vadd.f32 %v1618_v47, %v882_v53  ;;  %v705_v59 = vpop.f32.mrb[8].mxu1 }
 0x13a   : > { %v899_v60 = vmax.f32 %v895_v56, 0.0  ;;  %v819_v61 = vadd.f32 %v818_v19, %v705_v59  ;;  %v707_v62 = vpop.f32.mrb[9].mxu1 }
 0x13b   : > { %v1189_v63 = vpack.c.bf16 %v898_v57, %v897_v55  ;;  %v900_v1 = vmax.f32 %v896_v58, 0.0  ;;  %v821_v2 = vadd.f32 %v820_v20, %v707_v62  ;;  %v709_v3 = vpop.f32.mrb[10].mxu1  ;;  %v858_v19 = vpop.f32.mrb[24].mxu0 }
 0x13c   : > { %v823_v4 = vadd.f32 %v822_v21, %v709_v3  ;;  %v711_v5 = vpop.f32.mrb[11].mxu1  ;;  %v860_v23 = vpop.f32.mrb[25].mxu0 }
 0x13d   : > { %913 = vst [vmem:[%s1627_s22] sm:$0xff] %v1189_v63  ;;  %v1190_v7 = vpack.c.bf16 %v900_v1, %v899_v60  ;;  %v825_v8 = vadd.f32 %v824_v22, %v711_v5  ;;  %v862_v22 = vpop.f32.mrb[26].mxu0 }
 0x13e   : > { %v864_v28 = vpop.f32.mrb[27].mxu0 }
 0x13f   : > { %914 = vst [vmem:[%s1627_s22 + $0x8] sm:$0xff] %v1190_v7 }
 0x141   : > { %v715_v11 = vpop.f32.mrb[12].mxu1 }
 0x142   : > { %v829_v12 = vadd.f32 %v828_v30, %v715_v11  ;;  %v717_v13 = vpop.f32.mrb[13].mxu1 }
 0x143   : > { %v831_v14 = vadd.f32 %v830_v32, %v717_v13  ;;  %v719_v15 = vpop.f32.mrb[14].mxu1  ;;  %v868_v45 = vpop.f32.mrb[28].mxu0 }
 0x144   : > { %v915_v16 = vmax.f32 %v819_v61, %v829_v12  ;;  %v833_v17 = vadd.f32 %v832_v33, %v719_v15  ;;  %v721_v18 = vpop.f32.mrb[15].mxu1  ;;  %v870_v50 = vpop.f32.mrb[29].mxu0 }
 0x145   : > { %v916_v20 = vmax.f32 %v821_v2, %v831_v14  ;;  %v835_v21 = vadd.f32 %v834_v35, %v721_v18  ;;  %v872_v52 = vpop.f32.mrb[30].mxu0 }
 0x146   : > { %v919_v24 = vadd.f32 %v915_v16, %v1615_v34  ;;  %v917_v25 = vmax.f32 %v823_v4, %v833_v17  ;;  %v874_v53 = vpop.f32.mrb[31].mxu0 }
 0x147   : > { %v920_v26 = vadd.f32 %v916_v20, %v1615_v34  ;;  %v918_v27 = vmax.f32 %v825_v8, %v835_v21 }
 0x148   : > { %v923_v29 = vmax.f32 %v919_v24, 0.0  ;;  %v921_v30 = vadd.f32 %v917_v25, %v1618_v47 }
 0x149   : > { %v924_v31 = vmax.f32 %v920_v26, 0.0  ;;  %v922_v32 = vadd.f32 %v918_v27, %v1618_v47  ;;  %v725_v33 = vpop.f32.mrb[16].mxu1 }
 0x14a   : > { %v925_v36 = vmax.f32 %v921_v30, 0.0  ;;  %v839_v35 = vadd.f32 %v838_v44, %v725_v33  ;;  %v727_v37 = vpop.f32.mrb[17].mxu1 }
 0x14b   : > { %v1191_v38 = vpack.c.bf16 %v924_v31, %v923_v29  ;;  %v926_v39 = vmax.f32 %v922_v32, 0.0  ;;  %v841_v40 = vadd.f32 %v840_v48, %v727_v37  ;;  %v729_v41 = vpop.f32.mrb[18].mxu1 }
 0x14c   : > { %v843_v42 = vadd.f32 %v842_v51, %v729_v41  ;;  %v731_v43 = vpop.f32.mrb[19].mxu1 }
 0x14d   : > { %1176 = vst [vmem:[%s1627_s22 + $0x10] sm:$0xff] %v1191_v38  ;;  %v1192_v46 = vpack.c.bf16 %v926_v39, %v925_v36  ;;  %v845_v49 = vadd.f32 %v844_v54, %v731_v43 }
 0x14f   : > { %1177 = vst [vmem:[%s1627_s22 + $0x18] sm:$0xff] %v1192_v46 }
 0x151   : > { %v735_v55 = vpop.f32.mrb[20].mxu1 }
 0x152   : > { %v849_v56 = vadd.f32 %v848_v6, %v735_v55  ;;  %v737_v57 = vpop.f32.mrb[21].mxu1 }
 0x153   : > { %v851_v58 = vadd.f32 %v850_v0, %v737_v57  ;;  %v739_v44 = vpop.f32.mrb[22].mxu1 }
 0x154   : > { %v942_v59 = vmax.f32 %v839_v35, %v849_v56  ;;  %v853_v60 = vadd.f32 %v852_v9, %v739_v44  ;;  %v741_v61 = vpop.f32.mrb[23].mxu1 }
 0x155   : > { %v943_v48 = vmax.f32 %v841_v40, %v851_v58  ;;  %v855_v62 = vadd.f32 %v854_v10, %v741_v61 }
 0x156   : > { %v946_v51 = vadd.f32 %v942_v59, %v1615_v34  ;;  %v944_v63 = vmax.f32 %v843_v42, %v853_v60 }
 0x157   : > { %v947_v1 = vadd.f32 %v943_v48, %v1615_v34  ;;  %v945_v54 = vmax.f32 %v845_v49, %v855_v62 }
 0x158   : > { %v950_v2 = vmax.f32 %v946_v51, 0.0  ;;  %v948_v3 = vadd.f32 %v944_v63, %v1618_v47 }
 0x159   : > { %v951_v4 = vmax.f32 %v947_v1, 0.0  ;;  %v949_v5 = vadd.f32 %v945_v54, %v1618_v47  ;;  %v745_v6 = vpop.f32.mrb[24].mxu1 }
 0x15a   : > { %v952_v7 = vmax.f32 %v948_v3, 0.0  ;;  %v859_v8 = vadd.f32 %v858_v19, %v745_v6  ;;  %v747_v0 = vpop.f32.mrb[25].mxu1 }
 0x15b   : > { %v1193_v9 = vpack.c.bf16 %v951_v4, %v950_v2  ;;  %v953_v10 = vmax.f32 %v949_v5, 0.0  ;;  %v861_v11 = vadd.f32 %v860_v23, %v747_v0  ;;  %v749_v12 = vpop.f32.mrb[26].mxu1 }
 0x15c   : > { %v863_v13 = vadd.f32 %v862_v22, %v749_v12  ;;  %v751_v14 = vpop.f32.mrb[27].mxu1 }
 0x15d   : > { %1180 = vst [vmem:[%s1627_s22 + $0x20] sm:$0xff] %v1193_v9  ;;  %v1194_v15 = vpack.c.bf16 %v953_v10, %v952_v7  ;;  %v865_v16 = vadd.f32 %v864_v28, %v751_v14 }
 0x15f   : > { %1181 = vst [vmem:[%s1627_s22 + $0x28] sm:$0xff] %v1194_v15 }
 0x161   : > { %v755_v17 = vpop.f32.mrb[28].mxu1 }
 0x162   : > { %v869_v18 = vadd.f32 %v868_v45, %v755_v17  ;;  %v757_v20 = vpop.f32.mrb[29].mxu1 }
 0x163   : > { %v871_v21 = vadd.f32 %v870_v50, %v757_v20  ;;  %v759_v24 = vpop.f32.mrb[30].mxu1 }
 0x164   : > { %v969_v25 = vmax.f32 %v859_v8, %v869_v18  ;;  %v873_v26 = vadd.f32 %v872_v52, %v759_v24  ;;  %v761_v19 = vpop.f32.mrb[31].mxu1 }
 0x165   : > { %v970_v27 = vmax.f32 %v861_v11, %v871_v21  ;;  %v875_v29 = vadd.f32 %v874_v53, %v761_v19 }
 0x166   : > { %v973_v23 = vadd.f32 %v969_v25, %v1615_v34  ;;  %v971_v22 = vmax.f32 %v863_v13, %v873_v26 }
 0x167   : > { %v974_v30 = vadd.f32 %v970_v27, %v1615_v34  ;;  %v972_v31 = vmax.f32 %v865_v16, %v875_v29 }
 0x168   : > { %v977_v28 = vmax.f32 %v973_v23, 0.0  ;;  %v975_v32 = vadd.f32 %v971_v22, %v1618_v47 }
 0x169   : > { %v978_v33 = vmax.f32 %v974_v30, 0.0  ;;  %v976_v36 = vadd.f32 %v972_v31, %v1618_v47 }
 0x16a   : > { %v979_v35 = vmax.f32 %v975_v32, 0.0 }
 0x16b   : > { %v1195_v37 = vpack.c.bf16 %v978_v33, %v977_v28  ;;  %v980_v38 = vmax.f32 %v976_v36, 0.0 }
 0x16d   : > { %1184 = vst [vmem:[%s1627_s22 + $0x30] sm:$0xff] %v1195_v37  ;;  %v1196_v39 = vpack.c.bf16 %v980_v38, %v979_v35 }
 0x16f   : > { %1185 = vst [vmem:[%s1627_s22 + $0x38] sm:$0xff] %v1196_v39 }
 0x170 PF: > { %s13_s16 = sadd.s32 1, %s1415_s16   ;;  %s1668_s12 = smov %s1407_s14 }
 0x171   : > { %p10_p7 = scmp.ge.s32.totalorder %s13_s16, 64   ;;  %s1669_s13 = smov %s1411_s15 }
 0x172   : > { %s1670_s14 = smov %s1673_s17  ;;  %s1671_s15 = smov %s1677_s18 }
 0x173   :  { %12 = sbr.rel (!%p10_p7) target bundleno = 3 (0x3), region = 66 }

// kernel: simple_cnn_forward.7
= control target key start
LH: loop header
LB: loop body
LE: loop exit
PB: predicated region body
PF: predicated region fallthrough
CT: control target
= control target key end

     0   :  { %s2188_s12 = smov 0   ;;  %s2190_s13 = smov 0   ;;  %s2610_s0 = inlined_call_operand.vmem [shape: bf16[2,9920,128], index: 0, kind: input, shape index: {}]   ;;  %s2611_s1 = inlined_call_operand.vmem [shape: bf16[128,960], index: 1, kind: input, shape index: {}]   ;;  %s2612_s2 = inlined_call_operand.vmem [shape: f32[16,1], index: 2, kind: input, shape index: {}]   ;;  %s2613_s3 = inlined_call_operand.vmem [shape: bf16[2,60,16,128], index: 3, kind: output, shape index: {}]  }
   0x1   :  { %s2192_s14 = smov 0   ;;  %s2194_s15 = smov 0  }
   0x2   :  { %s2196_s16 = smov 0  }
   0x3 LB: > { %s22_s17 = sadd.s32 1, %s2157_s14  ;;  %s25_s18 = sadd.s32 1, %s2161_s15  ;;  %s2165_s16 = sphi %s2196_s16, %s13_s16   ;;  %s2161_s15 = sphi %s2194_s15, %s2617_s15   ;;  %s2157_s14 = sphi %s2192_s14, %s2616_s14   ;;  %s2153_s13 = sphi %s2190_s13, %s2615_s13   ;;  %s2149_s12 = sphi %s2188_s12, %s2614_s12  }
   0x4   : > { %p23_p0 = scmp.ge.s32.totalorder %s22_s17, 15  ;;  %p1646_p1 = scmp.ge.s32.totalorder %s2165_s16, 1 }
   0x5   : > { %p151_p2 = scmp.lt.s32.totalorder %s2165_s16, 31 }
   0x6   : > { %s2619_s17 = smov (%p23_p0, %s22_s17), 0  ;;  %s2621_s18 = smov (!%p23_p0, %s25_s18), %s2161_s15 }
   0x7   : > { %p152_p3 = pnand %p1646_p1, %p151_p2  ;;  %p27_p4 = scmp.ge.s32.totalorder %s2621_s18, 2 }
   0x8   : > { %p180_p5 = scmp.lt.s32.totalorder (!%p152_p3), %s2153_s13, 1  ;;  %s197_s19 = smul.u32 (!%p152_p3), 640, %s2149_s12  ;;  %v2224_v0 = vld [vmem:[%s2611_s1] sm:$0xff] (!%p152_p3)  ;;  %v2234_v2 = vld [vmem:[%s2611_s1 + $0x8] sm:$0xff] (!%p152_p3)  ;;  %v2167_v5 = vmov (!%p152_p3), 0   ;;  %vm1058_vm0 = vcmask (!%p152_p3), 523264  }
   0x9   : > { %s2623_s18 = smov (%p27_p4, %s2621_s18), 0  ;;  %155 = sbr.rel (%p152_p3) target bundleno = 405 (0x195), region = 32 }
   0xa   : > { %v2229_v1 = vld [vmem:[%s2611_s1 + $0x20] sm:$0xff] (!%p152_p3)  ;;  %v2241_v4 = vld [vmem:[%s2611_s1 + $0x28] sm:$0xff] (!%p152_p3)  ;;  %2066 = vset.pattern.permute.xlu0 (!%p152_p3), %v2167_v5  ;;  %s198_s28 = sshra.s32 (!%p152_p3), %s197_s19, 3 }
   0xb   : > { %v1653_v3 = vcombine.high (!%p152_p3), %v2224_v0, %v2229_v1  ;;  %v1655_v6 = vcombine.high (!%p152_p3), %v2234_v2, %v2241_v4  ;;  %s1651_s30 = sshll.u32 (!%p152_p3), %s198_s28, 2  ;;  %v330_v36 = vld [vmem:[%s2611_s1 + $0x40] sm:$0xff] (!%p152_p3)  ;;  %v331_v39 = vld [vmem:[%s2611_s1 + $0x48] sm:$0xff] (!%p152_p3)  ;;  %v1652_v43 = vcombine.low (!%p152_p3), %v2224_v0, %v2229_v1  ;;  %v1654_v44 = vcombine.low (!%p152_p3), %v2234_v2, %v2241_v4 }
   0xc   : > { %v334_v37 = vld [vmem:[%s2611_s1 + $0x60] sm:$0xff] (!%p152_p3)  ;;  %v335_v40 = vld [vmem:[%s2611_s1 + $0x68] sm:$0xff] (!%p152_p3) }
   0xd   : > { %1115 = vmatprep.mubr.bf16.mxu0 (!%p152_p3), %v1653_v3  ;;  %1212 = vmatprep.mubr.bf16.mxu1 (!%p152_p3), %v1655_v6  ;;  %v1661_v47 = vcombine.high (!%p152_p3), %v330_v36, %v334_v37  ;;  %v1663_v49 = vcombine.high (!%p152_p3), %v331_v39, %v335_v40  ;;  %v338_v51 = vld [vmem:[%s2611_s1 + $0x80] sm:$0xff] (!%p152_p3)  ;;  %v339_v54 = vld [vmem:[%s2611_s1 + $0x88] sm:$0xff] (!%p152_p3)  ;;  %v1660_v58 = vcombine.low (!%p152_p3), %v330_v36, %v334_v37 }
   0xe   : > { %v342_v52 = vld [vmem:[%s2611_s1 + $0xa0] sm:$0xff] (!%p152_p3)  ;;  %v343_v55 = vld [vmem:[%s2611_s1 + $0xa8] sm:$0xff] (!%p152_p3)  ;;  %v1662_v59 = vcombine.low (!%p152_p3), %v331_v39, %v335_v40 }
   0xf   : > { %v1669_v60 = vcombine.high (!%p152_p3), %v338_v51, %v342_v52  ;;  %v1671_v62 = vcombine.high (!%p152_p3), %v339_v54, %v343_v55  ;;  %v346_v1 = vld [vmem:[%s2611_s1 + $0xc0] sm:$0xff] (!%p152_p3)  ;;  %v347_v4 = vld [vmem:[%s2611_s1 + $0xc8] sm:$0xff] (!%p152_p3) }
  0x10   : > { %s2625_s13 = smov (!%p180_p5, %s2153_s13), 1  ;;  %v350_v2 = vld [vmem:[%s2611_s1 + $0xe0] sm:$0xff]  ;;  %v351_v6 = vld [vmem:[%s2611_s1 + $0xe8] sm:$0xff] }
  0x11   : > { %s2023_s29 = smul.u32 4960, %s2625_s13 }
  0x13   : > { %s184_s6 = scalar_lea.vmem %s2610_s0, %s2023_s29 }
  0x14   : > { %s2252_s7 = scalar_lea.vmem %s184_s6, %s1651_s30 }
  0x15   : > { %v2067_v7 = vld [vmem:[%s2252_s7 + $0x40] sm:$0xff]   ;;  %v2071_v11 = vld [vmem:[%s2252_s7 + $0x48] sm:$0xff]   ;;  %v2075_v15 = vld [vmem:[%s2252_s7 + $0x50] sm:$0xff]  }
  0x16   : > { %v2068_v8 = vld [vmem:[%s2252_s7 + $0xc0] sm:$0xff]   ;;  %1831 = vmatprep.subr.bf16.mxu0 %v2067_v7  ;;  %v2072_v12 = vld [vmem:[%s2252_s7 + $0xc8] sm:$0xff]   ;;  %v2076_v16 = vld [vmem:[%s2252_s7 + $0xd0] sm:$0xff]  }
  0x17   : > { %v2069_v9 = vld [vmem:[%s2252_s7] sm:$0xff]   ;;  %1895 = vmatprep.subr.bf16.mxu1 %v2068_v8  ;;  %v2073_v13 = vld [vmem:[%s2252_s7 + $0x8] sm:$0xff]   ;;  %v2077_v17 = vld [vmem:[%s2252_s7 + $0x10] sm:$0xff]  }
  0x18   : > { %v2070_v10 = vld [vmem:[%s2252_s7 + $0x80] sm:$0xff]   ;;  %1832 = vmatpush3.bf16.msra.mxu0 %v2069_v9  ;;  %v2074_v14 = vld [vmem:[%s2252_s7 + $0x88] sm:$0xff]   ;;  %v2078_v18 = vld [vmem:[%s2252_s7 + $0x90] sm:$0xff]   ;;  %v1668_v9 = vcombine.low %v338_v51, %v342_v52 }
  0x19   : > { %1896 = vmatpush3.bf16.msra.mxu1 %v2070_v10  ;;  %1833 = vmatprep.subr.bf16.mxu0 %v2071_v11  ;;  %v2079_v19 = vld [vmem:[%s2252_s7 + $0x58] sm:$0xff]   ;;  %v2083_v23 = vld [vmem:[%s2252_s7 + $0x60] sm:$0xff]   ;;  %v2087_v27 = vld [vmem:[%s2252_s7 + $0x68] sm:$0xff]   ;;  %v1670_v10 = vcombine.low %v339_v54, %v343_v55  ;;  %v1677_v11 = vcombine.high %v346_v1, %v350_v2 }
  0x1a   : > { %1897 = vmatprep.subr.bf16.mxu1 %v2072_v12  ;;  %v2080_v20 = vld [vmem:[%s2252_s7 + $0xd8] sm:$0xff]   ;;  %v2084_v24 = vld [vmem:[%s2252_s7 + $0xe0] sm:$0xff]   ;;  %v2088_v28 = vld [vmem:[%s2252_s7 + $0xe8] sm:$0xff]  }
  0x1b   : > { %v2081_v21 = vld [vmem:[%s2252_s7 + $0x18] sm:$0xff]   ;;  %v2085_v25 = vld [vmem:[%s2252_s7 + $0x20] sm:$0xff]   ;;  %v2089_v29 = vld [vmem:[%s2252_s7 + $0x28] sm:$0xff]  }
  0x1c   : > { %1834 = vmatpush3.bf16.msra.mxu0 %v2073_v13  ;;  %v2082_v22 = vld [vmem:[%s2252_s7 + $0x98] sm:$0xff]   ;;  %v2086_v26 = vld [vmem:[%s2252_s7 + $0xa0] sm:$0xff]   ;;  %v2090_v30 = vld [vmem:[%s2252_s7 + $0xa8] sm:$0xff]   ;;  %v1679_v13 = vcombine.high %v347_v4, %v351_v6 }
  0x1d   : > { %1898 = vmatpush3.bf16.msra.mxu1 %v2074_v14  ;;  %1835 = vmatprep.subr.bf16.mxu0 %v2075_v15  ;;  %v2091_v31 = vld [vmem:[%s2252_s7 + $0x70] sm:$0xff]   ;;  %v2095_v35 = vld [vmem:[%s2252_s7 + $0x78] sm:$0xff]   ;;  %v2099_v45 = vld [vmem:[%s2252_s7 + $0x140] sm:$0xff]  }
  0x1e   : > { %1899 = vmatprep.subr.bf16.mxu1 %v2076_v16  ;;  %v2092_v32 = vld [vmem:[%s2252_s7 + $0xf0] sm:$0xff]   ;;  %v2096_v38 = vld [vmem:[%s2252_s7 + $0xf8] sm:$0xff]   ;;  %v2100_v46 = vld [vmem:[%s2252_s7 + $0x100] sm:$0xff]  }
  0x1f   : > { %v2093_v33 = vld [vmem:[%s2252_s7 + $0x30] sm:$0xff]   ;;  %v2097_v41 = vld [vmem:[%s2252_s7 + $0x38] sm:$0xff]   ;;  %v2101_v48 = vld [vmem:[%s2252_s7 + $0x180] sm:$0xff]  }
  0x20   : > { %1836 = vmatpush3.bf16.msra.mxu0 %v2077_v17  ;;  %v2094_v34 = vld [vmem:[%s2252_s7 + $0xb0] sm:$0xff]   ;;  %v2098_v42 = vld [vmem:[%s2252_s7 + $0xb8] sm:$0xff]   ;;  %v2102_v50 = vld [vmem:[%s2252_s7 + $0x148] sm:$0xff]  }
  0x21   : > { %1900 = vmatpush3.bf16.msra.mxu1 %v2078_v18  ;;  %1837 = vmatprep.subr.bf16.mxu0 %v2079_v19  ;;  %v2103_v53 = vld [vmem:[%s2252_s7 + $0x108] sm:$0xff]   ;;  %v2105_v57 = vld [vmem:[%s2252_s7 + $0x150] sm:$0xff]   ;;  %v2109_v0 = vld [vmem:[%s2252_s7 + $0x158] sm:$0xff]  }
  0x22   : > { %1901 = vmatprep.subr.bf16.mxu1 %v2080_v20  ;;  %v2104_v56 = vld [vmem:[%s2252_s7 + $0x188] sm:$0xff]   ;;  %v2106_v61 = vld [vmem:[%s2252_s7 + $0x110] sm:$0xff]   ;;  %v2108_v3 = vld [vmem:[%s2252_s7 + $0x198] sm:$0xff]  }
  0x23   : > { %v2107_v63 = vld [vmem:[%s2252_s7 + $0x190] sm:$0xff]   ;;  %v2110_v7 = vld [vmem:[%s2252_s7 + $0x118] sm:$0xff]   ;;  %v2112_v8 = vld [vmem:[%s2252_s7 + $0x160] sm:$0xff]  }
  0x24   : > { %1838 = vmatpush3.bf16.msra.mxu0 %v2081_v21  ;;  %v2111_v12 = vld [vmem:[%s2252_s7 + $0x1a0] sm:$0xff]   ;;  %v2116_v15 = vld [vmem:[%s2252_s7 + $0x168] sm:$0xff]   ;;  %v2125_v51 = vld [vmem:[%s2252_s7 + $0x1d0] sm:$0xff]  }
  0x25   : > { %1902 = vmatpush3.bf16.msra.mxu1 %v2082_v22  ;;  %1839 = vmatprep.subr.bf16.mxu0 %v2083_v23  ;;  %v2113_v14 = vld [vmem:[%s2252_s7 + $0x120] sm:$0xff]   ;;  %v355_v18 = vld [vmem:[%s2611_s1 + $0x108] sm:$0xff]  ;;  %v2119_v22 = vld [vmem:[%s2252_s7 + $0x170] sm:$0xff]   ;;  %v1676_v23 = vcombine.low %v346_v1, %v350_v2 }
  0x26   : > { %1903 = vmatprep.subr.bf16.mxu1 %v2084_v24  ;;  %v354_v16 = vld [vmem:[%s2611_s1 + $0x100] sm:$0xff]  ;;  %v359_v19 = vld [vmem:[%s2611_s1 + $0x128] sm:$0xff]  ;;  %v1678_v24 = vcombine.low %v347_v4, %v351_v6  ;;  %v332_v6 = vld [vmem:[%s2611_s1 + $0x50] sm:$0xff] }
  0x27   : > { %v358_v17 = vld [vmem:[%s2611_s1 + $0x120] sm:$0xff]  ;;  %v2114_v20 = vld [vmem:[%s2252_s7 + $0x1a8] sm:$0xff]   ;;  %v1686_v37 = vcombine.low %v355_v18, %v359_v19 }
  0x28   : > { %1840 = vmatpush3.bf16.msra.mxu0 %v2085_v25  ;;  %v2117_v21 = vld [vmem:[%s2252_s7 + $0x128] sm:$0xff]   ;;  %v1685_v25 = vcombine.high %v354_v16, %v358_v17  ;;  %v1684_v36 = vcombine.low %v354_v16, %v358_v17  ;;  %v2121_v40 = vld [vmem:[%s2252_s7 + $0x1c0] sm:$0xff]   ;;  %v341_v16 = vld [vmem:[%s2611_s1 + $0x98] sm:$0xff] }
  0x29   : > { %1904 = vmatpush3.bf16.msra.mxu1 %v2086_v26  ;;  %1841 = vmatprep.subr.bf16.mxu0 %v2087_v27  ;;  %v1687_v26 = vcombine.high %v355_v18, %v359_v19  ;;  %v2120_v27 = vld [vmem:[%s2252_s7 + $0x130] sm:$0xff]   ;;  %v1472_v52 = vld [vmem:[%s2612_s2 + $0x8] sm:$0xff]  ;;  %v382_v54 = vld [vmem:[%s2611_s1 + $0x1e0] sm:$0xff] }
  0x2a   : > { %1905 = vmatprep.subr.bf16.mxu1 %v2088_v28  ;;  %v2115_v28 = vld [vmem:[%s2252_s7 + $0x1b0] sm:$0xff]   ;;  %v379_v55 = vld [vmem:[%s2611_s1 + $0x1c8] sm:$0xff]  ;;  %v345_v17 = vld [vmem:[%s2611_s1 + $0xb8] sm:$0xff] }
  0x2c   : > { %1842 = vmatpush3.bf16.msra.mxu0 %v2089_v29  ;;  %v362_v29 = vld [vmem:[%s2611_s1 + $0x140] sm:$0xff] }
  0x2d   : > { %1906 = vmatpush3.bf16.msra.mxu1 %v2090_v30  ;;  %1843 = vmatprep.subr.bf16.mxu0 %v2091_v31  ;;  %v366_v30 = vld [vmem:[%s2611_s1 + $0x160] sm:$0xff]  ;;  %v2123_v31 = vld [vmem:[%s2252_s7 + $0x178] sm:$0xff]  }
  0x2e   : > { %1907 = vmatprep.subr.bf16.mxu1 %v2092_v32  ;;  %v363_v32 = vld [vmem:[%s2611_s1 + $0x148] sm:$0xff] }
  0x30   : > { %1844 = vmatpush3.bf16.msra.mxu0 %v2093_v33  ;;  %v367_v33 = vld [vmem:[%s2611_s1 + $0x168] sm:$0xff] }
  0x31   : > { %1908 = vmatpush3.bf16.msra.mxu1 %v2094_v34  ;;  %1845 = vmatprep.subr.bf16.mxu0 %v2095_v35  ;;  %v2124_v34 = vld [vmem:[%s2252_s7 + $0x138] sm:$0xff]   ;;  %v1695_v39 = vcombine.high %v363_v32, %v367_v33 }
  0x32   : > { %1909 = vmatprep.subr.bf16.mxu1 %v2096_v38  ;;  %v2118_v35 = vld [vmem:[%s2252_s7 + $0x1b8] sm:$0xff]   ;;  %v1693_v38 = vcombine.high %v362_v29, %v366_v30 }
  0x34   : > { %1846 = vmatpush3.bf16.msra.mxu0 %v2097_v41  ;;  %v370_v41 = vld [vmem:[%s2611_s1 + $0x180] sm:$0xff] }
  0x35   : > { %1910 = vmatpush3.bf16.msra.mxu1 %v2098_v42  ;;  %1959 = vmatprep.subr.bf16.mxu0 %v2099_v45  ;;  %v374_v42 = vld [vmem:[%s2611_s1 + $0x1a0] sm:$0xff]  ;;  %v2122_v45 = vld [vmem:[%s2252_s7 + $0x1c8] sm:$0xff]  }
  0x36   : > { %1374 = vmatprep.subr.bf16.mxu1 %v2167_v5 }
  0x37   : > { %1116 = vmatmul.mubr.bf16.vlgmr.msra.gmra.mrb[0].mxu0 %v1652_v43  ;;  %v371_v43 = vld [vmem:[%s2611_s1 + $0x188] sm:$0xff] }
  0x38   : > { %1213 = vmatmul.mubr.bf16.vlgmr.msra.gmra.mrb[0].mxu1 %v1654_v44  ;;  %1960 = vmatpush3.bf16.msra.mxu0 %v2100_v46  ;;  %v375_v44 = vld [vmem:[%s2611_s1 + $0x1a8] sm:$0xff]  ;;  %v1692_v46 = vcombine.low %v362_v29, %v366_v30  ;;  %v356_v30 = vld [vmem:[%s2611_s1 + $0x110] sm:$0xff] }
  0x39   : > { %1375 = vmatpush1.bf16.msra.mxu1 %v2101_v48  ;;  %1123 = vmatprep.mubr.bf16.mxu0 %v1661_v47  ;;  %v1694_v47 = vcombine.low %v363_v32, %v367_v33  ;;  %v1701_v48 = vcombine.high %v370_v41, %v374_v42  ;;  %v357_v32 = vld [vmem:[%s2611_s1 + $0x118] sm:$0xff] }
  0x3a   : > { %1220 = vmatprep.mubr.bf16.mxu1 %v1663_v49  ;;  %1961 = vmatprep.subr.bf16.mxu0 %v2102_v50  ;;  %v1703_v49 = vcombine.high %v371_v43, %v375_v44  ;;  %v1471_v50 = vld [vmem:[%s2612_s2] sm:$0xff]  ;;  %v361_v33 = vld [vmem:[%s2611_s1 + $0x138] sm:$0xff] }
  0x3b   : > { %1376 = vmatprep.subr.bf16.mxu1 %v2167_v5  ;;  %1477 = vperm.xlu0 %2066, %v1471_v50  }
  0x3c   : > { %1962 = vmatpush3.bf16.msra.mxu0 %v2103_v53  ;;  %v378_v53 = vld [vmem:[%s2611_s1 + $0x1c0] sm:$0xff] }
  0x3d   : > { %1377 = vmatpush1.bf16.msra.mxu1 %v2104_v56  ;;  %1963 = vmatprep.subr.bf16.mxu0 %v2105_v57  ;;  %v383_v56 = vld [vmem:[%s2611_s1 + $0x1e8] sm:$0xff]  ;;  %v2126_v57 = vld [vmem:[%s2252_s7 + $0x1d8] sm:$0xff]   ;;  %v1708_v1 = vcombine.low %v378_v53, %v382_v54  ;;  %s1648_s7 = sshll.u32 %s2149_s12, 2  ;;  %s2024_s12 = smul.u32 120, %s2625_s13 }
  0x3e   : > { %1378 = vmatprep.subr.bf16.mxu1 %v2167_v5  ;;  %v1710_v2 = vcombine.low %v379_v55, %v383_v56  ;;  %p188_p6 = scmp.lt.s32.totalorder %s1648_s7, 59 }
  0x3f   : > { %1124 = vmatmul.mubr.bf16.gmra.mrb[4].mxu0 %v1660_v58  ;;  %1482 = vperm.xlu0 %2066, %v1472_v52   ;;  %v1700_v58 = vcombine.low %v370_v41, %v374_v42  ;;  %v369_v41 = vld [vmem:[%s2611_s1 + $0x178] sm:$0xff] }
  0x40   : > { %1221 = vmatmul.mubr.bf16.gmra.mrb[4].mxu1 %v1662_v59  ;;  %1131 = vmatprep.mubr.bf16.mxu0 %v1669_v60  ;;  %v1702_v59 = vcombine.low %v371_v43, %v375_v44  ;;  %v1709_v60 = vcombine.high %v378_v53, %v382_v54  ;;  %v1690_v43 = vcombine.low %v357_v32, %v361_v33  ;;  %v380_v54 = vld [vmem:[%s2611_s1 + $0x1d0] sm:$0xff]  ;;  %s2627_s7 = smov (!%p188_p6, %s1648_s7), 59 }
  0x41   : > { %1228 = vmatprep.mubr.bf16.mxu1 %v1671_v62  ;;  %1964 = vmatpush3.bf16.msra.mxu0 %v2106_v61  ;;  %v1711_v61 = vcombine.high %v379_v55, %v383_v56  ;;  %v324_v62 = vld [vmem:[%s2611_s1 + $0x10] sm:$0xff]  ;;  %v381_v56 = vld [vmem:[%s2611_s1 + $0x1d8] sm:$0xff]  ;;  %s1649_s22 = sshll.u32 %s2627_s7, 1 }
  0x42   : > { %1379 = vmatpush1.bf16.msra.mxu1 %v2107_v63  ;;  %1965 = vmatprep.subr.bf16.mxu0 %v2109_v0  ;;  %v328_v63 = vld [vmem:[%s2611_s1 + $0x30] sm:$0xff]  ;;  %v329_v0 = vld [vmem:[%s2611_s1 + $0x38] sm:$0xff]  ;;  %s192_s23 = sadd.s32 %s2024_s12, %s1649_s22 }
  0x43   : > { %1380 = vmatprep.subr.bf16.mxu1 %v2167_v5  ;;  %v384_v55 = vld [vmem:[%s2611_s1 + $0x1f0] sm:$0xff]  ;;  %s1650_s13 = sshll.u32 %s192_s23, 2 }
  0x44   : > { %s2573_s26 = scalar_lea.vmem %s2613_s3, %s1650_s13 }
  0x45   : > { %1966 = vmatpush3.bf16.msra.mxu0 %v2110_v7  ;;  %v336_v7 = vld [vmem:[%s2611_s1 + $0x70] sm:$0xff] }
  0x46   : > { %1381 = vmatpush1.bf16.msra.mxu1 %v2108_v3  ;;  %1967 = vmatprep.subr.bf16.mxu0 %v2112_v8  ;;  %v1657_v3 = vcombine.high %v324_v62, %v328_v63  ;;  %v333_v8 = vld [vmem:[%s2611_s1 + $0x58] sm:$0xff]  ;;  %v1664_v18 = vcombine.low %v332_v6, %v336_v7 }
  0x47   : > { %1132 = vmatmul.mubr.bf16.gmra.mrb[8].mxu0 %v1668_v9  ;;  %1382 = vmatprep.subr.bf16.mxu1 %v2167_v5  ;;  %v337_v9 = vld [vmem:[%s2611_s1 + $0x78] sm:$0xff] }
  0x48   : > { %1229 = vmatmul.mubr.bf16.gmra.mrb[8].mxu1 %v1670_v10  ;;  %1139 = vmatprep.mubr.bf16.mxu0 %v1677_v11  ;;  %v1656_v10 = vcombine.low %v324_v62, %v328_v63  ;;  %v1666_v19 = vcombine.low %v333_v8, %v337_v9  ;;  %v1712_v62 = vcombine.low %v380_v54, %v384_v55 }
  0x49   : > { %1236 = vmatprep.mubr.bf16.mxu1 %v1679_v13  ;;  %1968 = vmatpush3.bf16.msra.mxu0 %v2113_v14  ;;  %v1667_v13 = vcombine.high %v333_v8, %v337_v9  ;;  %v340_v14 = vld [vmem:[%s2611_s1 + $0x90] sm:$0xff] }
  0x4a   : > { %1383 = vmatpush1.bf16.msra.mxu1 %v2111_v12  ;;  %1969 = vmatprep.subr.bf16.mxu0 %v2116_v15  ;;  %v1665_v12 = vcombine.high %v332_v6, %v336_v7  ;;  %v344_v15 = vld [vmem:[%s2611_s1 + $0xb0] sm:$0xff] }
  0x4b   : > { %1384 = vmatprep.subr.bf16.mxu1 %v2167_v5 }
  0x4d   : > { %1970 = vmatpush3.bf16.msra.mxu0 %v2117_v21  ;;  %v1675_v21 = vcombine.high %v341_v16, %v345_v17 }
  0x4e   : > { %1385 = vmatpush1.bf16.msra.mxu1 %v2114_v20  ;;  %1971 = vmatprep.subr.bf16.mxu0 %v2119_v22  ;;  %v1673_v20 = vcombine.high %v340_v14, %v344_v15  ;;  %v348_v22 = vld [vmem:[%s2611_s1 + $0xd0] sm:$0xff] }
  0x4f   : > { %1140 = vmatmul.mubr.bf16.gmra.mrb[12].mxu0 %v1676_v23  ;;  %1386 = vmatprep.subr.bf16.mxu1 %v2167_v5  ;;  %v352_v23 = vld [vmem:[%s2611_s1 + $0xf0] sm:$0xff] }
  0x50   : > { %1237 = vmatmul.mubr.bf16.gmra.mrb[12].mxu1 %v1678_v24  ;;  %1147 = vmatprep.mubr.bf16.mxu0 %v1685_v25  ;;  %v349_v24 = vld [vmem:[%s2611_s1 + $0xd8] sm:$0xff] }
  0x51   : > { %1244 = vmatprep.mubr.bf16.mxu1 %v1687_v26  ;;  %1972 = vmatpush3.bf16.msra.mxu0 %v2120_v27  ;;  %v353_v25 = vld [vmem:[%s2611_s1 + $0xf8] sm:$0xff]  ;;  %v1672_v26 = vcombine.low %v340_v14, %v344_v15  ;;  %v1674_v27 = vcombine.low %v341_v16, %v345_v17 }
  0x52   : > { %1387 = vmatpush1.bf16.msra.mxu1 %v2115_v28  ;;  %1973 = vmatprep.subr.bf16.mxu0 %v2123_v31  ;;  %v1681_v28 = vcombine.high %v348_v22, %v352_v23  ;;  %v1683_v29 = vcombine.high %v349_v24, %v353_v25  ;;  %v360_v31 = vld [vmem:[%s2611_s1 + $0x130] sm:$0xff] }
  0x53   : > { %1388 = vmatprep.subr.bf16.mxu1 %v2167_v5  ;;  %v1688_v42 = vcombine.low %v356_v30, %v360_v31 }
  0x55   : > { %1974 = vmatpush3.bf16.msra.mxu0 %v2124_v34  ;;  %v1680_v34 = vcombine.low %v348_v22, %v352_v23 }
  0x56   : > { %1389 = vmatpush1.bf16.msra.mxu1 %v2118_v35  ;;  %v1682_v35 = vcombine.low %v349_v24, %v353_v25 }
  0x57   : > { %1148 = vmatmul.mubr.bf16.gmra.mrb[16].mxu0 %v1684_v36  ;;  %1390 = vmatprep.subr.bf16.mxu1 %v2167_v5  ;;  %v1689_v36 = vcombine.high %v356_v30, %v360_v31 }
  0x58   : > { %1245 = vmatmul.mubr.bf16.gmra.mrb[16].mxu1 %v1686_v37  ;;  %1155 = vmatprep.mubr.bf16.mxu0 %v1693_v38  ;;  %v1691_v37 = vcombine.high %v357_v32, %v361_v33  ;;  %v364_v38 = vld [vmem:[%s2611_s1 + $0x150] sm:$0xff] }
  0x59   : > { %1252 = vmatprep.mubr.bf16.mxu1 %v1695_v39  ;;  %v368_v39 = vld [vmem:[%s2611_s1 + $0x170] sm:$0xff] }
  0x5a   : > { %1391 = vmatpush1.bf16.msra.mxu1 %v2121_v40  ;;  %v365_v40 = vld [vmem:[%s2611_s1 + $0x158] sm:$0xff]  ;;  %v1697_v44 = vcombine.high %v364_v38, %v368_v39  ;;  %v1696_v50 = vcombine.low %v364_v38, %v368_v39 }
  0x5b   : > { %1392 = vmatprep.subr.bf16.mxu1 %v2167_v5 }
  0x5e   : > { %1393 = vmatpush1.bf16.msra.mxu1 %v2122_v45  ;;  %v1699_v45 = vcombine.high %v365_v40, %v369_v41 }
  0x5f   : > { %1156 = vmatmul.mubr.bf16.gmra.mrb[20].mxu0 %v1692_v46  ;;  %1394 = vmatprep.subr.bf16.mxu1 %v2167_v5  ;;  %v372_v46 = vld [vmem:[%s2611_s1 + $0x190] sm:$0xff] }
  0x60   : > { %1253 = vmatmul.mubr.bf16.gmra.mrb[20].mxu1 %v1694_v47  ;;  %1163 = vmatprep.mubr.bf16.mxu0 %v1701_v48  ;;  %v376_v47 = vld [vmem:[%s2611_s1 + $0x1b0] sm:$0xff]  ;;  %v373_v48 = vld [vmem:[%s2611_s1 + $0x198] sm:$0xff] }
  0x61   : > { %1260 = vmatprep.mubr.bf16.mxu1 %v1703_v49  ;;  %v377_v49 = vld [vmem:[%s2611_s1 + $0x1b8] sm:$0xff]  ;;  %v1705_v52 = vcombine.high %v372_v46, %v376_v47 }
  0x62   : > { %1395 = vmatpush1.bf16.msra.mxu1 %v2125_v51  ;;  %v1698_v51 = vcombine.low %v365_v40, %v369_v41  ;;  %v1707_v53 = vcombine.high %v373_v48, %v377_v49 }
  0x63   : > { %1396 = vmatprep.subr.bf16.mxu1 %v2167_v5  ;;  %v325_v5 = vld [vmem:[%s2611_s1 + $0x18] sm:$0xff] }
  0x64   : > { %v1659_v4 = vcombine.high %v325_v5, %v329_v0  ;;  %v1658_v11 = vcombine.low %v325_v5, %v329_v0 }
  0x66   : > { %1397 = vmatpush1.bf16.msra.mxu1 %v2126_v57  ;;  %v385_v57 = vld [vmem:[%s2611_s1 + $0x1f8] sm:$0xff] }
  0x67   : > { %1164 = vmatmul.mubr.bf16.gmra.mrb[24].mxu0 %v1700_v58  ;;  %v1704_v58 = vcombine.low %v372_v46, %v376_v47  ;;  %v1714_v63 = vcombine.low %v381_v56, %v385_v57 }
  0x68   : > { %1261 = vmatmul.mubr.bf16.gmra.mrb[24].mxu1 %v1702_v59  ;;  %1171 = vmatprep.mubr.bf16.mxu0 %v1709_v60  ;;  %v1706_v59 = vcombine.low %v373_v48, %v377_v49  ;;  %v1713_v60 = vcombine.high %v380_v54, %v384_v55 }
  0x69   : > { %1268 = vmatprep.mubr.bf16.mxu1 %v1711_v61  ;;  %v1715_v61 = vcombine.high %v381_v56, %v385_v57 }
  0x6f   : > { %1172 = vmatmul.mubr.bf16.gmra.mrb[28].mxu0 %v1708_v1 }
  0x70   : > { %1269 = vmatmul.mubr.bf16.gmra.mrb[28].mxu1 %v1710_v2  ;;  %1309 = vmatprep.mubr.bf16.mxu0 %v1657_v3 }
  0x71   : > { %1776 = vmatprep.mubr.msk.bf16.mxu1 %vm1058_vm0, %v1659_v4 }
  0x77   : > { %1310 = vmatmul.mubr.bf16.vlgmr.msra.gmra.mrb[32].mxu0 %v1656_v10 }
  0x78   : > { %1407 = vmatmul.mubr.bf16.vlgmr.msra.gmra.mrb[32].mxu1 %v1658_v11  ;;  %1317 = vmatprep.mubr.bf16.mxu0 %v1665_v12 }
  0x79   : > { %1777 = vmatprep.mubr.msk.bf16.mxu1 %vm1058_vm0, %v1667_v13 }
  0x7f   : > { %1318 = vmatmul.mubr.bf16.gmra.mrb[36].mxu0 %v1664_v18 }
  0x80   : > { %1415 = vmatmul.mubr.bf16.gmra.mrb[36].mxu1 %v1666_v19  ;;  %1325 = vmatprep.mubr.bf16.mxu0 %v1673_v20 }
  0x81   : > { %1778 = vmatprep.mubr.msk.bf16.mxu1 %vm1058_vm0, %v1675_v21 }
  0x87   : > { %1326 = vmatmul.mubr.bf16.gmra.mrb[40].mxu0 %v1672_v26 }
  0x88   : > { %1423 = vmatmul.mubr.bf16.gmra.mrb[40].mxu1 %v1674_v27  ;;  %1333 = vmatprep.mubr.bf16.mxu0 %v1681_v28 }
  0x89   : > { %1779 = vmatprep.mubr.msk.bf16.mxu1 %vm1058_vm0, %v1683_v29 }
  0x8f   : > { %1334 = vmatmul.mubr.bf16.gmra.mrb[44].mxu0 %v1680_v34 }
  0x90   : > { %1431 = vmatmul.mubr.bf16.gmra.mrb[44].mxu1 %v1682_v35  ;;  %1341 = vmatprep.mubr.bf16.mxu0 %v1689_v36 }
  0x91   : > { %1780 = vmatprep.mubr.msk.bf16.mxu1 %vm1058_vm0, %v1691_v37 }
  0x97   : > { %1342 = vmatmul.mubr.bf16.gmra.mrb[48].mxu0 %v1688_v42 }
  0x98   : > { %1439 = vmatmul.mubr.bf16.gmra.mrb[48].mxu1 %v1690_v43  ;;  %1349 = vmatprep.mubr.bf16.mxu0 %v1697_v44 }
  0x99   : > { %1781 = vmatprep.mubr.msk.bf16.mxu1 %vm1058_vm0, %v1699_v45 }
  0x9f   : > { %1350 = vmatmul.mubr.bf16.gmra.mrb[52].mxu0 %v1696_v50 }
  0xa0   : > { %1447 = vmatmul.mubr.bf16.gmra.mrb[52].mxu1 %v1698_v51  ;;  %1357 = vmatprep.mubr.bf16.mxu0 %v1705_v52 }
  0xa1   : > { %1782 = vmatprep.mubr.msk.bf16.mxu1 %vm1058_vm0, %v1707_v53 }
  0xa7   : > { %1358 = vmatmul.mubr.bf16.gmra.mrb[56].mxu0 %v1704_v58 }
  0xa8   : > { %1455 = vmatmul.mubr.bf16.gmra.mrb[56].mxu1 %v1706_v59  ;;  %1365 = vmatprep.mubr.bf16.mxu0 %v1713_v60 }
  0xa9   : > { %1783 = vmatprep.mubr.msk.bf16.mxu1 %vm1058_vm0, %v1715_v61 }
  0xaf   : > { %1366 = vmatmul.mubr.bf16.gmra.mrb[60].mxu0 %v1712_v62 }
  0xb0   : > { %1463 = vmatmul.mubr.bf16.gmra.mrb[60].mxu1 %v1714_v63 }
 0x10a   : > { %v1847_v5 = vpop.f32.mrb[0].mxu0 }
 0x10b   : > { %v1911_v0 = vpop.f32.mrb[0].mxu1  ;;  %v1848_v1 = vpop.f32.mrb[1].mxu0 }
 0x10c   : > { %v1849_v2 = vadd.f32 %v1848_v1, %v1847_v5  ;;  %v1912_v3 = vpop.f32.mrb[1].mxu1  ;;  %v1850_v4 = vpop.f32.mrb[2].mxu0 }
 0x10d   : > { %v1913_v6 = vadd.f32 %v1912_v3, %v1911_v0  ;;  %v1914_v7 = vpop.f32.mrb[2].mxu1  ;;  %v1851_v8 = vpop.f32.mrb[3].mxu0 }
 0x10e   : > { %v1852_v9 = vadd.f32 %v1851_v8, %v1850_v4  ;;  %v1915_v10 = vpop.f32.mrb[3].mxu1 }
 0x10f   : > { %v2524_v11 = vadd.f32 %v1913_v6, %v1849_v2  ;;  %v1916_v12 = vadd.f32 %v1915_v10, %v1914_v7 }
 0x111   : > { %v2526_v13 = vadd.f32 %v1916_v12, %v1852_v9 }
 0x112   : > { %v1853_v14 = vpop.f32.mrb[4].mxu0 }
 0x113   : > { %v1917_v15 = vpop.f32.mrb[4].mxu1  ;;  %v1854_v16 = vpop.f32.mrb[5].mxu0 }
 0x114   : > { %v1855_v17 = vadd.f32 %v1854_v16, %v1853_v14  ;;  %v1918_v18 = vpop.f32.mrb[5].mxu1  ;;  %v1856_v19 = vpop.f32.mrb[6].mxu0 }
 0x115   : > { %v1919_v20 = vadd.f32 %v1918_v18, %v1917_v15  ;;  %v1920_v21 = vpop.f32.mrb[6].mxu1  ;;  %v1857_v22 = vpop.f32.mrb[7].mxu0 }
 0x116   : > { %v1858_v23 = vadd.f32 %v1857_v22, %v1856_v19  ;;  %v1921_v24 = vpop.f32.mrb[7].mxu1 }
 0x117   : > { %v2528_v25 = vadd.f32 %v1919_v20, %v1855_v17  ;;  %v1922_v26 = vadd.f32 %v1921_v24, %v1920_v21 }
 0x119   : > { %v2530_v27 = vadd.f32 %v1922_v26, %v1858_v23 }
 0x11a   : > { %v1859_v28 = vpop.f32.mrb[8].mxu0 }
 0x11b   : > { %v1923_v29 = vpop.f32.mrb[8].mxu1  ;;  %v1860_v30 = vpop.f32.mrb[9].mxu0 }
 0x11c   : > { %v1861_v31 = vadd.f32 %v1860_v30, %v1859_v28  ;;  %v1924_v32 = vpop.f32.mrb[9].mxu1  ;;  %v1862_v33 = vpop.f32.mrb[10].mxu0 }
 0x11d   : > { %v1925_v34 = vadd.f32 %v1924_v32, %v1923_v29  ;;  %v1926_v35 = vpop.f32.mrb[10].mxu1  ;;  %v1863_v36 = vpop.f32.mrb[11].mxu0 }
 0x11e   : > { %v1864_v37 = vadd.f32 %v1863_v36, %v1862_v33  ;;  %v1927_v38 = vpop.f32.mrb[11].mxu1 }
 0x11f   : > { %v2532_v39 = vadd.f32 %v1925_v34, %v1861_v31  ;;  %v1928_v40 = vadd.f32 %v1927_v38, %v1926_v35 }
 0x121   : > { %v2534_v41 = vadd.f32 %v1928_v40, %v1864_v37 }
 0x122   : > { %v1865_v42 = vpop.f32.mrb[12].mxu0 }
 0x123   : > { %v1929_v43 = vpop.f32.mrb[12].mxu1  ;;  %v1866_v44 = vpop.f32.mrb[13].mxu0 }
 0x124   : > { %v1867_v45 = vadd.f32 %v1866_v44, %v1865_v42  ;;  %v1930_v46 = vpop.f32.mrb[13].mxu1  ;;  %v1868_v47 = vpop.f32.mrb[14].mxu0 }
 0x125   : > { %v1931_v48 = vadd.f32 %v1930_v46, %v1929_v43  ;;  %v1932_v49 = vpop.f32.mrb[14].mxu1  ;;  %v1869_v50 = vpop.f32.mrb[15].mxu0 }
 0x126   : > { %v1870_v51 = vadd.f32 %v1869_v50, %v1868_v47  ;;  %v1933_v52 = vpop.f32.mrb[15].mxu1 }
 0x127   : > { %v2536_v53 = vadd.f32 %v1931_v48, %v1867_v45  ;;  %v1934_v54 = vadd.f32 %v1933_v52, %v1932_v49 }
 0x129   : > { %v2538_v55 = vadd.f32 %v1934_v54, %v1870_v51 }
 0x12a   : > { %v1871_v56 = vpop.f32.mrb[16].mxu0 }
 0x12b   : > { %v1935_v57 = vpop.f32.mrb[16].mxu1  ;;  %v1872_v58 = vpop.f32.mrb[17].mxu0 }
 0x12c   : > { %v1873_v59 = vadd.f32 %v1872_v58, %v1871_v56  ;;  %v1936_v60 = vpop.f32.mrb[17].mxu1  ;;  %v1874_v61 = vpop.f32.mrb[18].mxu0 }
 0x12d   : > { %v1937_v62 = vadd.f32 %v1936_v60, %v1935_v57  ;;  %v1938_v63 = vpop.f32.mrb[18].mxu1  ;;  %v1875_v5 = vpop.f32.mrb[19].mxu0 }
 0x12e   : > { %v1876_v0 = vadd.f32 %v1875_v5, %v1874_v61  ;;  %v1939_v1 = vpop.f32.mrb[19].mxu1 }
 0x12f   : > { %v2540_v2 = vadd.f32 %v1937_v62, %v1873_v59  ;;  %v1940_v3 = vadd.f32 %v1939_v1, %v1938_v63 }
 0x131   : > { %v2542_v4 = vadd.f32 %v1940_v3, %v1876_v0 }
 0x132   : > { %v1877_v6 = vpop.f32.mrb[20].mxu0 }
 0x133   : > { %v1941_v7 = vpop.f32.mrb[20].mxu1  ;;  %v1878_v8 = vpop.f32.mrb[21].mxu0 }
 0x134   : > { %v1879_v9 = vadd.f32 %v1878_v8, %v1877_v6  ;;  %v1942_v10 = vpop.f32.mrb[21].mxu1  ;;  %v1880_v12 = vpop.f32.mrb[22].mxu0 }
 0x135   : > { %v1943_v14 = vadd.f32 %v1942_v10, %v1941_v7  ;;  %v1944_v15 = vpop.f32.mrb[22].mxu1  ;;  %v1881_v16 = vpop.f32.mrb[23].mxu0 }
 0x136   : > { %v1882_v17 = vadd.f32 %v1881_v16, %v1880_v12  ;;  %v1945_v18 = vpop.f32.mrb[23].mxu1 }
 0x137   : > { %v2544_v19 = vadd.f32 %v1943_v14, %v1879_v9  ;;  %v1946_v20 = vadd.f32 %v1945_v18, %v1944_v15  ;;  %v2559_v9 = vpop.permute.xlu0 %1477 }
 0x139   : > { %v2546_v21 = vadd.f32 %v1946_v20, %v1882_v17 }
 0x13a   : > { %v1883_v22 = vpop.f32.mrb[24].mxu0 }
 0x13b   : > { %v1947_v23 = vpop.f32.mrb[24].mxu1  ;;  %v1884_v24 = vpop.f32.mrb[25].mxu0 }
 0x13c   : > { %v1885_v26 = vadd.f32 %v1884_v24, %v1883_v22  ;;  %v1948_v28 = vpop.f32.mrb[25].mxu1  ;;  %v1886_v29 = vpop.f32.mrb[26].mxu0 }
 0x13d   : > { %v1949_v30 = vadd.f32 %v1948_v28, %v1947_v23  ;;  %v1950_v31 = vpop.f32.mrb[26].mxu1  ;;  %v1887_v32 = vpop.f32.mrb[27].mxu0 }
 0x13e   : > { %v1888_v33 = vadd.f32 %v1887_v32, %v1886_v29  ;;  %v1951_v34 = vpop.f32.mrb[27].mxu1  ;;  %v2564_v29 = vpop.permute.xlu0 %1482 }
 0x13f   : > { %v2548_v35 = vadd.f32 %v1949_v30, %v1885_v26  ;;  %v1952_v36 = vadd.f32 %v1951_v34, %v1950_v31 }
 0x141   : > { %v2550_v37 = vadd.f32 %v1952_v36, %v1888_v33 }
 0x142   : > { %v1889_v38 = vpop.f32.mrb[28].mxu0 }
 0x143   : > { %v1953_v40 = vpop.f32.mrb[28].mxu1  ;;  %v1890_v42 = vpop.f32.mrb[29].mxu0 }
 0x144   : > { %v1891_v43 = vadd.f32 %v1890_v42, %v1889_v38  ;;  %v1954_v44 = vpop.f32.mrb[29].mxu1  ;;  %v1892_v45 = vpop.f32.mrb[30].mxu0 }
 0x145   : > { %v1955_v46 = vadd.f32 %v1954_v44, %v1953_v40  ;;  %v1956_v47 = vpop.f32.mrb[30].mxu1  ;;  %v1893_v48 = vpop.f32.mrb[31].mxu0 }
 0x146   : > { %v1894_v49 = vadd.f32 %v1893_v48, %v1892_v45  ;;  %v1957_v50 = vpop.f32.mrb[31].mxu1 }
 0x147   : > { %v2552_v51 = vadd.f32 %v1955_v46, %v1891_v43  ;;  %v1958_v52 = vadd.f32 %v1957_v50, %v1956_v47 }
 0x149   : > { %v2554_v54 = vadd.f32 %v1958_v52, %v1894_v49 }
 0x14a   : > { %v1975_v56 = vpop.f32.mrb[32].mxu0 }
 0x14b   : > { %v1976_v57 = vpop.f32.mrb[33].mxu0  ;;  %v1408_v58 = vpop.f32.mrb[32].mxu1 }
 0x14c   : > { %v1977_v59 = vadd.f32 %v1976_v57, %v1975_v56  ;;  %v1978_v60 = vpop.f32.mrb[34].mxu0  ;;  %v1410_v61 = vpop.f32.mrb[33].mxu1 }
 0x14d   : > { %v1979_v62 = vpop.f32.mrb[35].mxu0  ;;  %v1411_v63 = vpop.f32.mrb[34].mxu1 }
 0x14e   : > { %v1980_v5 = vadd.f32 %v1979_v62, %v1978_v60  ;;  %v1312_v0 = vadd.f32 %v1977_v59, %v2524_v11  ;;  %v1413_v1 = vpop.f32.mrb[35].mxu1 }
 0x150   : > { %v1409_v3 = vadd.f32 %v1408_v58, %v1312_v0  ;;  %v1315_v6 = vadd.f32 %v1980_v5, %v2526_v13 }
 0x152   : > { %v1412_v7 = vadd.f32 %v1411_v63, %v1315_v6  ;;  %v1981_v8 = vpop.f32.mrb[36].mxu0 }
 0x153   : > { %v1982_v10 = vpop.f32.mrb[37].mxu0  ;;  %v1416_v12 = vpop.f32.mrb[36].mxu1 }
 0x154   : > { %v1983_v14 = vadd.f32 %v1982_v10, %v1981_v8  ;;  %v1984_v15 = vpop.f32.mrb[38].mxu0  ;;  %v1418_v16 = vpop.f32.mrb[37].mxu1 }
 0x155   : > { %v1985_v17 = vpop.f32.mrb[39].mxu0  ;;  %v1419_v18 = vpop.f32.mrb[38].mxu1 }
 0x156   : > { %v1986_v20 = vadd.f32 %v1985_v17, %v1984_v15  ;;  %v1320_v11 = vadd.f32 %v1983_v14, %v2528_v25  ;;  %v1421_v22 = vpop.f32.mrb[39].mxu1 }
 0x158   : > { %v1417_v13 = vadd.f32 %v1416_v12, %v1320_v11  ;;  %v1323_v23 = vadd.f32 %v1986_v20, %v2530_v27 }
 0x15a   : > { %v1473_v24 = vmax.f32 %v1409_v3, %v1417_v13  ;;  %v1420_v26 = vadd.f32 %v1419_v18, %v1323_v23  ;;  %v1987_v28 = vpop.f32.mrb[40].mxu0 }
 0x15b   : > { %v1988_v30 = vpop.f32.mrb[41].mxu0  ;;  %v1424_v31 = vpop.f32.mrb[40].mxu1 }
 0x15c   : > { %v1474_v32 = vmax.f32 %v1412_v7, %v1420_v26  ;;  %v1485_v33 = vadd.f32 %v2559_v9, %v1473_v24  ;;  %v1989_v34 = vadd.f32 %v1988_v30, %v1987_v28  ;;  %v1990_v36 = vpop.f32.mrb[42].mxu0  ;;  %v1426_v25 = vpop.f32.mrb[41].mxu1 }
 0x15d   : > { %v1991_v38 = vpop.f32.mrb[43].mxu0  ;;  %v1427_v40 = vpop.f32.mrb[42].mxu1 }
 0x15e   : > { %v1486_v27 = vadd.f32 %v2564_v29, %v1474_v32  ;;  %v1992_v42 = vadd.f32 %v1991_v38, %v1990_v36  ;;  %v1328_v43 = vadd.f32 %v1989_v34, %v2532_v39  ;;  %v1429_v44 = vpop.f32.mrb[43].mxu1  ;;  %v1487_v45 = vmax.f32 %v1485_v33, 0.0 }
 0x160   : > { %v1488_v46 = vmax.f32 %v1486_v27, 0.0  ;;  %v1425_v47 = vadd.f32 %v1424_v31, %v1328_v43  ;;  %v1331_v48 = vadd.f32 %v1992_v42, %v2534_v41 }
 0x162   : > { %v1811_v49 = vpack.c.bf16 %v1488_v46, %v1487_v45  ;;  %v1428_v50 = vadd.f32 %v1427_v40, %v1331_v48  ;;  %v1993_v52 = vpop.f32.mrb[44].mxu0 }
 0x163   : > { %v1994_v56 = vpop.f32.mrb[45].mxu0  ;;  %v1432_v57 = vpop.f32.mrb[44].mxu1 }
 0x164   : > { %1812 = vst [vmem:[%s2573_s26] sm:$0xff] %v1811_v49   ;;  %v1995_v58 = vadd.f32 %v1994_v56, %v1993_v52  ;;  %v1996_v39 = vpop.f32.mrb[46].mxu0  ;;  %v1434_v59 = vpop.f32.mrb[45].mxu1 }
 0x165   : > { %v1997_v60 = vpop.f32.mrb[47].mxu0  ;;  %v1435_v61 = vpop.f32.mrb[46].mxu1 }
 0x166   : > { %v1998_v62 = vadd.f32 %v1997_v60, %v1996_v39  ;;  %v1336_v41 = vadd.f32 %v1995_v58, %v2536_v53  ;;  %v1437_v63 = vpop.f32.mrb[47].mxu1 }
 0x168   : > { %v1433_v5 = vadd.f32 %v1432_v57, %v1336_v41  ;;  %v1339_v0 = vadd.f32 %v1998_v62, %v2538_v55 }
 0x16a   : > { %v1499_v1 = vmax.f32 %v1425_v47, %v1433_v5  ;;  %v1436_v3 = vadd.f32 %v1435_v61, %v1339_v0  ;;  %v1999_v6 = vpop.f32.mrb[48].mxu0 }
 0x16b   : > { %v2000_v7 = vpop.f32.mrb[49].mxu0  ;;  %v1440_v8 = vpop.f32.mrb[48].mxu1 }
 0x16c   : > { %v1501_v10 = vadd.f32 %v1499_v1, %v2559_v9  ;;  %v1500_v12 = vmax.f32 %v1428_v50, %v1436_v3  ;;  %v2001_v14 = vadd.f32 %v2000_v7, %v1999_v6  ;;  %v2002_v15 = vpop.f32.mrb[50].mxu0  ;;  %v1442_v16 = vpop.f32.mrb[49].mxu1 }
 0x16d   : > { %v2003_v17 = vpop.f32.mrb[51].mxu0  ;;  %v1443_v18 = vpop.f32.mrb[50].mxu1 }
 0x16e   : > { %v1502_v53 = vadd.f32 %v1500_v12, %v2564_v29  ;;  %v2004_v20 = vadd.f32 %v2003_v17, %v2002_v15  ;;  %v1344_v11 = vadd.f32 %v2001_v14, %v2540_v2  ;;  %v1445_v55 = vpop.f32.mrb[51].mxu1  ;;  %v1503_v22 = vmax.f32 %v1501_v10, 0.0 }
 0x170   : > { %v1504_v13 = vmax.f32 %v1502_v53, 0.0  ;;  %v1441_v23 = vadd.f32 %v1440_v8, %v1344_v11  ;;  %v1347_v24 = vadd.f32 %v2004_v20, %v2542_v4 }
 0x172   : > { %v1816_v26 = vpack.c.bf16 %v1504_v13, %v1503_v22  ;;  %v1444_v28 = vadd.f32 %v1443_v18, %v1347_v24  ;;  %v2005_v30 = vpop.f32.mrb[52].mxu0 }
 0x173   : > { %v2006_v31 = vpop.f32.mrb[53].mxu0  ;;  %v1448_v32 = vpop.f32.mrb[52].mxu1 }
 0x174   : > { %1828 = vst [vmem:[%s2573_s26 + $0x8] sm:$0xff] %v1816_v26   ;;  %v2007_v33 = vadd.f32 %v2006_v31, %v2005_v30  ;;  %v2008_v34 = vpop.f32.mrb[54].mxu0  ;;  %v1450_v36 = vpop.f32.mrb[53].mxu1 }
 0x175   : > { %v2009_v25 = vpop.f32.mrb[55].mxu0  ;;  %v1451_v38 = vpop.f32.mrb[54].mxu1 }
 0x176   : > { %v2010_v40 = vadd.f32 %v2009_v25, %v2008_v34  ;;  %v1352_v2 = vadd.f32 %v2007_v33, %v2544_v19  ;;  %v1453_v27 = vpop.f32.mrb[55].mxu1 }
 0x178   : > { %v1449_v42 = vadd.f32 %v1448_v32, %v1352_v2  ;;  %v1355_v43 = vadd.f32 %v2010_v40, %v2546_v21 }
 0x17a   : > { %v1516_v44 = vmax.f32 %v1441_v23, %v1449_v42  ;;  %v1452_v4 = vadd.f32 %v1451_v38, %v1355_v43  ;;  %v2011_v45 = vpop.f32.mrb[56].mxu0 }
 0x17b   : > { %v2012_v46 = vpop.f32.mrb[57].mxu0  ;;  %v1456_v47 = vpop.f32.mrb[56].mxu1 }
 0x17c   : > { %v1518_v48 = vadd.f32 %v1516_v44, %v2559_v9  ;;  %v1517_v49 = vmax.f32 %v1444_v28, %v1452_v4  ;;  %v2013_v50 = vadd.f32 %v2012_v46, %v2011_v45  ;;  %v2014_v52 = vpop.f32.mrb[58].mxu0  ;;  %v1458_v56 = vpop.f32.mrb[57].mxu1 }
 0x17d   : > { %v2015_v57 = vpop.f32.mrb[59].mxu0  ;;  %v1459_v58 = vpop.f32.mrb[58].mxu1 }
 0x17e   : > { %v1519_v19 = vadd.f32 %v1517_v49, %v2564_v29  ;;  %v2016_v39 = vadd.f32 %v2015_v57, %v2014_v52  ;;  %v1360_v59 = vadd.f32 %v2013_v50, %v2548_v35  ;;  %v1461_v21 = vpop.f32.mrb[59].mxu1  ;;  %v1520_v60 = vmax.f32 %v1518_v48, 0.0 }
 0x180   : > { %v1521_v61 = vmax.f32 %v1519_v19, 0.0  ;;  %v1457_v62 = vadd.f32 %v1456_v47, %v1360_v59  ;;  %v1363_v41 = vadd.f32 %v2016_v39, %v2550_v37 }
 0x182   : > { %v1821_v63 = vpack.c.bf16 %v1521_v61, %v1520_v60  ;;  %v1460_v5 = vadd.f32 %v1459_v58, %v1363_v41  ;;  %v2017_v0 = vpop.f32.mrb[60].mxu0 }
 0x183   : > { %v2018_v1 = vpop.f32.mrb[61].mxu0  ;;  %v1464_v3 = vpop.f32.mrb[60].mxu1 }
 0x184   : > { %1829 = vst [vmem:[%s2573_s26 + $0x10] sm:$0xff] %v1821_v63   ;;  %v2019_v6 = vadd.f32 %v2018_v1, %v2017_v0  ;;  %v2020_v7 = vpop.f32.mrb[62].mxu0  ;;  %v1466_v8 = vpop.f32.mrb[61].mxu1 }
 0x185   : > { %v2021_v10 = vpop.f32.mrb[63].mxu0  ;;  %v1467_v12 = vpop.f32.mrb[62].mxu1 }
 0x186   : > { %v2022_v14 = vadd.f32 %v2021_v10, %v2020_v7  ;;  %v1368_v35 = vadd.f32 %v2019_v6, %v2552_v51  ;;  %v1469_v15 = vpop.f32.mrb[63].mxu1 }
 0x188   : > { %v1465_v16 = vadd.f32 %v1464_v3, %v1368_v35  ;;  %v1371_v17 = vadd.f32 %v2022_v14, %v2554_v54 }
 0x18a   : > { %v1533_v37 = vmax.f32 %v1457_v62, %v1465_v16  ;;  %v1468_v18 = vadd.f32 %v1467_v12, %v1371_v17 }
 0x18c   : > { %v1535_v53 = vadd.f32 %v1533_v37, %v2559_v9  ;;  %v1534_v20 = vmax.f32 %v1460_v5, %v1468_v18 }
 0x18e   : > { %v1536_v11 = vadd.f32 %v1534_v20, %v2564_v29  ;;  %v1537_v55 = vmax.f32 %v1535_v53, 0.0 }
 0x190   : > { %v1538_v22 = vmax.f32 %v1536_v11, 0.0 }
 0x192   : > { %v1826_v13 = vpack.c.bf16 %v1538_v22, %v1537_v55 }
 0x194   : > { %1830 = vst [vmem:[%s2573_s26 + $0x18] sm:$0xff] %v1826_v13  }
 0x195 PF: > { %s13_s16 = sadd.s32 1, %s2165_s16   ;;  %s2614_s12 = smov %s2157_s14 }
 0x196   : > { %p10_p7 = scmp.ge.s32.totalorder %s13_s16, 32   ;;  %s2615_s13 = smov %s2161_s15 }
 0x197   : > { %s2616_s14 = smov %s2619_s17  ;;  %s2617_s15 = smov %s2623_s18 }
 0x198   :  { %12 = sbr.rel (!%p10_p7) target bundleno = 3 (0x3), region = 66 }

// kernel: simple_cnn_forward.9
= control target key start
LH: loop header
LB: loop body
LE: loop exit
PB: predicated region body
PF: predicated region fallthrough
CT: control target
= control target key end

     0   :  { %v172_v0 = vmov 0.0|0.0   ;;  %vm173_vm0 = vmmov 0   ;;  %v174_v4 = vmov 0.0   ;;  %vm45_vm1 = vcmask 523264   ;;  %s239_s2 = inlined_call_operand.vmem [shape: f32[64,10], index: 2, kind: input, shape index: {}]   ;;  %s240_s0 = inlined_call_operand.vmem [shape: f32[2,8,64], index: 0, kind: input, shape index: {}]   ;;  %s241_s1 = inlined_call_operand.vmem [shape: f32[1,64], index: 1, kind: input, shape index: {}]   ;;  %s242_s3 = inlined_call_operand.vmem [shape: f32[1,10], index: 3, kind: input, shape index: {}]   ;;  %s243_s4 = inlined_call_operand.vmem [shape: f32[8,10], index: 4, kind: output, shape index: {}]  }
   0x1   :  { %157 = vmatprep.subr.bf16.mxu0 %v172_v0  ;;  %v30_v1 = vld [vmem:[%s239_s2] sm:$0xff]  ;;  %v31_v2 = vld [vmem:[%s239_s2 + $0x8] sm:$0xff]  ;;  %v32_v3 = vld [vmem:[%s239_s2 + $0x10] sm:$0xff]  ;;  %154 = vmatprep.mubr.msk.f32.mxu0 %vm173_vm0, %v174_v4  ;;  %vm119_vm2 = vcmask 80896  }
   0x2   :  { %v158_v5 = vpack.c.bf16 %v31_v2, %v30_v1  ;;  %v33_v6 = vld [vmem:[%s239_s2 + $0x18] sm:$0xff]  ;;  %v17_v8 = vld [vmem:[%s240_s0] sm:$0xff]  ;;  %v125_v9 = vld [vmem:[%s240_s0 + $0x8] sm:$0xff] }
   0x3   :  { %v161_v7 = vpack.c.bf16 %v33_v6, %v32_v3  ;;  %v34_v10 = vld [vmem:[%s239_s2 + $0x20] sm:$0xff]  ;;  %v35_v11 = vld [vmem:[%s239_s2 + $0x28] sm:$0xff]  ;;  %v20_v12 = vadd.f32 %v125_v9, %v17_v8  ;;  %v36_v15 = vld [vmem:[%s239_s2 + $0x30] sm:$0xff] }
   0x4   :  { %159 = vmatpush3.bf16.msra.mxu0 %v158_v5  ;;  %v164_v13 = vpack.c.bf16 %v35_v11, %v34_v10  ;;  %v126_v14 = vld [vmem:[%s241_s1] ss:$0 sm:$0xff]  ;;  %v37_v16 = vld [vmem:[%s239_s2 + $0x38] sm:$0xff] }
   0x5   :  { %160 = vmatprep.subr.bf16.mxu0 %v172_v0  ;;  %v28_v17 = vadd.f32 %v126_v14, %v20_v12  ;;  %v167_v18 = vpack.c.bf16 %v37_v16, %v36_v15  ;;  %v127_v20 = vld [vmem:[%s242_s3] ss:$0 sm:$0xff] }
   0x7   :  { %v29_v19 = vmax.f32 %v28_v17, 0.0 }
   0x8   :  { %162 = vmatpush3.bf16.msra.mxu0 %v161_v7 }
   0x9   :  { %163 = vmatprep.subr.bf16.mxu0 %v172_v0 }
   0xc   :  { %165 = vmatpush3.bf16.msra.mxu0 %v164_v13 }
   0xd   :  { %166 = vmatprep.subr.bf16.mxu0 %v172_v0 }
  0x10   :  { %168 = vmatpush3.bf16.msra.mxu0 %v167_v18 }
  0x13   :  { %155 = vmatmul.mubr.msk.f32.vlgmr.msra.gmra.mrb[0].mxu0 %vm45_vm1, %v29_v19 }
  0xe6   :  { %v115_v21 = vpop.f32.mrb[0].mxu0 }
  0xe7   :  { %v116_v22 = vadd.f32 %v127_v20, %v115_v21  ;;  %v156_v23 = vpop.f32.mrb[1].mxu0 }
  0xe9   :  { %120 = vst.msk [vmem:[%s243_s4] sm:$0xff] %vm119_vm2, %v116_v22 }

// kernel: simple_cnn_forward.8
= control target key start
LH: loop header
LB: loop body
LE: loop exit
PB: predicated region body
PF: predicated region fallthrough
CT: control target
= control target key end

     0   :  { %s9226_s9 = smov 0   ;;  %s9228_s10 = smov 0   ;;  %s9972_s0 = inlined_call_operand.vmem [shape: bf16[8,57600], index: 0, kind: input, shape index: {}]   ;;  %s9973_s1 = inlined_call_operand.vmem [shape: bf16[57600,64], index: 1, kind: input, shape index: {}]   ;;  %s9974_s2 = inlined_call_operand.vmem [shape: f32[2,8,64], index: 2, kind: output, shape index: {}]  }
   0x1   :  { %s9230_s11 = smov 0   ;;  %s9232_s12 = smov 0  }
   0x2   :  { %s9234_s13 = smov 0  }
   0x3 LB: > { %s21_s14 = sadd.s32 1, %s9198_s11  ;;  %s24_s15 = sadd.s32 1, %s9202_s12  ;;  %s9206_s13 = sphi %s9234_s13, %s12_s13   ;;  %s9202_s12 = sphi %s9232_s12, %s9978_s12   ;;  %s9198_s11 = sphi %s9230_s11, %s9977_s11   ;;  %s9194_s10 = sphi %s9228_s10, %s9976_s10   ;;  %s9190_s9 = sphi %s9226_s9, %s9975_s9  }
   0x4   : > { %p22_p0 = scmp.ge.s32.totalorder %s21_s14, 3  ;;  %p6924_p1 = scmp.ge.s32.totalorder %s9206_s13, 1 }
   0x5   : > { %p152_p2 = scmp.lt.s32.totalorder %s9206_s13, 7 }
   0x6   : > { %s9980_s14 = smov (%p22_p0, %s21_s14), 0  ;;  %s9982_s15 = smov (!%p22_p0, %s24_s15), %s9202_s12 }
   0x7   : > { %p153_p3 = pnand %p6924_p1, %p152_p2  ;;  %p26_p4 = scmp.ge.s32.totalorder %s9982_s15, 2 }
   0x8   : > { %s182_s16 = smul.u32 (!%p153_p3), 3, %s9194_s10  ;;  %p202_p7 = scmp.lt.s32.totalorder (!%p153_p3), %s9194_s10, 1 }
   0x9   : > { %s9984_s15 = smov (%p26_p4, %s9982_s15), 0  ;;  %156 = sbr.rel (%p153_p3) target bundleno = 866 (0x362), region = 28 }
   0xa   : > { %s183_s17 = sadd.s32 (!%p153_p3), %s9190_s9, %s182_s16  ;;  %p6928_p8 = scmp.ne.s32.totalorder (!%p153_p3), %s9190_s9, 0 }
   0xb   : > { %s184_s18 = smul.u32 (!%p153_p3), 75, %s183_s17 }
   0xc   : > { %s194_s19 = smul.u32 (!%p153_p3), 1200, %s183_s17 }
   0xd   : > { %p185_p5 = scmp.lt.s32.totalorder (!%p153_p3), %s184_s18, 449 }
   0xe   : > { %p195_p6 = scmp.lt.s32.totalorder (!%p153_p3), %s194_s19, 7199 }
  0x10   : > { %s9986_s18 = smov (!%p185_p5, %s184_s18), 449  ;;  %s9988_s19 = smov (!%p195_p6, %s194_s19), 7199 }
  0x11   : > { %s6925_s20 = sshll.u32 %s9986_s18, 2  ;;  %s6926_s24 = sshll.u32 %s9988_s19, 2  ;;  %vm211_vm0 = vcmask (!%p6928_p8), 523264   ;;  %v9208_v0 = vmov (!%p6928_p8), 0.0  }
  0x12   : > { %s9262_s23 = scalar_lea.vmem %s9972_s0, %s6925_s20  ;;  %s9267_s27 = scalar_lea.vmem %s9973_s1, %s6926_s24  ;;  %212 = vst.msk [vmem:[#allocation2] sm:$0xff] (!%p6928_p8), %vm211_vm0, %v9208_v0 }
  0x13   : > { %s9990_s10 = smov (!%p202_p7, %s9194_s10), 1  ;;  %210 = sbr.rel (%p6928_p8) target bundleno = 26 (0x1a), region = 32 }
  0x14   : > { %s6927_s28 = sshll.u32 %s9990_s10, 3 }
  0x15   : > { %s9272_s3 = scalar_lea.vmem %s9974_s2, %s6927_s28 }
  0x1a PF: > { %v8493_v1 = vld [vmem:[%s9267_s27 + $0x40] sm:$0xff]   ;;  %v8497_v5 = vld [vmem:[%s9267_s27 + $0x48] sm:$0xff]   ;;  %v8501_v9 = vld [vmem:[%s9267_s27 + $0x50] sm:$0xff]   ;;  %vm9210_vm1 = vmmov 0   ;;  %vm6836_vm2 = vcmask 523264   ;;  %p7604_p9 = scmp.ne.s32.totalorder %s9190_s9, 2 }
  0x1b   : > { %v8494_v2 = vld [vmem:[%s9267_s27 + $0xc0] sm:$0xff]   ;;  %7607 = vmatprep.subr.bf16.mxu0 %v8493_v1  ;;  %v8498_v6 = vld [vmem:[%s9267_s27 + $0xc8] sm:$0xff]   ;;  %v8502_v10 = vld [vmem:[%s9267_s27 + $0xd0] sm:$0xff]  }
  0x1c   : > { %v8495_v3 = vld [vmem:[%s9267_s27] sm:$0xff]   ;;  %7629 = vmatprep.subr.bf16.mxu1 %v8494_v2  ;;  %v8499_v7 = vld [vmem:[%s9267_s27 + $0x8] sm:$0xff]   ;;  %v8503_v11 = vld [vmem:[%s9267_s27 + $0x10] sm:$0xff]  }
  0x1d   : > { %v8496_v4 = vld [vmem:[%s9267_s27 + $0x80] sm:$0xff]   ;;  %7608 = vmatpush3.bf16.msra.mxu0 %v8495_v3  ;;  %v8500_v8 = vld [vmem:[%s9267_s27 + $0x88] sm:$0xff]   ;;  %v8504_v12 = vld [vmem:[%s9267_s27 + $0x90] sm:$0xff]  }
  0x1e   : > { %7630 = vmatpush3.bf16.msra.mxu1 %v8496_v4  ;;  %7609 = vmatprep.subr.bf16.mxu0 %v8497_v5  ;;  %v8505_v13 = vld [vmem:[%s9267_s27 + $0x58] sm:$0xff]   ;;  %v8509_v17 = vld [vmem:[%s9267_s27 + $0x60] sm:$0xff]   ;;  %v8513_v21 = vld [vmem:[%s9267_s27 + $0x68] sm:$0xff]  }
  0x1f   : > { %7631 = vmatprep.subr.bf16.mxu1 %v8498_v6  ;;  %v8506_v14 = vld [vmem:[%s9267_s27 + $0xd8] sm:$0xff]   ;;  %v8510_v18 = vld [vmem:[%s9267_s27 + $0xe0] sm:$0xff]   ;;  %v8514_v22 = vld [vmem:[%s9267_s27 + $0xe8] sm:$0xff]  }
  0x20   : > { %v8507_v15 = vld [vmem:[%s9267_s27 + $0x18] sm:$0xff]   ;;  %v8511_v19 = vld [vmem:[%s9267_s27 + $0x20] sm:$0xff]   ;;  %v8515_v23 = vld [vmem:[%s9267_s27 + $0x28] sm:$0xff]  }
  0x21   : > { %7610 = vmatpush3.bf16.msra.mxu0 %v8499_v7  ;;  %v8508_v16 = vld [vmem:[%s9267_s27 + $0x98] sm:$0xff]   ;;  %v8512_v20 = vld [vmem:[%s9267_s27 + $0xa0] sm:$0xff]   ;;  %v8516_v24 = vld [vmem:[%s9267_s27 + $0xa8] sm:$0xff]  }
  0x22   : > { %7632 = vmatpush3.bf16.msra.mxu1 %v8500_v8  ;;  %7611 = vmatprep.subr.bf16.mxu0 %v8501_v9  ;;  %v8517_v25 = vld [vmem:[%s9267_s27 + $0x70] sm:$0xff]   ;;  %v8521_v29 = vld [vmem:[%s9267_s27 + $0x78] sm:$0xff]   ;;  %v214_v33 = vld [vmem:[%s9262_s23] sm:$0xff] }
  0x23   : > { %7633 = vmatprep.subr.bf16.mxu1 %v8502_v10  ;;  %v8518_v26 = vld [vmem:[%s9267_s27 + $0xf0] sm:$0xff]   ;;  %v8522_v30 = vld [vmem:[%s9267_s27 + $0xf8] sm:$0xff]   ;;  %v215_v34 = vld [vmem:[%s9262_s23 + $0x8] sm:$0xff]  ;;  %v6929_v35 = vcombine.low %v214_v33, %v214_v33  ;;  %v6930_v36 = vcombine.high %v214_v33, %v214_v33 }
  0x24   : > { %v8519_v27 = vld [vmem:[%s9267_s27 + $0x30] sm:$0xff]   ;;  %v8523_v31 = vld [vmem:[%s9267_s27 + $0x38] sm:$0xff]   ;;  %v6931_v37 = vcombine.low %v215_v34, %v215_v34  ;;  %v6932_v38 = vcombine.high %v215_v34, %v215_v34  ;;  %v8529_v39 = vld [vmem:[%s9267_s27 + $0x140] sm:$0xff]  }
  0x25   : > { %7612 = vmatpush3.bf16.msra.mxu0 %v8503_v11  ;;  %v8520_v28 = vld [vmem:[%s9267_s27 + $0xb0] sm:$0xff]   ;;  %v8524_v32 = vld [vmem:[%s9267_s27 + $0xb8] sm:$0xff]   ;;  %v8530_v40 = vld [vmem:[%s9267_s27 + $0x100] sm:$0xff]   ;;  %5347 = vmatprep.mubr.bf16.mxu0 %v6930_v36 }
  0x26   : > { %7634 = vmatpush3.bf16.msra.mxu1 %v8504_v12  ;;  %7613 = vmatprep.subr.bf16.mxu0 %v8505_v13  ;;  %v8531_v41 = vld [vmem:[%s9267_s27 + $0x1c0] sm:$0xff]   ;;  %v8533_v43 = vld [vmem:[%s9267_s27 + $0x148] sm:$0xff]   ;;  %v8537_v47 = vld [vmem:[%s9267_s27 + $0x150] sm:$0xff]  }
  0x27   : > { %7635 = vmatprep.subr.bf16.mxu1 %v8506_v14  ;;  %5387 = vmatprep.mubr.bf16.mxu1 %v6932_v38  ;;  %v8532_v42 = vld [vmem:[%s9267_s27 + $0x180] sm:$0xff]   ;;  %v8534_v44 = vld [vmem:[%s9267_s27 + $0x108] sm:$0xff]   ;;  %v8538_v48 = vld [vmem:[%s9267_s27 + $0x110] sm:$0xff]  }
  0x28   : > { %v8535_v45 = vld [vmem:[%s9267_s27 + $0x1c8] sm:$0xff]   ;;  %v8539_v49 = vld [vmem:[%s9267_s27 + $0x1d0] sm:$0xff]   ;;  %v8541_v51 = vld [vmem:[%s9267_s27 + $0x158] sm:$0xff]  }
  0x29   : > { %7614 = vmatpush3.bf16.msra.mxu0 %v8507_v15  ;;  %v8536_v46 = vld [vmem:[%s9267_s27 + $0x188] sm:$0xff]   ;;  %v8540_v50 = vld [vmem:[%s9267_s27 + $0x190] sm:$0xff]   ;;  %v8542_v52 = vld [vmem:[%s9267_s27 + $0x118] sm:$0xff]  }
  0x2a   : > { %7636 = vmatpush3.bf16.msra.mxu1 %v8508_v16  ;;  %7615 = vmatprep.subr.bf16.mxu0 %v8509_v17  ;;  %v8543_v53 = vld [vmem:[%s9267_s27 + $0x1d8] sm:$0xff]   ;;  %v8545_v55 = vld [vmem:[%s9267_s27 + $0x160] sm:$0xff]   ;;  %v8549_v59 = vld [vmem:[%s9267_s27 + $0x168] sm:$0xff]  }
  0x2b   : > { %7637 = vmatprep.subr.bf16.mxu1 %v8510_v18  ;;  %v8544_v54 = vld [vmem:[%s9267_s27 + $0x198] sm:$0xff]   ;;  %v8546_v56 = vld [vmem:[%s9267_s27 + $0x120] sm:$0xff]   ;;  %v8550_v60 = vld [vmem:[%s9267_s27 + $0x128] sm:$0xff]  }
  0x2c   : > { %v8547_v57 = vld [vmem:[%s9267_s27 + $0x1e0] sm:$0xff]   ;;  %v8551_v61 = vld [vmem:[%s9267_s27 + $0x1e8] sm:$0xff]   ;;  %v8553_v63 = vld [vmem:[%s9267_s27 + $0x170] sm:$0xff]  }
  0x2d   : > { %7616 = vmatpush3.bf16.msra.mxu0 %v8511_v19  ;;  %v8548_v58 = vld [vmem:[%s9267_s27 + $0x1a0] sm:$0xff]   ;;  %v8552_v62 = vld [vmem:[%s9267_s27 + $0x1a8] sm:$0xff]   ;;  %v8554_v0 = vld [vmem:[%s9267_s27 + $0x130] sm:$0xff]  }
  0x2e   : > { %7638 = vmatpush3.bf16.msra.mxu1 %v8512_v20  ;;  %7617 = vmatprep.subr.bf16.mxu0 %v8513_v21  ;;  %v8555_v1 = vld [vmem:[%s9267_s27 + $0x1f0] sm:$0xff]   ;;  %v8557_v3 = vld [vmem:[%s9267_s27 + $0x178] sm:$0xff]   ;;  %v8563_v10 = vld [vmem:[%s9267_s27 + $0x240] sm:$0xff]  }
  0x2f   : > { %7639 = vmatprep.subr.bf16.mxu1 %v8514_v22  ;;  %v8556_v2 = vld [vmem:[%s9267_s27 + $0x1b0] sm:$0xff]   ;;  %v8558_v4 = vld [vmem:[%s9267_s27 + $0x138] sm:$0xff]   ;;  %v8566_v14 = vld [vmem:[%s9267_s27 + $0x200] sm:$0xff]  }
  0x30   : > { %v8559_v5 = vld [vmem:[%s9267_s27 + $0x1f8] sm:$0xff]   ;;  %v216_v6 = vld [vmem:[%s9262_s23 + $0x10] sm:$0xff]  ;;  %v8567_v15 = vld [vmem:[%s9267_s27 + $0x2c0] sm:$0xff]  }
  0x31   : > { %7618 = vmatpush3.bf16.msra.mxu0 %v8515_v23  ;;  %v6934_v7 = vcombine.high %v216_v6, %v216_v6  ;;  %v8562_v8 = vld [vmem:[%s9267_s27 + $0x1b8] sm:$0xff]   ;;  %v6933_v9 = vcombine.low %v216_v6, %v216_v6  ;;  %v8568_v16 = vld [vmem:[%s9267_s27 + $0x280] sm:$0xff]   ;;  %v8569_v17 = vld [vmem:[%s9267_s27 + $0x248] sm:$0xff]  }
  0x32   : > { %7640 = vmatpush3.bf16.msra.mxu1 %v8516_v24  ;;  %7619 = vmatprep.subr.bf16.mxu0 %v8517_v25  ;;  %v217_v11 = vld [vmem:[%s9262_s23 + $0x18] sm:$0xff]  ;;  %v8570_v18 = vld [vmem:[%s9267_s27 + $0x208] sm:$0xff]   ;;  %v8573_v21 = vld [vmem:[%s9267_s27 + $0x250] sm:$0xff]  }
  0x33   : > { %7641 = vmatprep.subr.bf16.mxu1 %v8518_v26  ;;  %v6935_v12 = vcombine.low %v217_v11, %v217_v11  ;;  %v6936_v13 = vcombine.high %v217_v11, %v217_v11  ;;  %v8571_v19 = vld [vmem:[%s9267_s27 + $0x2c8] sm:$0xff]   ;;  %v8574_v22 = vld [vmem:[%s9267_s27 + $0x210] sm:$0xff]   ;;  %v8577_v25 = vld [vmem:[%s9267_s27 + $0x258] sm:$0xff]  }
  0x34   : > { %v8572_v20 = vld [vmem:[%s9267_s27 + $0x288] sm:$0xff]   ;;  %v8575_v23 = vld [vmem:[%s9267_s27 + $0x2d0] sm:$0xff]   ;;  %v8578_v26 = vld [vmem:[%s9267_s27 + $0x218] sm:$0xff]  }
  0x35   : > { %7620 = vmatpush3.bf16.msra.mxu0 %v8519_v27  ;;  %v8576_v24 = vld [vmem:[%s9267_s27 + $0x290] sm:$0xff]   ;;  %v8579_v27 = vld [vmem:[%s9267_s27 + $0x2d8] sm:$0xff]   ;;  %v8585_v33 = vld [vmem:[%s9267_s27 + $0x268] sm:$0xff]  }
  0x36   : > { %7642 = vmatpush3.bf16.msra.mxu1 %v8520_v28  ;;  %7621 = vmatprep.subr.bf16.mxu0 %v8521_v29  ;;  %v8580_v28 = vld [vmem:[%s9267_s27 + $0x298] sm:$0xff]   ;;  %v8581_v29 = vld [vmem:[%s9267_s27 + $0x260] sm:$0xff]   ;;  %v8586_v34 = vld [vmem:[%s9267_s27 + $0x228] sm:$0xff]  }
  0x37   : > { %7643 = vmatprep.subr.bf16.mxu1 %v8522_v30  ;;  %v8582_v30 = vld [vmem:[%s9267_s27 + $0x220] sm:$0xff]   ;;  %v8588_v36 = vld [vmem:[%s9267_s27 + $0x2a8] sm:$0xff]   ;;  %v8590_v38 = vld [vmem:[%s9267_s27 + $0x230] sm:$0xff]  }
  0x38   : > { %v8620_v6 = vld [vmem:[%s9267_s27 + $0x3a0] sm:$0xff]   ;;  %v8625_v11 = vld [vmem:[%s9267_s27 + $0x370] sm:$0xff]  }
  0x39   : > { %7622 = vmatpush3.bf16.msra.mxu0 %v8523_v31  ;;  %v8583_v31 = vld [vmem:[%s9267_s27 + $0x2e0] sm:$0xff]  }
  0x3a   : > { %7644 = vmatpush3.bf16.msra.mxu1 %v8524_v32  ;;  %7651 = vmatprep.subr.bf16.mxu0 %v8529_v39  ;;  %v8584_v32 = vld [vmem:[%s9267_s27 + $0x2a0] sm:$0xff]   ;;  %v8591_v39 = vld [vmem:[%s9267_s27 + $0x2f0] sm:$0xff]  }
  0x3b   : > { %7673 = vmatprep.subr.bf16.mxu1 %v8531_v41  ;;  %v8593_v41 = vld [vmem:[%s9267_s27 + $0x278] sm:$0xff]  }
  0x3c   : > { %5348 = vmatmul.mubr.bf16.vlgmr.msra.gmra.mrb[0].mxu0 %v6929_v35  ;;  %v8587_v35 = vld [vmem:[%s9267_s27 + $0x2e8] sm:$0xff]  }
  0x3d   : > { %5388 = vmatmul.mubr.bf16.vlgmr.msra.gmra.mrb[0].mxu1 %v6931_v37  ;;  %7652 = vmatpush3.bf16.msra.mxu0 %v8530_v40  ;;  %v8589_v37 = vld [vmem:[%s9267_s27 + $0x270] sm:$0xff]  }
  0x3e   : > { %7674 = vmatpush3.bf16.msra.mxu1 %v8532_v42  ;;  %7653 = vmatprep.subr.bf16.mxu0 %v8533_v43  ;;  %v8592_v40 = vld [vmem:[%s9267_s27 + $0x2b0] sm:$0xff]   ;;  %v8594_v42 = vld [vmem:[%s9267_s27 + $0x238] sm:$0xff]  }
  0x3f   : > { %7675 = vmatprep.subr.bf16.mxu1 %v8535_v45  ;;  %5427 = vmatprep.mubr.bf16.mxu0 %v6934_v7  ;;  %v8595_v43 = vld [vmem:[%s9267_s27 + $0x2f8] sm:$0xff]   ;;  %v8621_v7 = vld [vmem:[%s9267_s27 + $0x368] sm:$0xff]  }
  0x40   : > { %5467 = vmatprep.mubr.bf16.mxu1 %v6936_v13  ;;  %v8627_v13 = vld [vmem:[%s9267_s27 + $0x3f0] sm:$0xff]  }
  0x41   : > { %7654 = vmatpush3.bf16.msra.mxu0 %v8534_v44  ;;  %v218_v44 = vld [vmem:[%s9262_s23 + $0x20] sm:$0xff] }
  0x42   : > { %7676 = vmatpush3.bf16.msra.mxu1 %v8536_v46  ;;  %7655 = vmatprep.subr.bf16.mxu0 %v8537_v47  ;;  %v6937_v45 = vcombine.low %v218_v44, %v218_v44  ;;  %v6938_v46 = vcombine.high %v218_v44, %v218_v44  ;;  %v8598_v47 = vld [vmem:[%s9267_s27 + $0x2b8] sm:$0xff]   ;;  %v8656_v44 = vld [vmem:[%s9267_s27 + $0x4a0] sm:$0xff]  }
  0x43   : > { %7677 = vmatprep.subr.bf16.mxu1 %v8539_v49  ;;  %v219_v49 = vld [vmem:[%s9262_s23 + $0x28] sm:$0xff] }
  0x45   : > { %7656 = vmatpush3.bf16.msra.mxu0 %v8538_v48  ;;  %v8599_v48 = vld [vmem:[%s9267_s27 + $0x340] sm:$0xff]  }
  0x46   : > { %7678 = vmatpush3.bf16.msra.mxu1 %v8540_v50  ;;  %7657 = vmatprep.subr.bf16.mxu0 %v8541_v51  ;;  %v6939_v50 = vcombine.low %v219_v49, %v219_v49  ;;  %v6940_v51 = vcombine.high %v219_v49, %v219_v49  ;;  %v8661_v49 = vld [vmem:[%s9267_s27 + $0x470] sm:$0xff]  }
  0x47   : > { %7679 = vmatprep.subr.bf16.mxu1 %v8543_v53  ;;  %v8603_v53 = vld [vmem:[%s9267_s27 + $0x3c0] sm:$0xff]  }
  0x49   : > { %7658 = vmatpush3.bf16.msra.mxu0 %v8542_v52  ;;  %v8602_v52 = vld [vmem:[%s9267_s27 + $0x300] sm:$0xff]  }
  0x4a   : > { %7680 = vmatpush3.bf16.msra.mxu1 %v8544_v54  ;;  %7659 = vmatprep.subr.bf16.mxu0 %v8545_v55  ;;  %v8604_v54 = vld [vmem:[%s9267_s27 + $0x380] sm:$0xff]   ;;  %v8605_v55 = vld [vmem:[%s9267_s27 + $0x348] sm:$0xff]  }
  0x4b   : > { %7681 = vmatprep.subr.bf16.mxu1 %v8547_v57  ;;  %v8607_v57 = vld [vmem:[%s9267_s27 + $0x3c8] sm:$0xff]  }
  0x4d   : > { %7660 = vmatpush3.bf16.msra.mxu0 %v8546_v56  ;;  %v8606_v56 = vld [vmem:[%s9267_s27 + $0x308] sm:$0xff]  }
  0x4e   : > { %7682 = vmatpush3.bf16.msra.mxu1 %v8548_v58  ;;  %7661 = vmatprep.subr.bf16.mxu0 %v8549_v59  ;;  %v8608_v58 = vld [vmem:[%s9267_s27 + $0x388] sm:$0xff]   ;;  %v8609_v59 = vld [vmem:[%s9267_s27 + $0x350] sm:$0xff]  }
  0x4f   : > { %7683 = vmatprep.subr.bf16.mxu1 %v8551_v61  ;;  %v8611_v61 = vld [vmem:[%s9267_s27 + $0x3d0] sm:$0xff]  }
  0x51   : > { %7662 = vmatpush3.bf16.msra.mxu0 %v8550_v60  ;;  %v8610_v60 = vld [vmem:[%s9267_s27 + $0x310] sm:$0xff]  }
  0x52   : > { %7684 = vmatpush3.bf16.msra.mxu1 %v8552_v62  ;;  %7663 = vmatprep.subr.bf16.mxu0 %v8553_v63  ;;  %v8612_v62 = vld [vmem:[%s9267_s27 + $0x390] sm:$0xff]   ;;  %v8613_v63 = vld [vmem:[%s9267_s27 + $0x358] sm:$0xff]  }
  0x53   : > { %7685 = vmatprep.subr.bf16.mxu1 %v8555_v1  ;;  %v8615_v1 = vld [vmem:[%s9267_s27 + $0x3d8] sm:$0xff]  }
  0x55   : > { %7664 = vmatpush3.bf16.msra.mxu0 %v8554_v0  ;;  %v8614_v0 = vld [vmem:[%s9267_s27 + $0x318] sm:$0xff]  }
  0x56   : > { %7686 = vmatpush3.bf16.msra.mxu1 %v8556_v2  ;;  %7665 = vmatprep.subr.bf16.mxu0 %v8557_v3  ;;  %v8616_v2 = vld [vmem:[%s9267_s27 + $0x398] sm:$0xff]   ;;  %v8617_v3 = vld [vmem:[%s9267_s27 + $0x360] sm:$0xff]  }
  0x57   : > { %7687 = vmatprep.subr.bf16.mxu1 %v8559_v5  ;;  %v8619_v5 = vld [vmem:[%s9267_s27 + $0x3e0] sm:$0xff]  }
  0x59   : > { %7666 = vmatpush3.bf16.msra.mxu0 %v8558_v4  ;;  %v8618_v4 = vld [vmem:[%s9267_s27 + $0x320] sm:$0xff]  }
  0x5a   : > { %7688 = vmatpush3.bf16.msra.mxu1 %v8562_v8  ;;  %7695 = vmatprep.subr.bf16.mxu0 %v8563_v10  ;;  %v8622_v8 = vld [vmem:[%s9267_s27 + $0x328] sm:$0xff]  }
  0x5b   : > { %7717 = vmatprep.subr.bf16.mxu1 %v8567_v15  ;;  %v8624_v10 = vld [vmem:[%s9267_s27 + $0x3a8] sm:$0xff]   ;;  %v8629_v15 = vld [vmem:[%s9267_s27 + $0x378] sm:$0xff]  }
  0x5c   : > { %5428 = vmatmul.mubr.bf16.vlgmr.msra.gmra.mrb[4].mxu0 %v6933_v9  ;;  %v8623_v9 = vld [vmem:[%s9267_s27 + $0x3e8] sm:$0xff]  }
  0x5d   : > { %7696 = vmatpush3.bf16.msra.mxu0 %v8566_v14  ;;  %5468 = vmatmul.mubr.bf16.vlgmr.msra.gmra.mrb[4].mxu1 %v6935_v12  ;;  %v8626_v12 = vld [vmem:[%s9267_s27 + $0x330] sm:$0xff]  }
  0x5e   : > { %7718 = vmatpush3.bf16.msra.mxu1 %v8568_v16  ;;  %7697 = vmatprep.subr.bf16.mxu0 %v8569_v17  ;;  %v8628_v14 = vld [vmem:[%s9267_s27 + $0x3b0] sm:$0xff]   ;;  %v8630_v16 = vld [vmem:[%s9267_s27 + $0x338] sm:$0xff]  }
  0x5f   : > { %7719 = vmatprep.subr.bf16.mxu1 %v8571_v19  ;;  %5507 = vmatprep.mubr.bf16.mxu0 %v6938_v46  ;;  %v8631_v17 = vld [vmem:[%s9267_s27 + $0x3f8] sm:$0xff]   ;;  %v8658_v46 = vld [vmem:[%s9267_s27 + $0x428] sm:$0xff]  }
  0x60   : > { %5547 = vmatprep.mubr.bf16.mxu1 %v6940_v51  ;;  %v8663_v51 = vld [vmem:[%s9267_s27 + $0x4f0] sm:$0xff]  }
  0x61   : > { %7698 = vmatpush3.bf16.msra.mxu0 %v8570_v18  ;;  %v220_v18 = vld [vmem:[%s9262_s23 + $0x30] sm:$0xff] }
  0x62   : > { %7720 = vmatpush3.bf16.msra.mxu1 %v8572_v20  ;;  %7699 = vmatprep.subr.bf16.mxu0 %v8573_v21  ;;  %v6941_v19 = vcombine.low %v220_v18, %v220_v18  ;;  %v6942_v20 = vcombine.high %v220_v18, %v220_v18  ;;  %v8634_v21 = vld [vmem:[%s9267_s27 + $0x3b8] sm:$0xff]   ;;  %v8692_v18 = vld [vmem:[%s9267_s27 + $0x5a0] sm:$0xff]  }
  0x63   : > { %7721 = vmatprep.subr.bf16.mxu1 %v8575_v23  ;;  %v221_v23 = vld [vmem:[%s9262_s23 + $0x38] sm:$0xff] }
  0x65   : > { %7700 = vmatpush3.bf16.msra.mxu0 %v8574_v22  ;;  %v8635_v22 = vld [vmem:[%s9267_s27 + $0x440] sm:$0xff]  }
  0x66   : > { %7722 = vmatpush3.bf16.msra.mxu1 %v8576_v24  ;;  %7701 = vmatprep.subr.bf16.mxu0 %v8577_v25  ;;  %v6943_v24 = vcombine.low %v221_v23, %v221_v23  ;;  %v6944_v25 = vcombine.high %v221_v23, %v221_v23  ;;  %v8697_v23 = vld [vmem:[%s9267_s27 + $0x570] sm:$0xff]  }
  0x67   : > { %7723 = vmatprep.subr.bf16.mxu1 %v8579_v27  ;;  %v8639_v27 = vld [vmem:[%s9267_s27 + $0x4c0] sm:$0xff]  }
  0x69   : > { %7702 = vmatpush3.bf16.msra.mxu0 %v8578_v26  ;;  %v8638_v26 = vld [vmem:[%s9267_s27 + $0x400] sm:$0xff]  }
  0x6a   : > { %7724 = vmatpush3.bf16.msra.mxu1 %v8580_v28  ;;  %7703 = vmatprep.subr.bf16.mxu0 %v8581_v29  ;;  %v8640_v28 = vld [vmem:[%s9267_s27 + $0x480] sm:$0xff]   ;;  %v8641_v29 = vld [vmem:[%s9267_s27 + $0x448] sm:$0xff]  }
  0x6b   : > { %7725 = vmatprep.subr.bf16.mxu1 %v8583_v31  ;;  %v8643_v31 = vld [vmem:[%s9267_s27 + $0x4c8] sm:$0xff]  }
  0x6d   : > { %7704 = vmatpush3.bf16.msra.mxu0 %v8582_v30  ;;  %v8642_v30 = vld [vmem:[%s9267_s27 + $0x408] sm:$0xff]  }
  0x6e   : > { %7726 = vmatpush3.bf16.msra.mxu1 %v8584_v32  ;;  %7705 = vmatprep.subr.bf16.mxu0 %v8585_v33  ;;  %v8644_v32 = vld [vmem:[%s9267_s27 + $0x488] sm:$0xff]   ;;  %v8645_v33 = vld [vmem:[%s9267_s27 + $0x450] sm:$0xff]  }
  0x6f   : > { %7727 = vmatprep.subr.bf16.mxu1 %v8587_v35  ;;  %v8647_v35 = vld [vmem:[%s9267_s27 + $0x4d0] sm:$0xff]  }
  0x71   : > { %7706 = vmatpush3.bf16.msra.mxu0 %v8586_v34  ;;  %v8646_v34 = vld [vmem:[%s9267_s27 + $0x410] sm:$0xff]  }
  0x72   : > { %7728 = vmatpush3.bf16.msra.mxu1 %v8588_v36  ;;  %7707 = vmatprep.subr.bf16.mxu0 %v8589_v37  ;;  %v8648_v36 = vld [vmem:[%s9267_s27 + $0x490] sm:$0xff]   ;;  %v8649_v37 = vld [vmem:[%s9267_s27 + $0x458] sm:$0xff]  }
  0x73   : > { %7729 = vmatprep.subr.bf16.mxu1 %v8591_v39  ;;  %v8651_v39 = vld [vmem:[%s9267_s27 + $0x4d8] sm:$0xff]  }
  0x75   : > { %7708 = vmatpush3.bf16.msra.mxu0 %v8590_v38  ;;  %v8650_v38 = vld [vmem:[%s9267_s27 + $0x418] sm:$0xff]  }
  0x76   : > { %7730 = vmatpush3.bf16.msra.mxu1 %v8592_v40  ;;  %7709 = vmatprep.subr.bf16.mxu0 %v8593_v41  ;;  %v8652_v40 = vld [vmem:[%s9267_s27 + $0x498] sm:$0xff]   ;;  %v8653_v41 = vld [vmem:[%s9267_s27 + $0x460] sm:$0xff]  }
  0x77   : > { %7731 = vmatprep.subr.bf16.mxu1 %v8595_v43  ;;  %v8655_v43 = vld [vmem:[%s9267_s27 + $0x4e0] sm:$0xff]  }
  0x79   : > { %7710 = vmatpush3.bf16.msra.mxu0 %v8594_v42  ;;  %v8654_v42 = vld [vmem:[%s9267_s27 + $0x420] sm:$0xff]  }
  0x7a   : > { %7732 = vmatpush3.bf16.msra.mxu1 %v8598_v47  ;;  %7739 = vmatprep.subr.bf16.mxu0 %v8599_v48  ;;  %v8659_v47 = vld [vmem:[%s9267_s27 + $0x4e8] sm:$0xff]  }
  0x7b   : > { %7761 = vmatprep.subr.bf16.mxu1 %v8603_v53  ;;  %v8660_v48 = vld [vmem:[%s9267_s27 + $0x4a8] sm:$0xff]   ;;  %v8665_v53 = vld [vmem:[%s9267_s27 + $0x478] sm:$0xff]  }
  0x7c   : > { %5508 = vmatmul.mubr.bf16.vlgmr.msra.gmra.mrb[8].mxu0 %v6937_v45  ;;  %v8657_v45 = vld [vmem:[%s9267_s27 + $0x468] sm:$0xff]  }
  0x7d   : > { %7740 = vmatpush3.bf16.msra.mxu0 %v8602_v52  ;;  %5548 = vmatmul.mubr.bf16.vlgmr.msra.gmra.mrb[8].mxu1 %v6939_v50  ;;  %v8662_v50 = vld [vmem:[%s9267_s27 + $0x430] sm:$0xff]  }
  0x7e   : > { %7762 = vmatpush3.bf16.msra.mxu1 %v8604_v54  ;;  %7741 = vmatprep.subr.bf16.mxu0 %v8605_v55  ;;  %v8664_v52 = vld [vmem:[%s9267_s27 + $0x4b0] sm:$0xff]   ;;  %v8666_v54 = vld [vmem:[%s9267_s27 + $0x438] sm:$0xff]  }
  0x7f   : > { %7763 = vmatprep.subr.bf16.mxu1 %v8607_v57  ;;  %5587 = vmatprep.mubr.bf16.mxu0 %v6942_v20  ;;  %v8667_v55 = vld [vmem:[%s9267_s27 + $0x4f8] sm:$0xff]   ;;  %v8694_v20 = vld [vmem:[%s9267_s27 + $0x528] sm:$0xff]  }
  0x80   : > { %5627 = vmatprep.mubr.bf16.mxu1 %v6944_v25  ;;  %v8699_v25 = vld [vmem:[%s9267_s27 + $0x5f0] sm:$0xff]  }
  0x81   : > { %7742 = vmatpush3.bf16.msra.mxu0 %v8606_v56  ;;  %v222_v56 = vld [vmem:[%s9262_s23 + $0x40] sm:$0xff] }
  0x82   : > { %7764 = vmatpush3.bf16.msra.mxu1 %v8608_v58  ;;  %7743 = vmatprep.subr.bf16.mxu0 %v8609_v59  ;;  %v6945_v57 = vcombine.low %v222_v56, %v222_v56  ;;  %v6946_v58 = vcombine.high %v222_v56, %v222_v56  ;;  %v8670_v59 = vld [vmem:[%s9267_s27 + $0x4b8] sm:$0xff]   ;;  %v8728_v56 = vld [vmem:[%s9267_s27 + $0x6a0] sm:$0xff]  }
  0x83   : > { %7765 = vmatprep.subr.bf16.mxu1 %v8611_v61  ;;  %v223_v61 = vld [vmem:[%s9262_s23 + $0x48] sm:$0xff] }
  0x85   : > { %7744 = vmatpush3.bf16.msra.mxu0 %v8610_v60  ;;  %v8671_v60 = vld [vmem:[%s9267_s27 + $0x540] sm:$0xff]  }
  0x86   : > { %7766 = vmatpush3.bf16.msra.mxu1 %v8612_v62  ;;  %7745 = vmatprep.subr.bf16.mxu0 %v8613_v63  ;;  %v6947_v62 = vcombine.low %v223_v61, %v223_v61  ;;  %v6948_v63 = vcombine.high %v223_v61, %v223_v61  ;;  %v8733_v61 = vld [vmem:[%s9267_s27 + $0x670] sm:$0xff]  }
  0x87   : > { %7767 = vmatprep.subr.bf16.mxu1 %v8615_v1  ;;  %v8675_v1 = vld [vmem:[%s9267_s27 + $0x5c0] sm:$0xff]  }
  0x89   : > { %7746 = vmatpush3.bf16.msra.mxu0 %v8614_v0  ;;  %v8674_v0 = vld [vmem:[%s9267_s27 + $0x500] sm:$0xff]  }
  0x8a   : > { %7768 = vmatpush3.bf16.msra.mxu1 %v8616_v2  ;;  %7747 = vmatprep.subr.bf16.mxu0 %v8617_v3  ;;  %v8676_v2 = vld [vmem:[%s9267_s27 + $0x580] sm:$0xff]   ;;  %v8677_v3 = vld [vmem:[%s9267_s27 + $0x548] sm:$0xff]  }
  0x8b   : > { %7769 = vmatprep.subr.bf16.mxu1 %v8619_v5  ;;  %v8679_v5 = vld [vmem:[%s9267_s27 + $0x5c8] sm:$0xff]  }
  0x8d   : > { %7748 = vmatpush3.bf16.msra.mxu0 %v8618_v4  ;;  %v8678_v4 = vld [vmem:[%s9267_s27 + $0x508] sm:$0xff]  }
  0x8e   : > { %7770 = vmatpush3.bf16.msra.mxu1 %v8620_v6  ;;  %7749 = vmatprep.subr.bf16.mxu0 %v8621_v7  ;;  %v8680_v6 = vld [vmem:[%s9267_s27 + $0x588] sm:$0xff]   ;;  %v8681_v7 = vld [vmem:[%s9267_s27 + $0x550] sm:$0xff]  }
  0x8f   : > { %7771 = vmatprep.subr.bf16.mxu1 %v8623_v9  ;;  %v8683_v9 = vld [vmem:[%s9267_s27 + $0x5d0] sm:$0xff]  }
  0x91   : > { %7750 = vmatpush3.bf16.msra.mxu0 %v8622_v8  ;;  %v8682_v8 = vld [vmem:[%s9267_s27 + $0x510] sm:$0xff]  }
  0x92   : > { %7772 = vmatpush3.bf16.msra.mxu1 %v8624_v10  ;;  %7751 = vmatprep.subr.bf16.mxu0 %v8625_v11  ;;  %v8684_v10 = vld [vmem:[%s9267_s27 + $0x590] sm:$0xff]   ;;  %v8685_v11 = vld [vmem:[%s9267_s27 + $0x558] sm:$0xff]  }
  0x93   : > { %7773 = vmatprep.subr.bf16.mxu1 %v8627_v13  ;;  %v8687_v13 = vld [vmem:[%s9267_s27 + $0x5d8] sm:$0xff]  }
  0x95   : > { %7752 = vmatpush3.bf16.msra.mxu0 %v8626_v12  ;;  %v8686_v12 = vld [vmem:[%s9267_s27 + $0x518] sm:$0xff]  }
  0x96   : > { %7774 = vmatpush3.bf16.msra.mxu1 %v8628_v14  ;;  %7753 = vmatprep.subr.bf16.mxu0 %v8629_v15  ;;  %v8688_v14 = vld [vmem:[%s9267_s27 + $0x598] sm:$0xff]   ;;  %v8689_v15 = vld [vmem:[%s9267_s27 + $0x560] sm:$0xff]  }
  0x97   : > { %7775 = vmatprep.subr.bf16.mxu1 %v8631_v17  ;;  %v8691_v17 = vld [vmem:[%s9267_s27 + $0x5e0] sm:$0xff]  }
  0x99   : > { %7754 = vmatpush3.bf16.msra.mxu0 %v8630_v16  ;;  %v8690_v16 = vld [vmem:[%s9267_s27 + $0x520] sm:$0xff]  }
  0x9a   : > { %7776 = vmatpush3.bf16.msra.mxu1 %v8634_v21  ;;  %7783 = vmatprep.subr.bf16.mxu0 %v8635_v22  ;;  %v8695_v21 = vld [vmem:[%s9267_s27 + $0x5e8] sm:$0xff]  }
  0x9b   : > { %7805 = vmatprep.subr.bf16.mxu1 %v8639_v27  ;;  %v8696_v22 = vld [vmem:[%s9267_s27 + $0x5a8] sm:$0xff]   ;;  %v8701_v27 = vld [vmem:[%s9267_s27 + $0x578] sm:$0xff]  }
  0x9c   : > { %5588 = vmatmul.mubr.bf16.vlgmr.msra.gmra.mrb[12].mxu0 %v6941_v19  ;;  %v8693_v19 = vld [vmem:[%s9267_s27 + $0x568] sm:$0xff]  }
  0x9d   : > { %7784 = vmatpush3.bf16.msra.mxu0 %v8638_v26  ;;  %5628 = vmatmul.mubr.bf16.vlgmr.msra.gmra.mrb[12].mxu1 %v6943_v24  ;;  %v8698_v24 = vld [vmem:[%s9267_s27 + $0x530] sm:$0xff]  }
  0x9e   : > { %7806 = vmatpush3.bf16.msra.mxu1 %v8640_v28  ;;  %7785 = vmatprep.subr.bf16.mxu0 %v8641_v29  ;;  %v8700_v26 = vld [vmem:[%s9267_s27 + $0x5b0] sm:$0xff]   ;;  %v8702_v28 = vld [vmem:[%s9267_s27 + $0x538] sm:$0xff]  }
  0x9f   : > { %7807 = vmatprep.subr.bf16.mxu1 %v8643_v31  ;;  %5667 = vmatprep.mubr.bf16.mxu0 %v6946_v58  ;;  %v8703_v29 = vld [vmem:[%s9267_s27 + $0x5f8] sm:$0xff]   ;;  %v8730_v58 = vld [vmem:[%s9267_s27 + $0x628] sm:$0xff]  }
  0xa0   : > { %5707 = vmatprep.mubr.bf16.mxu1 %v6948_v63  ;;  %v8735_v63 = vld [vmem:[%s9267_s27 + $0x6f0] sm:$0xff]  }
  0xa1   : > { %7786 = vmatpush3.bf16.msra.mxu0 %v8642_v30  ;;  %v224_v30 = vld [vmem:[%s9262_s23 + $0x50] sm:$0xff] }
  0xa2   : > { %7808 = vmatpush3.bf16.msra.mxu1 %v8644_v32  ;;  %7787 = vmatprep.subr.bf16.mxu0 %v8645_v33  ;;  %v6949_v31 = vcombine.low %v224_v30, %v224_v30  ;;  %v6950_v32 = vcombine.high %v224_v30, %v224_v30  ;;  %v8706_v33 = vld [vmem:[%s9267_s27 + $0x5b8] sm:$0xff]  }
  0xa3   : > { %7809 = vmatprep.subr.bf16.mxu1 %v8647_v35  ;;  %v225_v35 = vld [vmem:[%s9262_s23 + $0x58] sm:$0xff] }
  0xa5   : > { %7788 = vmatpush3.bf16.msra.mxu0 %v8646_v34  ;;  %v8707_v34 = vld [vmem:[%s9267_s27 + $0x640] sm:$0xff]  }
  0xa6   : > { %7810 = vmatpush3.bf16.msra.mxu1 %v8648_v36  ;;  %7789 = vmatprep.subr.bf16.mxu0 %v8649_v37  ;;  %v6951_v36 = vcombine.low %v225_v35, %v225_v35  ;;  %v6952_v37 = vcombine.high %v225_v35, %v225_v35 }
  0xa7   : > { %7811 = vmatprep.subr.bf16.mxu1 %v8651_v39  ;;  %v8711_v39 = vld [vmem:[%s9267_s27 + $0x6c0] sm:$0xff]  }
  0xa9   : > { %7790 = vmatpush3.bf16.msra.mxu0 %v8650_v38  ;;  %v8710_v38 = vld [vmem:[%s9267_s27 + $0x600] sm:$0xff]  }
  0xaa   : > { %7812 = vmatpush3.bf16.msra.mxu1 %v8652_v40  ;;  %7791 = vmatprep.subr.bf16.mxu0 %v8653_v41  ;;  %v8712_v40 = vld [vmem:[%s9267_s27 + $0x680] sm:$0xff]   ;;  %v8713_v41 = vld [vmem:[%s9267_s27 + $0x648] sm:$0xff]  }
  0xab   : > { %7813 = vmatprep.subr.bf16.mxu1 %v8655_v43  ;;  %v8715_v43 = vld [vmem:[%s9267_s27 + $0x6c8] sm:$0xff]  }
  0xad   : > { %7792 = vmatpush3.bf16.msra.mxu0 %v8654_v42  ;;  %v8714_v42 = vld [vmem:[%s9267_s27 + $0x608] sm:$0xff]  }
  0xae   : > { %7814 = vmatpush3.bf16.msra.mxu1 %v8656_v44  ;;  %7793 = vmatprep.subr.bf16.mxu0 %v8657_v45  ;;  %v8716_v44 = vld [vmem:[%s9267_s27 + $0x688] sm:$0xff]   ;;  %v8717_v45 = vld [vmem:[%s9267_s27 + $0x650] sm:$0xff]  }
  0xaf   : > { %7815 = vmatprep.subr.bf16.mxu1 %v8659_v47  ;;  %v8719_v47 = vld [vmem:[%s9267_s27 + $0x6d0] sm:$0xff]  }
  0xb1   : > { %7794 = vmatpush3.bf16.msra.mxu0 %v8658_v46  ;;  %v8718_v46 = vld [vmem:[%s9267_s27 + $0x610] sm:$0xff]  }
  0xb2   : > { %7816 = vmatpush3.bf16.msra.mxu1 %v8660_v48  ;;  %7795 = vmatprep.subr.bf16.mxu0 %v8661_v49  ;;  %v8720_v48 = vld [vmem:[%s9267_s27 + $0x690] sm:$0xff]   ;;  %v8721_v49 = vld [vmem:[%s9267_s27 + $0x658] sm:$0xff]  }
  0xb3   : > { %7817 = vmatprep.subr.bf16.mxu1 %v8663_v51  ;;  %v8723_v51 = vld [vmem:[%s9267_s27 + $0x6d8] sm:$0xff]  }
  0xb5   : > { %7796 = vmatpush3.bf16.msra.mxu0 %v8662_v50  ;;  %v8722_v50 = vld [vmem:[%s9267_s27 + $0x618] sm:$0xff]  }
  0xb6   : > { %7818 = vmatpush3.bf16.msra.mxu1 %v8664_v52  ;;  %7797 = vmatprep.subr.bf16.mxu0 %v8665_v53  ;;  %v8724_v52 = vld [vmem:[%s9267_s27 + $0x698] sm:$0xff]   ;;  %v8725_v53 = vld [vmem:[%s9267_s27 + $0x660] sm:$0xff]  }
  0xb7   : > { %7819 = vmatprep.subr.bf16.mxu1 %v8667_v55  ;;  %v8727_v55 = vld [vmem:[%s9267_s27 + $0x6e0] sm:$0xff]  }
  0xb9   : > { %7798 = vmatpush3.bf16.msra.mxu0 %v8666_v54  ;;  %v8726_v54 = vld [vmem:[%s9267_s27 + $0x620] sm:$0xff]  }
  0xba   : > { %7820 = vmatpush3.bf16.msra.mxu1 %v8670_v59  ;;  %7827 = vmatprep.subr.bf16.mxu0 %v8671_v60  ;;  %v8731_v59 = vld [vmem:[%s9267_s27 + $0x6e8] sm:$0xff]  }
  0xbb   : > { %7849 = vmatprep.subr.bf16.mxu1 %v8675_v1  ;;  %v8732_v60 = vld [vmem:[%s9267_s27 + $0x6a8] sm:$0xff]   ;;  %v8737_v1 = vld [vmem:[%s9267_s27 + $0x678] sm:$0xff]  }
  0xbc   : > { %5668 = vmatmul.mubr.bf16.vlgmr.msra.gmra.mrb[16].mxu0 %v6945_v57  ;;  %v8729_v57 = vld [vmem:[%s9267_s27 + $0x668] sm:$0xff]  }
  0xbd   : > { %7828 = vmatpush3.bf16.msra.mxu0 %v8674_v0  ;;  %5708 = vmatmul.mubr.bf16.vlgmr.msra.gmra.mrb[16].mxu1 %v6947_v62  ;;  %v8734_v62 = vld [vmem:[%s9267_s27 + $0x630] sm:$0xff]  }
  0xbe   : > { %7850 = vmatpush3.bf16.msra.mxu1 %v8676_v2  ;;  %7829 = vmatprep.subr.bf16.mxu0 %v8677_v3  ;;  %v8736_v0 = vld [vmem:[%s9267_s27 + $0x6b0] sm:$0xff]   ;;  %v8738_v2 = vld [vmem:[%s9267_s27 + $0x638] sm:$0xff]  }
  0xbf   : > { %7851 = vmatprep.subr.bf16.mxu1 %v8679_v5  ;;  %5747 = vmatprep.mubr.bf16.mxu0 %v6950_v32  ;;  %v8739_v3 = vld [vmem:[%s9267_s27 + $0x6f8] sm:$0xff]   ;;  %v8764_v32 = vld [vmem:[%s9267_s27 + $0x7a0] sm:$0xff]  }
  0xc0   : > { %5787 = vmatprep.mubr.bf16.mxu1 %v6952_v37  ;;  %v8765_v37 = vld [vmem:[%s9267_s27 + $0x768] sm:$0xff]  }
  0xc1   : > { %7830 = vmatpush3.bf16.msra.mxu0 %v8678_v4  ;;  %v226_v4 = vld [vmem:[%s9262_s23 + $0x60] sm:$0xff] }
  0xc2   : > { %7852 = vmatpush3.bf16.msra.mxu1 %v8680_v6  ;;  %7831 = vmatprep.subr.bf16.mxu0 %v8681_v7  ;;  %v6953_v5 = vcombine.low %v226_v4, %v226_v4  ;;  %v6954_v6 = vcombine.high %v226_v4, %v226_v4  ;;  %v8742_v7 = vld [vmem:[%s9267_s27 + $0x6b8] sm:$0xff]   ;;  %v8789_v4 = vld [vmem:[%s9267_s27 + $0x850] sm:$0xff]  }
  0xc3   : > { %7853 = vmatprep.subr.bf16.mxu1 %v8683_v9  ;;  %v227_v9 = vld [vmem:[%s9262_s23 + $0x68] sm:$0xff] }
  0xc5   : > { %7832 = vmatpush3.bf16.msra.mxu0 %v8682_v8  ;;  %v8743_v8 = vld [vmem:[%s9267_s27 + $0x740] sm:$0xff]  }
  0xc6   : > { %7854 = vmatpush3.bf16.msra.mxu1 %v8684_v10  ;;  %7833 = vmatprep.subr.bf16.mxu0 %v8685_v11  ;;  %v6955_v10 = vcombine.low %v227_v9, %v227_v9  ;;  %v6956_v11 = vcombine.high %v227_v9, %v227_v9  ;;  %v8794_v9 = vld [vmem:[%s9267_s27 + $0x818] sm:$0xff]  }
  0xc7   : > { %7855 = vmatprep.subr.bf16.mxu1 %v8687_v13  ;;  %v8747_v13 = vld [vmem:[%s9267_s27 + $0x7c0] sm:$0xff]  }
  0xc9   : > { %7834 = vmatpush3.bf16.msra.mxu0 %v8686_v12  ;;  %v8746_v12 = vld [vmem:[%s9267_s27 + $0x700] sm:$0xff]  }
  0xca   : > { %7856 = vmatpush3.bf16.msra.mxu1 %v8688_v14  ;;  %7835 = vmatprep.subr.bf16.mxu0 %v8689_v15  ;;  %v8748_v14 = vld [vmem:[%s9267_s27 + $0x780] sm:$0xff]   ;;  %v8749_v15 = vld [vmem:[%s9267_s27 + $0x748] sm:$0xff]  }
  0xcb   : > { %7857 = vmatprep.subr.bf16.mxu1 %v8691_v17  ;;  %v8751_v17 = vld [vmem:[%s9267_s27 + $0x7c8] sm:$0xff]  }
  0xcd   : > { %7836 = vmatpush3.bf16.msra.mxu0 %v8690_v16  ;;  %v8750_v16 = vld [vmem:[%s9267_s27 + $0x708] sm:$0xff]  }
  0xce   : > { %7858 = vmatpush3.bf16.msra.mxu1 %v8692_v18  ;;  %7837 = vmatprep.subr.bf16.mxu0 %v8693_v19  ;;  %v8752_v18 = vld [vmem:[%s9267_s27 + $0x788] sm:$0xff]   ;;  %v8753_v19 = vld [vmem:[%s9267_s27 + $0x750] sm:$0xff]  }
  0xcf   : > { %7859 = vmatprep.subr.bf16.mxu1 %v8695_v21  ;;  %v8755_v21 = vld [vmem:[%s9267_s27 + $0x7d0] sm:$0xff]  }
  0xd1   : > { %7838 = vmatpush3.bf16.msra.mxu0 %v8694_v20  ;;  %v8754_v20 = vld [vmem:[%s9267_s27 + $0x710] sm:$0xff]  }
  0xd2   : > { %7860 = vmatpush3.bf16.msra.mxu1 %v8696_v22  ;;  %7839 = vmatprep.subr.bf16.mxu0 %v8697_v23  ;;  %v8756_v22 = vld [vmem:[%s9267_s27 + $0x790] sm:$0xff]   ;;  %v8757_v23 = vld [vmem:[%s9267_s27 + $0x758] sm:$0xff]  }
  0xd3   : > { %7861 = vmatprep.subr.bf16.mxu1 %v8699_v25  ;;  %v8759_v25 = vld [vmem:[%s9267_s27 + $0x7d8] sm:$0xff]  }
  0xd5   : > { %7840 = vmatpush3.bf16.msra.mxu0 %v8698_v24  ;;  %v8758_v24 = vld [vmem:[%s9267_s27 + $0x718] sm:$0xff]  }
  0xd6   : > { %7862 = vmatpush3.bf16.msra.mxu1 %v8700_v26  ;;  %7841 = vmatprep.subr.bf16.mxu0 %v8701_v27  ;;  %v8760_v26 = vld [vmem:[%s9267_s27 + $0x798] sm:$0xff]   ;;  %v8761_v27 = vld [vmem:[%s9267_s27 + $0x760] sm:$0xff]  }
  0xd7   : > { %7863 = vmatprep.subr.bf16.mxu1 %v8703_v29  ;;  %v8763_v29 = vld [vmem:[%s9267_s27 + $0x7e0] sm:$0xff]  }
  0xd9   : > { %7842 = vmatpush3.bf16.msra.mxu0 %v8702_v28  ;;  %v8762_v28 = vld [vmem:[%s9267_s27 + $0x720] sm:$0xff]  }
  0xda   : > { %7864 = vmatpush3.bf16.msra.mxu1 %v8706_v33  ;;  %7871 = vmatprep.subr.bf16.mxu0 %v8707_v34 }
  0xdb   : > { %7893 = vmatprep.subr.bf16.mxu1 %v8711_v39  ;;  %v8766_v39 = vld [vmem:[%s9267_s27 + $0x728] sm:$0xff]  }
  0xdc   : > { %5748 = vmatmul.mubr.bf16.vlgmr.msra.gmra.mrb[20].mxu0 %v6949_v31 }
  0xdd   : > { %7872 = vmatpush3.bf16.msra.mxu0 %v8710_v38  ;;  %5788 = vmatmul.mubr.bf16.vlgmr.msra.gmra.mrb[20].mxu1 %v6951_v36 }
  0xde   : > { %7894 = vmatpush3.bf16.msra.mxu1 %v8712_v40  ;;  %7873 = vmatprep.subr.bf16.mxu0 %v8713_v41 }
  0xdf   : > { %7895 = vmatprep.subr.bf16.mxu1 %v8715_v43  ;;  %5827 = vmatprep.mubr.bf16.mxu0 %v6954_v6  ;;  %v8791_v6 = vld [vmem:[%s9267_s27 + $0x8d0] sm:$0xff]  }
  0xe0   : > { %5867 = vmatprep.mubr.bf16.mxu1 %v6956_v11  ;;  %v8796_v11 = vld [vmem:[%s9267_s27 + $0x898] sm:$0xff]  }
  0xe1   : > { %7874 = vmatpush3.bf16.msra.mxu0 %v8714_v42  ;;  %v8767_v42 = vld [vmem:[%s9267_s27 + $0x7e8] sm:$0xff]  }
  0xe2   : > { %7896 = vmatpush3.bf16.msra.mxu1 %v8716_v44  ;;  %7875 = vmatprep.subr.bf16.mxu0 %v8717_v45  ;;  %v8768_v44 = vld [vmem:[%s9267_s27 + $0x7a8] sm:$0xff]  }
  0xe3   : > { %7897 = vmatprep.subr.bf16.mxu1 %v8719_v47  ;;  %v8770_v47 = vld [vmem:[%s9267_s27 + $0x730] sm:$0xff]  }
  0xe5   : > { %7876 = vmatpush3.bf16.msra.mxu0 %v8718_v46  ;;  %v8769_v46 = vld [vmem:[%s9267_s27 + $0x770] sm:$0xff]  }
  0xe6   : > { %7898 = vmatpush3.bf16.msra.mxu1 %v8720_v48  ;;  %7877 = vmatprep.subr.bf16.mxu0 %v8721_v49  ;;  %v8771_v48 = vld [vmem:[%s9267_s27 + $0x7f0] sm:$0xff]  }
  0xe7   : > { %7899 = vmatprep.subr.bf16.mxu1 %v8723_v51  ;;  %v8772_v49 = vld [vmem:[%s9267_s27 + $0x7b0] sm:$0xff]   ;;  %v8774_v51 = vld [vmem:[%s9267_s27 + $0x738] sm:$0xff]  }
  0xe9   : > { %7878 = vmatpush3.bf16.msra.mxu0 %v8722_v50  ;;  %v8773_v50 = vld [vmem:[%s9267_s27 + $0x778] sm:$0xff]  }
  0xea   : > { %7900 = vmatpush3.bf16.msra.mxu1 %v8724_v52  ;;  %7879 = vmatprep.subr.bf16.mxu0 %v8725_v53  ;;  %v8775_v52 = vld [vmem:[%s9267_s27 + $0x7f8] sm:$0xff]   ;;  %v228_v53 = vld [vmem:[%s9262_s23 + $0x70] sm:$0xff] }
  0xeb   : > { %7901 = vmatprep.subr.bf16.mxu1 %v8727_v55  ;;  %v6958_v55 = vcombine.high %v228_v53, %v228_v53 }
  0xed   : > { %7880 = vmatpush3.bf16.msra.mxu0 %v8726_v54  ;;  %v6957_v54 = vcombine.low %v228_v53, %v228_v53  ;;  %v8824_v53 = vld [vmem:[%s9267_s27 + $0x988] sm:$0xff]  }
  0xee   : > { %7902 = vmatpush3.bf16.msra.mxu1 %v8728_v56  ;;  %7881 = vmatprep.subr.bf16.mxu0 %v8729_v57  ;;  %v8778_v56 = vld [vmem:[%s9267_s27 + $0x7b8] sm:$0xff]   ;;  %v8779_v57 = vld [vmem:[%s9267_s27 + $0x840] sm:$0xff]  }
  0xef   : > { %7903 = vmatprep.subr.bf16.mxu1 %v8731_v59 }
  0xf1   : > { %7882 = vmatpush3.bf16.msra.mxu0 %v8730_v58  ;;  %v229_v58 = vld [vmem:[%s9262_s23 + $0x78] sm:$0xff] }
  0xf2   : > { %7904 = vmatpush3.bf16.msra.mxu1 %v8732_v60  ;;  %7883 = vmatprep.subr.bf16.mxu0 %v8733_v61  ;;  %v6959_v59 = vcombine.low %v229_v58, %v229_v58  ;;  %v6960_v60 = vcombine.high %v229_v58, %v229_v58  ;;  %v8782_v61 = vld [vmem:[%s9267_s27 + $0x800] sm:$0xff]   ;;  %v8829_v58 = vld [vmem:[%s9267_s27 + $0x958] sm:$0xff]  }
  0xf3   : > { %7905 = vmatprep.subr.bf16.mxu1 %v8735_v63  ;;  %v8784_v63 = vld [vmem:[%s9267_s27 + $0x880] sm:$0xff]  }
  0xf5   : > { %7884 = vmatpush3.bf16.msra.mxu0 %v8734_v62  ;;  %v8783_v62 = vld [vmem:[%s9267_s27 + $0x8c0] sm:$0xff]  }
  0xf6   : > { %7906 = vmatpush3.bf16.msra.mxu1 %v8736_v0  ;;  %7885 = vmatprep.subr.bf16.mxu0 %v8737_v1  ;;  %v8785_v0 = vld [vmem:[%s9267_s27 + $0x848] sm:$0xff]  }
  0xf7   : > { %7907 = vmatprep.subr.bf16.mxu1 %v8739_v3  ;;  %v8786_v1 = vld [vmem:[%s9267_s27 + $0x808] sm:$0xff]  }
  0xf8   : > { %v8788_v3 = vld [vmem:[%s9267_s27 + $0x888] sm:$0xff]  }
  0xf9   : > { %7886 = vmatpush3.bf16.msra.mxu0 %v8738_v2  ;;  %v8787_v2 = vld [vmem:[%s9267_s27 + $0x8c8] sm:$0xff]  }
  0xfa   : > { %7908 = vmatpush3.bf16.msra.mxu1 %v8742_v7  ;;  %7915 = vmatprep.subr.bf16.mxu0 %v8743_v8  ;;  %v8792_v7 = vld [vmem:[%s9267_s27 + $0x890] sm:$0xff]   ;;  %v8793_v8 = vld [vmem:[%s9267_s27 + $0x858] sm:$0xff]  }
  0xfb   : > { %7937 = vmatprep.subr.bf16.mxu1 %v8747_v13  ;;  %v8798_v13 = vld [vmem:[%s9267_s27 + $0x820] sm:$0xff]  }
  0xfc   : > { %5828 = vmatmul.mubr.bf16.vlgmr.msra.gmra.mrb[24].mxu0 %v6953_v5  ;;  %v8790_v5 = vld [vmem:[%s9267_s27 + $0x810] sm:$0xff]  }
  0xfd   : > { %7916 = vmatpush3.bf16.msra.mxu0 %v8746_v12  ;;  %5868 = vmatmul.mubr.bf16.vlgmr.msra.gmra.mrb[24].mxu1 %v6955_v10  ;;  %v8795_v10 = vld [vmem:[%s9267_s27 + $0x8d8] sm:$0xff]   ;;  %v8797_v12 = vld [vmem:[%s9267_s27 + $0x860] sm:$0xff]  }
  0xfe   : > { %7938 = vmatpush3.bf16.msra.mxu1 %v8748_v14  ;;  %7917 = vmatprep.subr.bf16.mxu0 %v8749_v15  ;;  %v8799_v14 = vld [vmem:[%s9267_s27 + $0x8e0] sm:$0xff]  }
  0xff   : > { %7939 = vmatprep.subr.bf16.mxu1 %v8751_v17  ;;  %5907 = vmatprep.mubr.bf16.mxu0 %v6958_v55  ;;  %v8826_v55 = vld [vmem:[%s9267_s27 + $0x910] sm:$0xff]  }
 0x100   : > { %5947 = vmatprep.mubr.bf16.mxu1 %v6960_v60  ;;  %v8831_v60 = vld [vmem:[%s9267_s27 + $0x9d8] sm:$0xff]  }
 0x101   : > { %7918 = vmatpush3.bf16.msra.mxu0 %v8750_v16  ;;  %v8800_v16 = vld [vmem:[%s9267_s27 + $0x8a0] sm:$0xff]  }
 0x102   : > { %7940 = vmatpush3.bf16.msra.mxu1 %v8752_v18  ;;  %7919 = vmatprep.subr.bf16.mxu0 %v8753_v19  ;;  %v8801_v19 = vld [vmem:[%s9267_s27 + $0x868] sm:$0xff]  }
 0x103   : > { %7941 = vmatprep.subr.bf16.mxu1 %v8755_v21 }
 0x105   : > { %7920 = vmatpush3.bf16.msra.mxu0 %v8754_v20 }
 0x106   : > { %7942 = vmatpush3.bf16.msra.mxu1 %v8756_v22  ;;  %7921 = vmatprep.subr.bf16.mxu0 %v8757_v23  ;;  %v8802_v22 = vld [vmem:[%s9267_s27 + $0x828] sm:$0xff]  }
 0x107   : > { %7943 = vmatprep.subr.bf16.mxu1 %v8759_v25 }
 0x109   : > { %7922 = vmatpush3.bf16.msra.mxu0 %v8758_v24 }
 0x10a   : > { %7944 = vmatpush3.bf16.msra.mxu1 %v8760_v26  ;;  %7923 = vmatprep.subr.bf16.mxu0 %v8761_v27  ;;  %v8803_v27 = vld [vmem:[%s9267_s27 + $0x8e8] sm:$0xff]  }
 0x10b   : > { %7945 = vmatprep.subr.bf16.mxu1 %v8763_v29  ;;  %v8804_v29 = vld [vmem:[%s9267_s27 + $0x8a8] sm:$0xff]  }
 0x10d   : > { %7924 = vmatpush3.bf16.msra.mxu0 %v8762_v28 }
 0x10e   : > { %7946 = vmatpush3.bf16.msra.mxu1 %v8764_v32  ;;  %7925 = vmatprep.subr.bf16.mxu0 %v8765_v37  ;;  %v8805_v32 = vld [vmem:[%s9267_s27 + $0x870] sm:$0xff]   ;;  %v8810_v37 = vld [vmem:[%s9267_s27 + $0x838] sm:$0xff]  }
 0x10f   : > { %v7623_v30 = vpop.f32.mrb[0].mxu0  ;;  %7947 = vmatprep.subr.bf16.mxu1 %v8767_v42  ;;  %v8814_v42 = vld [vmem:[%s9267_s27 + $0x8b8] sm:$0xff]  }
 0x110   : > { %v7645_v31 = vpop.f32.mrb[0].mxu1  ;;  %v7624_v33 = vpop.f32.mrb[1].mxu0 }
 0x111   : > { %v7646_v34 = vpop.f32.mrb[1].mxu1  ;;  %v7625_v35 = vadd.f32 %v7624_v33, %v7623_v30  ;;  %v7626_v38 = vpop.f32.mrb[2].mxu0  ;;  %7926 = vmatpush3.bf16.msra.mxu0 %v8766_v39  ;;  %v8806_v33 = vld [vmem:[%s9267_s27 + $0x830] sm:$0xff]   ;;  %v230_v39 = vld [vmem:[%s9262_s23 + $0x80] sm:$0xff] }
 0x112   : > { %v7647_v36 = vadd.f32 %v7646_v34, %v7645_v31  ;;  %v7627_v40 = vpop.f32.mrb[3].mxu0  ;;  %v7648_v43 = vpop.f32.mrb[2].mxu1  ;;  %7948 = vmatpush3.bf16.msra.mxu1 %v8768_v44  ;;  %7927 = vmatprep.subr.bf16.mxu0 %v8769_v46  ;;  %v8807_v34 = vld [vmem:[%s9267_s27 + $0x8f0] sm:$0xff]   ;;  %v8811_v38 = vld [vmem:[%s9267_s27 + $0x8f8] sm:$0xff]   ;;  %v231_v44 = vld [vmem:[%s9262_s23 + $0x88] sm:$0xff] }
 0x113   : > { %v7649_v45 = vpop.f32.mrb[3].mxu1  ;;  %7949 = vmatprep.subr.bf16.mxu1 %v8771_v48  ;;  %v6961_v40 = vcombine.low %v230_v39, %v230_v39  ;;  %v8815_v43 = vld [vmem:[%s9267_s27 + $0x940] sm:$0xff]   ;;  %v6964_v46 = vcombine.high %v231_v44, %v231_v44 }
 0x114   : > { %v9535_v41 = vadd.f32 %v7647_v36, %v7625_v35  ;;  %v8808_v35 = vld [vmem:[%s9267_s27 + $0x8b0] sm:$0xff]   ;;  %v8809_v36 = vld [vmem:[%s9267_s27 + $0x878] sm:$0xff]   ;;  %v6963_v45 = vcombine.low %v231_v44, %v231_v44  ;;  %v8819_v48 = vld [vmem:[%s9267_s27 + $0x9c0] sm:$0xff]  }
 0x115   : > { %7928 = vmatpush3.bf16.msra.mxu0 %v8770_v47  ;;  %v8818_v47 = vld [vmem:[%s9267_s27 + $0x900] sm:$0xff]   ;;  %v8865_v44 = vld [vmem:[%s9267_s27 + $0xa58] sm:$0xff]  }
 0x116   : > { %7950 = vmatpush3.bf16.msra.mxu1 %v8772_v49  ;;  %7929 = vmatprep.subr.bf16.mxu0 %v8773_v50  ;;  %v8820_v49 = vld [vmem:[%s9267_s27 + $0x980] sm:$0xff]   ;;  %v8821_v50 = vld [vmem:[%s9267_s27 + $0x948] sm:$0xff]  }
 0x117   : > { %7951 = vmatprep.subr.bf16.mxu1 %v8775_v52  ;;  %v8823_v52 = vld [vmem:[%s9267_s27 + $0x9c8] sm:$0xff]  }
 0x119   : > { %7930 = vmatpush3.bf16.msra.mxu0 %v8774_v51  ;;  %v8822_v51 = vld [vmem:[%s9267_s27 + $0x908] sm:$0xff]  }
 0x11a   : > { %7952 = vmatpush3.bf16.msra.mxu1 %v8778_v56  ;;  %7959 = vmatprep.subr.bf16.mxu0 %v8779_v57  ;;  %v8827_v56 = vld [vmem:[%s9267_s27 + $0x9d0] sm:$0xff]  }
 0x11b   : > { %7981 = vmatprep.subr.bf16.mxu1 %v8783_v62  ;;  %v8828_v57 = vld [vmem:[%s9267_s27 + $0x990] sm:$0xff]   ;;  %v8833_v62 = vld [vmem:[%s9267_s27 + $0x960] sm:$0xff]  }
 0x11c   : > { %5908 = vmatmul.mubr.bf16.vlgmr.msra.gmra.mrb[28].mxu0 %v6957_v54  ;;  %v8825_v54 = vld [vmem:[%s9267_s27 + $0x950] sm:$0xff]  }
 0x11d   : > { %7960 = vmatpush3.bf16.msra.mxu0 %v8782_v61  ;;  %5948 = vmatmul.mubr.bf16.vlgmr.msra.gmra.mrb[28].mxu1 %v6959_v59  ;;  %v8830_v59 = vld [vmem:[%s9267_s27 + $0x918] sm:$0xff]  }
 0x11e   : > { %7982 = vmatpush3.bf16.msra.mxu1 %v8784_v63  ;;  %7961 = vmatprep.subr.bf16.mxu0 %v8785_v0  ;;  %v8832_v61 = vld [vmem:[%s9267_s27 + $0x998] sm:$0xff]   ;;  %v8834_v63 = vld [vmem:[%s9267_s27 + $0x920] sm:$0xff]  }
 0x11f   : > { %7983 = vmatprep.subr.bf16.mxu1 %v8787_v2  ;;  %6027 = vmatprep.mubr.bf16.mxu1 %v6964_v46  ;;  %v8867_v46 = vld [vmem:[%s9267_s27 + $0xad8] sm:$0xff]  }
 0x121   : > { %7962 = vmatpush3.bf16.msra.mxu0 %v8786_v1  ;;  %v8835_v1 = vld [vmem:[%s9267_s27 + $0x9e0] sm:$0xff]  }
 0x122   : > { %7984 = vmatpush3.bf16.msra.mxu1 %v8788_v3  ;;  %7963 = vmatprep.subr.bf16.mxu0 %v8789_v4  ;;  %v8836_v3 = vld [vmem:[%s9267_s27 + $0x9a0] sm:$0xff]  }
 0x123   : > { %7985 = vmatprep.subr.bf16.mxu1 %v8791_v6  ;;  %v8837_v6 = vld [vmem:[%s9267_s27 + $0x968] sm:$0xff]  }
 0x125   : > { %7964 = vmatpush3.bf16.msra.mxu0 %v8790_v5 }
 0x126   : > { %7986 = vmatpush3.bf16.msra.mxu1 %v8792_v7  ;;  %7965 = vmatprep.subr.bf16.mxu0 %v8793_v8 }
 0x127   : > { %7987 = vmatprep.subr.bf16.mxu1 %v8795_v10 }
 0x129   : > { %7966 = vmatpush3.bf16.msra.mxu0 %v8794_v9  ;;  %v8838_v9 = vld [vmem:[%s9267_s27 + $0x928] sm:$0xff]  }
 0x12a   : > { %7988 = vmatpush3.bf16.msra.mxu1 %v8796_v11  ;;  %7967 = vmatprep.subr.bf16.mxu0 %v8797_v12  ;;  %v8839_v12 = vld [vmem:[%s9267_s27 + $0x9e8] sm:$0xff]  }
 0x12b   : > { %7989 = vmatprep.subr.bf16.mxu1 %v8799_v14  ;;  %v8840_v14 = vld [vmem:[%s9267_s27 + $0x9a8] sm:$0xff]  }
 0x12d   : > { %7968 = vmatpush3.bf16.msra.mxu0 %v8798_v13 }
 0x12e   : > { %7990 = vmatpush3.bf16.msra.mxu1 %v8800_v16  ;;  %7969 = vmatprep.subr.bf16.mxu0 %v8801_v19  ;;  %v8842_v19 = vld [vmem:[%s9267_s27 + $0x930] sm:$0xff]  }
 0x12f   : > { %v7667_v15 = vpop.f32.mrb[4].mxu0  ;;  %7991 = vmatprep.subr.bf16.mxu1 %v8803_v27 }
 0x130   : > { %v7668_v17 = vpop.f32.mrb[5].mxu0  ;;  %v7689_v21 = vpop.f32.mrb[4].mxu1 }
 0x131   : > { %v7669_v18 = vadd.f32 %v7668_v17, %v7667_v15  ;;  %v7670_v20 = vpop.f32.mrb[6].mxu0  ;;  %v7690_v24 = vpop.f32.mrb[5].mxu1  ;;  %7970 = vmatpush3.bf16.msra.mxu0 %v8802_v22  ;;  %v8841_v17 = vld [vmem:[%s9267_s27 + $0x970] sm:$0xff]   ;;  %v8845_v22 = vld [vmem:[%s9267_s27 + $0x978] sm:$0xff]  }
 0x132   : > { %v7671_v23 = vpop.f32.mrb[7].mxu0  ;;  %v7691_v26 = vadd.f32 %v7690_v24, %v7689_v21  ;;  %v7692_v28 = vpop.f32.mrb[6].mxu1  ;;  %7992 = vmatpush3.bf16.msra.mxu1 %v8804_v29  ;;  %7971 = vmatprep.subr.bf16.mxu0 %v8805_v32  ;;  %v8843_v20 = vld [vmem:[%s9267_s27 + $0x9f0] sm:$0xff]   ;;  %v8847_v24 = vld [vmem:[%s9267_s27 + $0x9f8] sm:$0xff]   ;;  %v8851_v29 = vld [vmem:[%s9267_s27 + $0xa40] sm:$0xff]  }
 0x133   : > { %v5430_v25 = vadd.f32 %v7669_v18, %v9535_v41  ;;  %v7693_v30 = vpop.f32.mrb[7].mxu1  ;;  %7993 = vmatprep.subr.bf16.mxu1 %v8807_v34  ;;  %v6962_v41 = vcombine.high %v230_v39, %v230_v39  ;;  %v8844_v21 = vld [vmem:[%s9267_s27 + $0x9b0] sm:$0xff]   ;;  %v8846_v23 = vld [vmem:[%s9267_s27 + $0x938] sm:$0xff]   ;;  %v8855_v34 = vld [vmem:[%s9267_s27 + $0xac0] sm:$0xff]  }
 0x134   : > { %v8850_v28 = vld [vmem:[%s9267_s27 + $0x9b8] sm:$0xff]   ;;  %v8860_v39 = vld [vmem:[%s9267_s27 + $0xa88] sm:$0xff]  }
 0x135   : > { %v9574_v31 = vadd.f32 %v7691_v26, %v5430_v25  ;;  %7972 = vmatpush3.bf16.msra.mxu0 %v8806_v33  ;;  %5987 = vmatprep.mubr.bf16.mxu0 %v6962_v41  ;;  %v232_v25 = vld [vmem:[%s9262_s23 + $0x90] sm:$0xff]  ;;  %v233_v30 = vld [vmem:[%s9262_s23 + $0x98] sm:$0xff]  ;;  %v8854_v33 = vld [vmem:[%s9267_s27 + $0xa00] sm:$0xff]  }
 0x136   : > { %7994 = vmatpush3.bf16.msra.mxu1 %v8808_v35  ;;  %7973 = vmatprep.subr.bf16.mxu0 %v8809_v36  ;;  %v6965_v26 = vcombine.low %v232_v25, %v232_v25  ;;  %v6966_v27 = vcombine.high %v232_v25, %v232_v25  ;;  %v6968_v32 = vcombine.high %v233_v30, %v233_v30  ;;  %v8856_v35 = vld [vmem:[%s9267_s27 + $0xa80] sm:$0xff]   ;;  %v8857_v36 = vld [vmem:[%s9267_s27 + $0xa48] sm:$0xff]   ;;  %v8862_v41 = vld [vmem:[%s9267_s27 + $0xa10] sm:$0xff]  }
 0x137   : > { %7995 = vmatprep.subr.bf16.mxu1 %v8811_v38  ;;  %v8859_v38 = vld [vmem:[%s9267_s27 + $0xac8] sm:$0xff]  }
 0x138   : > { %v8896_v25 = vld [vmem:[%s9267_s27 + $0xb88] sm:$0xff]  }
 0x139   : > { %7974 = vmatpush3.bf16.msra.mxu0 %v8810_v37  ;;  %v8858_v37 = vld [vmem:[%s9267_s27 + $0xa08] sm:$0xff]  }
 0x13a   : > { %7996 = vmatpush3.bf16.msra.mxu1 %v8814_v42  ;;  %8003 = vmatprep.subr.bf16.mxu0 %v8815_v43  ;;  %v8863_v42 = vld [vmem:[%s9267_s27 + $0xad0] sm:$0xff]  }
 0x13b   : > { %8025 = vmatprep.subr.bf16.mxu1 %v8819_v48  ;;  %v8864_v43 = vld [vmem:[%s9267_s27 + $0xa90] sm:$0xff]   ;;  %v8869_v48 = vld [vmem:[%s9267_s27 + $0xa60] sm:$0xff]  }
 0x13c   : > { %5988 = vmatmul.mubr.bf16.vlgmr.msra.gmra.mrb[32].mxu0 %v6961_v40  ;;  %v8861_v40 = vld [vmem:[%s9267_s27 + $0xa50] sm:$0xff]  }
 0x13d   : > { %8004 = vmatpush3.bf16.msra.mxu0 %v8818_v47  ;;  %6028 = vmatmul.mubr.bf16.vlgmr.msra.gmra.mrb[32].mxu1 %v6963_v45  ;;  %v8866_v45 = vld [vmem:[%s9267_s27 + $0xa18] sm:$0xff]  }
 0x13e   : > { %8026 = vmatpush3.bf16.msra.mxu1 %v8820_v49  ;;  %8005 = vmatprep.subr.bf16.mxu0 %v8821_v50  ;;  %v8868_v47 = vld [vmem:[%s9267_s27 + $0xa98] sm:$0xff]   ;;  %v8870_v50 = vld [vmem:[%s9267_s27 + $0xa20] sm:$0xff]  }
 0x13f   : > { %8027 = vmatprep.subr.bf16.mxu1 %v8823_v52  ;;  %6067 = vmatprep.mubr.bf16.mxu0 %v6966_v27  ;;  %v8871_v52 = vld [vmem:[%s9267_s27 + $0xae0] sm:$0xff]   ;;  %v8898_v27 = vld [vmem:[%s9267_s27 + $0xb10] sm:$0xff]  }
 0x140   : > { %6107 = vmatprep.mubr.bf16.mxu1 %v6968_v32  ;;  %v8903_v32 = vld [vmem:[%s9267_s27 + $0xbd8] sm:$0xff]  }
 0x141   : > { %8006 = vmatpush3.bf16.msra.mxu0 %v8822_v51 }
 0x142   : > { %8028 = vmatpush3.bf16.msra.mxu1 %v8824_v53  ;;  %8007 = vmatprep.subr.bf16.mxu0 %v8825_v54 }
 0x143   : > { %8029 = vmatprep.subr.bf16.mxu1 %v8827_v56 }
 0x145   : > { %8008 = vmatpush3.bf16.msra.mxu0 %v8826_v55  ;;  %v8872_v55 = vld [vmem:[%s9267_s27 + $0xaa0] sm:$0xff]  }
 0x146   : > { %8030 = vmatpush3.bf16.msra.mxu1 %v8828_v57  ;;  %8009 = vmatprep.subr.bf16.mxu0 %v8829_v58  ;;  %v8873_v58 = vld [vmem:[%s9267_s27 + $0xa68] sm:$0xff]  }
 0x147   : > { %8031 = vmatprep.subr.bf16.mxu1 %v8831_v60  ;;  %v8874_v60 = vld [vmem:[%s9267_s27 + $0xa28] sm:$0xff]  }
 0x149   : > { %8010 = vmatpush3.bf16.msra.mxu0 %v8830_v59 }
 0x14a   : > { %8032 = vmatpush3.bf16.msra.mxu1 %v8832_v61  ;;  %8011 = vmatprep.subr.bf16.mxu0 %v8833_v62 }
 0x14b   : > { %8033 = vmatprep.subr.bf16.mxu1 %v8835_v1  ;;  %v8876_v1 = vld [vmem:[%s9267_s27 + $0xaa8] sm:$0xff]  }
 0x14d   : > { %8012 = vmatpush3.bf16.msra.mxu0 %v8834_v63  ;;  %v8875_v63 = vld [vmem:[%s9267_s27 + $0xae8] sm:$0xff]  }
 0x14e   : > { %8034 = vmatpush3.bf16.msra.mxu1 %v8836_v3  ;;  %8013 = vmatprep.subr.bf16.mxu0 %v8837_v6  ;;  %v8879_v6 = vld [vmem:[%s9267_s27 + $0xaf0] sm:$0xff]  }
 0x14f   : > { %v7711_v0 = vpop.f32.mrb[8].mxu0  ;;  %8035 = vmatprep.subr.bf16.mxu1 %v8839_v12 }
 0x150   : > { %v7712_v2 = vpop.f32.mrb[9].mxu0  ;;  %v7733_v7 = vpop.f32.mrb[8].mxu1 }
 0x151   : > { %v7713_v4 = vadd.f32 %v7712_v2, %v7711_v0  ;;  %v7714_v5 = vpop.f32.mrb[10].mxu0  ;;  %v7734_v11 = vpop.f32.mrb[9].mxu1  ;;  %8014 = vmatpush3.bf16.msra.mxu0 %v8838_v9  ;;  %v8882_v9 = vld [vmem:[%s9267_s27 + $0xa38] sm:$0xff]  }
 0x152   : > { %v7715_v10 = vpop.f32.mrb[11].mxu0  ;;  %v7735_v13 = vadd.f32 %v7734_v11, %v7733_v7  ;;  %v7736_v15 = vpop.f32.mrb[10].mxu1  ;;  %8036 = vmatpush3.bf16.msra.mxu1 %v8840_v14  ;;  %8015 = vmatprep.subr.bf16.mxu0 %v8841_v17  ;;  %v8878_v5 = vld [vmem:[%s9267_s27 + $0xa30] sm:$0xff]   ;;  %v234_v11 = vld [vmem:[%s9262_s23 + $0xa0] sm:$0xff]  ;;  %v8886_v14 = vld [vmem:[%s9267_s27 + $0xab8] sm:$0xff]  }
 0x153   : > { %v5510_v8 = vadd.f32 %v7713_v4, %v9574_v31  ;;  %v7737_v18 = vpop.f32.mrb[11].mxu1  ;;  %8037 = vmatprep.subr.bf16.mxu1 %v8843_v20  ;;  %v6967_v31 = vcombine.low %v233_v30, %v233_v30  ;;  %v8877_v4 = vld [vmem:[%s9267_s27 + $0xa70] sm:$0xff]   ;;  %v8883_v10 = vld [vmem:[%s9267_s27 + $0xaf8] sm:$0xff]   ;;  %v6969_v12 = vcombine.low %v234_v11, %v234_v11  ;;  %v8887_v15 = vld [vmem:[%s9267_s27 + $0xb40] sm:$0xff]  }
 0x154   : > { %v8880_v7 = vld [vmem:[%s9267_s27 + $0xab0] sm:$0xff]   ;;  %v8891_v20 = vld [vmem:[%s9267_s27 + $0xbc0] sm:$0xff]   ;;  %v8901_v30 = vld [vmem:[%s9267_s27 + $0xb58] sm:$0xff]  }
 0x155   : > { %v9611_v16 = vadd.f32 %v7735_v13, %v5510_v8  ;;  %8016 = vmatpush3.bf16.msra.mxu0 %v8842_v19  ;;  %v8881_v8 = vld [vmem:[%s9267_s27 + $0xa78] sm:$0xff]   ;;  %v6970_v13 = vcombine.high %v234_v11, %v234_v11  ;;  %v8890_v19 = vld [vmem:[%s9267_s27 + $0xb00] sm:$0xff]   ;;  %v8932_v11 = vld [vmem:[%s9267_s27 + $0xc88] sm:$0xff]  }
 0x156   : > { %8038 = vmatpush3.bf16.msra.mxu1 %v8844_v21  ;;  %8017 = vmatprep.subr.bf16.mxu0 %v8845_v22  ;;  %v8892_v21 = vld [vmem:[%s9267_s27 + $0xb80] sm:$0xff]   ;;  %v8893_v22 = vld [vmem:[%s9267_s27 + $0xb48] sm:$0xff]  }
 0x157   : > { %8039 = vmatprep.subr.bf16.mxu1 %v8847_v24  ;;  %v8895_v24 = vld [vmem:[%s9267_s27 + $0xbc8] sm:$0xff]  }
 0x159   : > { %8018 = vmatpush3.bf16.msra.mxu0 %v8846_v23  ;;  %v8894_v23 = vld [vmem:[%s9267_s27 + $0xb08] sm:$0xff]  }
 0x15a   : > { %8040 = vmatpush3.bf16.msra.mxu1 %v8850_v28  ;;  %8047 = vmatprep.subr.bf16.mxu0 %v8851_v29  ;;  %v8899_v28 = vld [vmem:[%s9267_s27 + $0xbd0] sm:$0xff]  }
 0x15b   : > { %8069 = vmatprep.subr.bf16.mxu1 %v8855_v34  ;;  %v8900_v29 = vld [vmem:[%s9267_s27 + $0xb90] sm:$0xff]   ;;  %v8905_v34 = vld [vmem:[%s9267_s27 + $0xb60] sm:$0xff]  }
 0x15c   : > { %6068 = vmatmul.mubr.bf16.vlgmr.msra.gmra.mrb[36].mxu0 %v6965_v26  ;;  %v8897_v26 = vld [vmem:[%s9267_s27 + $0xb50] sm:$0xff]  }
 0x15d   : > { %8048 = vmatpush3.bf16.msra.mxu0 %v8854_v33  ;;  %6108 = vmatmul.mubr.bf16.vlgmr.msra.gmra.mrb[36].mxu1 %v6967_v31  ;;  %v8902_v31 = vld [vmem:[%s9267_s27 + $0xb18] sm:$0xff]  }
 0x15e   : > { %8070 = vmatpush3.bf16.msra.mxu1 %v8856_v35  ;;  %8049 = vmatprep.subr.bf16.mxu0 %v8857_v36  ;;  %v8904_v33 = vld [vmem:[%s9267_s27 + $0xb98] sm:$0xff]   ;;  %v8906_v36 = vld [vmem:[%s9267_s27 + $0xb20] sm:$0xff]  }
 0x15f   : > { %8071 = vmatprep.subr.bf16.mxu1 %v8859_v38  ;;  %6147 = vmatprep.mubr.bf16.mxu0 %v6970_v13  ;;  %v8907_v38 = vld [vmem:[%s9267_s27 + $0xbe0] sm:$0xff]   ;;  %v8934_v13 = vld [vmem:[%s9267_s27 + $0xc10] sm:$0xff]  }
 0x161   : > { %8050 = vmatpush3.bf16.msra.mxu0 %v8858_v37 }
 0x162   : > { %8072 = vmatpush3.bf16.msra.mxu1 %v8860_v39  ;;  %8051 = vmatprep.subr.bf16.mxu0 %v8861_v40 }
 0x163   : > { %8073 = vmatprep.subr.bf16.mxu1 %v8863_v42 }
 0x165   : > { %8052 = vmatpush3.bf16.msra.mxu0 %v8862_v41  ;;  %v8908_v41 = vld [vmem:[%s9267_s27 + $0xba0] sm:$0xff]  }
 0x166   : > { %8074 = vmatpush3.bf16.msra.mxu1 %v8864_v43  ;;  %8053 = vmatprep.subr.bf16.mxu0 %v8865_v44  ;;  %v8909_v44 = vld [vmem:[%s9267_s27 + $0xb68] sm:$0xff]  }
 0x167   : > { %8075 = vmatprep.subr.bf16.mxu1 %v8867_v46  ;;  %v8910_v46 = vld [vmem:[%s9267_s27 + $0xb28] sm:$0xff]  }
 0x169   : > { %8054 = vmatpush3.bf16.msra.mxu0 %v8866_v45 }
 0x16a   : > { %8076 = vmatpush3.bf16.msra.mxu1 %v8868_v47  ;;  %8055 = vmatprep.subr.bf16.mxu0 %v8869_v48 }
 0x16b   : > { %8077 = vmatprep.subr.bf16.mxu1 %v8871_v52 }
 0x16d   : > { %8056 = vmatpush3.bf16.msra.mxu0 %v8870_v50 }
 0x16e   : > { %8078 = vmatpush3.bf16.msra.mxu1 %v8872_v55  ;;  %8057 = vmatprep.subr.bf16.mxu0 %v8873_v58  ;;  %v8914_v55 = vld [vmem:[%s9267_s27 + $0xb30] sm:$0xff]   ;;  %v8917_v58 = vld [vmem:[%s9267_s27 + $0xb78] sm:$0xff]  }
 0x16f   : > { %v7755_v49 = vpop.f32.mrb[12].mxu0  ;;  %8079 = vmatprep.subr.bf16.mxu1 %v8875_v63 }
 0x170   : > { %v7756_v51 = vpop.f32.mrb[13].mxu0  ;;  %v7777_v56 = vpop.f32.mrb[12].mxu1 }
 0x171   : > { %v7757_v53 = vadd.f32 %v7756_v51, %v7755_v49  ;;  %v7758_v54 = vpop.f32.mrb[14].mxu0  ;;  %v7778_v61 = vpop.f32.mrb[13].mxu1  ;;  %8058 = vmatpush3.bf16.msra.mxu0 %v8874_v60  ;;  %v8911_v49 = vld [vmem:[%s9267_s27 + $0xbe8] sm:$0xff]   ;;  %v8919_v60 = vld [vmem:[%s9267_s27 + $0xbf8] sm:$0xff]  }
 0x172   : > { %v7759_v59 = vpop.f32.mrb[15].mxu0  ;;  %v7779_v62 = vadd.f32 %v7778_v61, %v7777_v56  ;;  %v7780_v0 = vpop.f32.mrb[14].mxu1  ;;  %8080 = vmatpush3.bf16.msra.mxu1 %v8876_v1  ;;  %8059 = vmatprep.subr.bf16.mxu0 %v8877_v4  ;;  %v8912_v51 = vld [vmem:[%s9267_s27 + $0xba8] sm:$0xff]   ;;  %v8913_v54 = vld [vmem:[%s9267_s27 + $0xb70] sm:$0xff]   ;;  %v8923_v1 = vld [vmem:[%s9267_s27 + $0xc40] sm:$0xff]  }
 0x173   : > { %v5590_v57 = vadd.f32 %v7757_v53, %v9611_v16  ;;  %v7781_v2 = vpop.f32.mrb[15].mxu1  ;;  %8081 = vmatprep.subr.bf16.mxu1 %v8879_v6  ;;  %v235_v16 = vld [vmem:[%s9262_s23 + $0xa8] sm:$0xff]  ;;  %v8915_v56 = vld [vmem:[%s9267_s27 + $0xbf0] sm:$0xff]   ;;  %v8918_v59 = vld [vmem:[%s9267_s27 + $0xb38] sm:$0xff]  }
 0x174   : > { %v6971_v17 = vcombine.low %v235_v16, %v235_v16  ;;  %v6972_v18 = vcombine.high %v235_v16, %v235_v16  ;;  %v236_v61 = vld [vmem:[%s9262_s23 + $0xb0] sm:$0xff]  ;;  %v8922_v0 = vld [vmem:[%s9267_s27 + $0xbb8] sm:$0xff]   ;;  %v8927_v6 = vld [vmem:[%s9267_s27 + $0xcc0] sm:$0xff]  }
 0x175   : > { %v9648_v3 = vadd.f32 %v7779_v62, %v5590_v57  ;;  %8060 = vmatpush3.bf16.msra.mxu0 %v8878_v5  ;;  %v8916_v57 = vld [vmem:[%s9267_s27 + $0xbb0] sm:$0xff]   ;;  %v6973_v62 = vcombine.low %v236_v61, %v236_v61  ;;  %v6974_v63 = vcombine.high %v236_v61, %v236_v61  ;;  %v237_v2 = vld [vmem:[%s9262_s23 + $0xb8] sm:$0xff]  ;;  %v8926_v5 = vld [vmem:[%s9267_s27 + $0xc00] sm:$0xff]  }
 0x176   : > { %8082 = vmatpush3.bf16.msra.mxu1 %v8880_v7  ;;  %8061 = vmatprep.subr.bf16.mxu0 %v8881_v8  ;;  %v6976_v4 = vcombine.high %v237_v2, %v237_v2  ;;  %v8928_v7 = vld [vmem:[%s9267_s27 + $0xc80] sm:$0xff]   ;;  %v8929_v8 = vld [vmem:[%s9267_s27 + $0xc48] sm:$0xff]   ;;  %v8937_v16 = vld [vmem:[%s9267_s27 + $0xc58] sm:$0xff]  }
 0x177   : > { %8083 = vmatprep.subr.bf16.mxu1 %v8883_v10  ;;  %6187 = vmatprep.mubr.bf16.mxu1 %v6972_v18  ;;  %v8931_v10 = vld [vmem:[%s9267_s27 + $0xcc8] sm:$0xff]   ;;  %v8939_v18 = vld [vmem:[%s9267_s27 + $0xcd8] sm:$0xff]  }
 0x178   : > { %v8968_v61 = vld [vmem:[%s9267_s27 + $0xd88] sm:$0xff]  }
 0x179   : > { %8062 = vmatpush3.bf16.msra.mxu0 %v8882_v9  ;;  %v8930_v9 = vld [vmem:[%s9267_s27 + $0xc08] sm:$0xff]  }
 0x17a   : > { %8084 = vmatpush3.bf16.msra.mxu1 %v8886_v14  ;;  %8091 = vmatprep.subr.bf16.mxu0 %v8887_v15  ;;  %v8935_v14 = vld [vmem:[%s9267_s27 + $0xcd0] sm:$0xff]  }
 0x17b   : > { %8113 = vmatprep.subr.bf16.mxu1 %v8891_v20  ;;  %v8936_v15 = vld [vmem:[%s9267_s27 + $0xc90] sm:$0xff]   ;;  %v8941_v20 = vld [vmem:[%s9267_s27 + $0xc60] sm:$0xff]  }
 0x17c   : > { %6148 = vmatmul.mubr.bf16.vlgmr.msra.gmra.mrb[40].mxu0 %v6969_v12  ;;  %v8933_v12 = vld [vmem:[%s9267_s27 + $0xc50] sm:$0xff]  }
 0x17d   : > { %8092 = vmatpush3.bf16.msra.mxu0 %v8890_v19  ;;  %6188 = vmatmul.mubr.bf16.vlgmr.msra.gmra.mrb[40].mxu1 %v6971_v17  ;;  %v8938_v17 = vld [vmem:[%s9267_s27 + $0xc18] sm:$0xff]  }
 0x17e   : > { %8114 = vmatpush3.bf16.msra.mxu1 %v8892_v21  ;;  %8093 = vmatprep.subr.bf16.mxu0 %v8893_v22  ;;  %v8940_v19 = vld [vmem:[%s9267_s27 + $0xc98] sm:$0xff]   ;;  %v8942_v22 = vld [vmem:[%s9267_s27 + $0xc20] sm:$0xff]  }
 0x17f   : > { %8115 = vmatprep.subr.bf16.mxu1 %v8895_v24  ;;  %6227 = vmatprep.mubr.bf16.mxu0 %v6974_v63  ;;  %v8943_v24 = vld [vmem:[%s9267_s27 + $0xce0] sm:$0xff]   ;;  %v8970_v63 = vld [vmem:[%s9267_s27 + $0xd10] sm:$0xff]  }
 0x180   : > { %6267 = vmatprep.mubr.bf16.mxu1 %v6976_v4  ;;  %v8975_v4 = vld [vmem:[%s9267_s27 + $0xdd8] sm:$0xff]  }
 0x181   : > { %8094 = vmatpush3.bf16.msra.mxu0 %v8894_v23 }
 0x182   : > { %8116 = vmatpush3.bf16.msra.mxu1 %v8896_v25  ;;  %8095 = vmatprep.subr.bf16.mxu0 %v8897_v26 }
 0x183   : > { %8117 = vmatprep.subr.bf16.mxu1 %v8899_v28 }
 0x185   : > { %8096 = vmatpush3.bf16.msra.mxu0 %v8898_v27  ;;  %v8944_v27 = vld [vmem:[%s9267_s27 + $0xca0] sm:$0xff]  }
 0x186   : > { %8118 = vmatpush3.bf16.msra.mxu1 %v8900_v29  ;;  %8097 = vmatprep.subr.bf16.mxu0 %v8901_v30  ;;  %v8945_v30 = vld [vmem:[%s9267_s27 + $0xc68] sm:$0xff]  }
 0x187   : > { %8119 = vmatprep.subr.bf16.mxu1 %v8903_v32  ;;  %v8946_v32 = vld [vmem:[%s9267_s27 + $0xc28] sm:$0xff]  }
 0x189   : > { %8098 = vmatpush3.bf16.msra.mxu0 %v8902_v31 }
 0x18a   : > { %8120 = vmatpush3.bf16.msra.mxu1 %v8904_v33  ;;  %8099 = vmatprep.subr.bf16.mxu0 %v8905_v34 }
 0x18b   : > { %8121 = vmatprep.subr.bf16.mxu1 %v8907_v38 }
 0x18d   : > { %8100 = vmatpush3.bf16.msra.mxu0 %v8906_v36 }
 0x18e   : > { %8122 = vmatpush3.bf16.msra.mxu1 %v8908_v41  ;;  %8101 = vmatprep.subr.bf16.mxu0 %v8909_v44  ;;  %v8950_v41 = vld [vmem:[%s9267_s27 + $0xc30] sm:$0xff]   ;;  %v8953_v44 = vld [vmem:[%s9267_s27 + $0xc78] sm:$0xff]  }
 0x18f   : > { %v7799_v35 = vpop.f32.mrb[16].mxu0  ;;  %8123 = vmatprep.subr.bf16.mxu1 %v8911_v49 }
 0x190   : > { %v7800_v37 = vpop.f32.mrb[17].mxu0  ;;  %v7821_v42 = vpop.f32.mrb[16].mxu1 }
 0x191   : > { %v7801_v39 = vadd.f32 %v7800_v37, %v7799_v35  ;;  %v7802_v40 = vpop.f32.mrb[18].mxu0  ;;  %v7822_v47 = vpop.f32.mrb[17].mxu1  ;;  %8102 = vmatpush3.bf16.msra.mxu0 %v8910_v46  ;;  %v8947_v35 = vld [vmem:[%s9267_s27 + $0xce8] sm:$0xff]   ;;  %v8955_v46 = vld [vmem:[%s9267_s27 + $0xcf8] sm:$0xff]  }
 0x192   : > { %v7803_v45 = vpop.f32.mrb[19].mxu0  ;;  %v7823_v48 = vadd.f32 %v7822_v47, %v7821_v42  ;;  %v7824_v50 = vpop.f32.mrb[18].mxu1  ;;  %8124 = vmatpush3.bf16.msra.mxu1 %v8912_v51  ;;  %8103 = vmatprep.subr.bf16.mxu0 %v8913_v54  ;;  %v8948_v37 = vld [vmem:[%s9267_s27 + $0xca8] sm:$0xff]   ;;  %v8949_v40 = vld [vmem:[%s9267_s27 + $0xc70] sm:$0xff]   ;;  %v238_v47 = vld [vmem:[%s9262_s23 + $0xc0] sm:$0xff] }
 0x193   : > { %v5670_v43 = vadd.f32 %v7801_v39, %v9648_v3  ;;  %v7825_v52 = vpop.f32.mrb[19].mxu1  ;;  %8125 = vmatprep.subr.bf16.mxu1 %v8915_v56  ;;  %v6975_v3 = vcombine.low %v237_v2, %v237_v2  ;;  %v8951_v42 = vld [vmem:[%s9267_s27 + $0xcf0] sm:$0xff]   ;;  %v8954_v45 = vld [vmem:[%s9267_s27 + $0xc38] sm:$0xff]   ;;  %v6978_v49 = vcombine.high %v238_v47, %v238_v47  ;;  %v8959_v51 = vld [vmem:[%s9267_s27 + $0xd40] sm:$0xff]  }
 0x194   : > { %v8958_v50 = vld [vmem:[%s9267_s27 + $0xcb8] sm:$0xff]   ;;  %v239_v52 = vld [vmem:[%s9262_s23 + $0xc8] sm:$0xff]  ;;  %v8963_v56 = vld [vmem:[%s9267_s27 + $0xdc0] sm:$0xff]  }
 0x195   : > { %v9685_v53 = vadd.f32 %v7823_v48, %v5670_v43  ;;  %8104 = vmatpush3.bf16.msra.mxu0 %v8914_v55  ;;  %v8952_v43 = vld [vmem:[%s9267_s27 + $0xcb0] sm:$0xff]   ;;  %v6977_v48 = vcombine.low %v238_v47, %v238_v47  ;;  %v6980_v54 = vcombine.high %v239_v52, %v239_v52  ;;  %v8962_v55 = vld [vmem:[%s9267_s27 + $0xd00] sm:$0xff]   ;;  %v8973_v2 = vld [vmem:[%s9267_s27 + $0xd58] sm:$0xff]  }
 0x196   : > { %8126 = vmatpush3.bf16.msra.mxu1 %v8916_v57  ;;  %8105 = vmatprep.subr.bf16.mxu0 %v8917_v58  ;;  %v8964_v57 = vld [vmem:[%s9267_s27 + $0xd80] sm:$0xff]   ;;  %v8965_v58 = vld [vmem:[%s9267_s27 + $0xd48] sm:$0xff]  }
 0x197   : > { %8127 = vmatprep.subr.bf16.mxu1 %v8919_v60  ;;  %v8967_v60 = vld [vmem:[%s9267_s27 + $0xdc8] sm:$0xff]  }
 0x198   : > { %v9004_v47 = vld [vmem:[%s9267_s27 + $0xe88] sm:$0xff]  }
 0x199   : > { %8106 = vmatpush3.bf16.msra.mxu0 %v8918_v59  ;;  %v8966_v59 = vld [vmem:[%s9267_s27 + $0xd08] sm:$0xff]  }
 0x19a   : > { %8128 = vmatpush3.bf16.msra.mxu1 %v8922_v0  ;;  %8135 = vmatprep.subr.bf16.mxu0 %v8923_v1  ;;  %v8971_v0 = vld [vmem:[%s9267_s27 + $0xdd0] sm:$0xff]  }
 0x19b   : > { %8157 = vmatprep.subr.bf16.mxu1 %v8927_v6  ;;  %v8972_v1 = vld [vmem:[%s9267_s27 + $0xd90] sm:$0xff]   ;;  %v8977_v6 = vld [vmem:[%s9267_s27 + $0xd60] sm:$0xff]  }
 0x19c   : > { %6228 = vmatmul.mubr.bf16.vlgmr.msra.gmra.mrb[44].mxu0 %v6973_v62  ;;  %v8969_v62 = vld [vmem:[%s9267_s27 + $0xd50] sm:$0xff]  }
 0x19d   : > { %8136 = vmatpush3.bf16.msra.mxu0 %v8926_v5  ;;  %6268 = vmatmul.mubr.bf16.vlgmr.msra.gmra.mrb[44].mxu1 %v6975_v3  ;;  %v8974_v3 = vld [vmem:[%s9267_s27 + $0xd18] sm:$0xff]  }
 0x19e   : > { %8158 = vmatpush3.bf16.msra.mxu1 %v8928_v7  ;;  %8137 = vmatprep.subr.bf16.mxu0 %v8929_v8  ;;  %v8976_v5 = vld [vmem:[%s9267_s27 + $0xd98] sm:$0xff]   ;;  %v8978_v8 = vld [vmem:[%s9267_s27 + $0xd20] sm:$0xff]  }
 0x19f   : > { %8159 = vmatprep.subr.bf16.mxu1 %v8931_v10  ;;  %6307 = vmatprep.mubr.bf16.mxu0 %v6978_v49  ;;  %v8979_v10 = vld [vmem:[%s9267_s27 + $0xde0] sm:$0xff]   ;;  %v9006_v49 = vld [vmem:[%s9267_s27 + $0xe10] sm:$0xff]  }
 0x1a0   : > { %6347 = vmatprep.mubr.bf16.mxu1 %v6980_v54  ;;  %v9011_v54 = vld [vmem:[%s9267_s27 + $0xed8] sm:$0xff]  }
 0x1a1   : > { %8138 = vmatpush3.bf16.msra.mxu0 %v8930_v9 }
 0x1a2   : > { %8160 = vmatpush3.bf16.msra.mxu1 %v8932_v11  ;;  %8139 = vmatprep.subr.bf16.mxu0 %v8933_v12 }
 0x1a3   : > { %8161 = vmatprep.subr.bf16.mxu1 %v8935_v14 }
 0x1a5   : > { %8140 = vmatpush3.bf16.msra.mxu0 %v8934_v13  ;;  %v8980_v13 = vld [vmem:[%s9267_s27 + $0xda0] sm:$0xff]  }
 0x1a6   : > { %8162 = vmatpush3.bf16.msra.mxu1 %v8936_v15  ;;  %8141 = vmatprep.subr.bf16.mxu0 %v8937_v16  ;;  %v8981_v16 = vld [vmem:[%s9267_s27 + $0xd68] sm:$0xff]  }
 0x1a7   : > { %8163 = vmatprep.subr.bf16.mxu1 %v8939_v18  ;;  %v8982_v18 = vld [vmem:[%s9267_s27 + $0xd28] sm:$0xff]  }
 0x1a9   : > { %8142 = vmatpush3.bf16.msra.mxu0 %v8938_v17 }
 0x1aa   : > { %8164 = vmatpush3.bf16.msra.mxu1 %v8940_v19  ;;  %8143 = vmatprep.subr.bf16.mxu0 %v8941_v20 }
 0x1ab   : > { %8165 = vmatprep.subr.bf16.mxu1 %v8943_v24 }
 0x1ad   : > { %8144 = vmatpush3.bf16.msra.mxu0 %v8942_v22 }
 0x1ae   : > { %8166 = vmatpush3.bf16.msra.mxu1 %v8944_v27  ;;  %8145 = vmatprep.subr.bf16.mxu0 %v8945_v30  ;;  %v8986_v27 = vld [vmem:[%s9267_s27 + $0xd30] sm:$0xff]   ;;  %v8989_v30 = vld [vmem:[%s9267_s27 + $0xd78] sm:$0xff]  }
 0x1af   : > { %v7843_v21 = vpop.f32.mrb[20].mxu0  ;;  %8167 = vmatprep.subr.bf16.mxu1 %v8947_v35 }
 0x1b0   : > { %v7844_v23 = vpop.f32.mrb[21].mxu0  ;;  %v7865_v28 = vpop.f32.mrb[20].mxu1 }
 0x1b1   : > { %v7845_v25 = vadd.f32 %v7844_v23, %v7843_v21  ;;  %v7846_v26 = vpop.f32.mrb[22].mxu0  ;;  %v7866_v33 = vpop.f32.mrb[21].mxu1  ;;  %8146 = vmatpush3.bf16.msra.mxu0 %v8946_v32  ;;  %v8983_v21 = vld [vmem:[%s9267_s27 + $0xde8] sm:$0xff]   ;;  %v8991_v32 = vld [vmem:[%s9267_s27 + $0xdf8] sm:$0xff]  }
 0x1b2   : > { %v7847_v31 = vpop.f32.mrb[23].mxu0  ;;  %v7867_v34 = vadd.f32 %v7866_v33, %v7865_v28  ;;  %v7868_v36 = vpop.f32.mrb[22].mxu1  ;;  %8168 = vmatpush3.bf16.msra.mxu1 %v8948_v37  ;;  %8147 = vmatprep.subr.bf16.mxu0 %v8949_v40  ;;  %v8984_v23 = vld [vmem:[%s9267_s27 + $0xda8] sm:$0xff]   ;;  %v8985_v26 = vld [vmem:[%s9267_s27 + $0xd70] sm:$0xff]   ;;  %v8995_v37 = vld [vmem:[%s9267_s27 + $0xe40] sm:$0xff]  }
 0x1b3   : > { %v5750_v29 = vadd.f32 %v7845_v25, %v9685_v53  ;;  %v7869_v38 = vpop.f32.mrb[23].mxu1  ;;  %8169 = vmatprep.subr.bf16.mxu1 %v8951_v42  ;;  %v6979_v53 = vcombine.low %v239_v52, %v239_v52  ;;  %v8987_v28 = vld [vmem:[%s9267_s27 + $0xdf0] sm:$0xff]   ;;  %v8990_v31 = vld [vmem:[%s9267_s27 + $0xd38] sm:$0xff]   ;;  %v8999_v42 = vld [vmem:[%s9267_s27 + $0xec0] sm:$0xff]  }
 0x1b4   : > { %v240_v33 = vld [vmem:[%s9262_s23 + $0xd0] sm:$0xff]  ;;  %v8994_v36 = vld [vmem:[%s9267_s27 + $0xdb8] sm:$0xff]  }
 0x1b5   : > { %v9722_v39 = vadd.f32 %v7867_v34, %v5750_v29  ;;  %8148 = vmatpush3.bf16.msra.mxu0 %v8950_v41  ;;  %v8988_v29 = vld [vmem:[%s9267_s27 + $0xdb0] sm:$0xff]   ;;  %v6981_v34 = vcombine.low %v240_v33, %v240_v33  ;;  %v6982_v35 = vcombine.high %v240_v33, %v240_v33  ;;  %v241_v38 = vld [vmem:[%s9262_s23 + $0xd8] sm:$0xff]  ;;  %v8998_v41 = vld [vmem:[%s9267_s27 + $0xe00] sm:$0xff]  }
 0x1b6   : > { %8170 = vmatpush3.bf16.msra.mxu1 %v8952_v43  ;;  %8149 = vmatprep.subr.bf16.mxu0 %v8953_v44  ;;  %v6984_v40 = vcombine.high %v241_v38, %v241_v38  ;;  %v9000_v43 = vld [vmem:[%s9267_s27 + $0xe80] sm:$0xff]   ;;  %v9001_v44 = vld [vmem:[%s9267_s27 + $0xe48] sm:$0xff]   ;;  %v9009_v52 = vld [vmem:[%s9267_s27 + $0xe58] sm:$0xff]  }
 0x1b7   : > { %8171 = vmatprep.subr.bf16.mxu1 %v8955_v46  ;;  %v9003_v46 = vld [vmem:[%s9267_s27 + $0xec8] sm:$0xff]  }
 0x1b8   : > { %v9040_v33 = vld [vmem:[%s9267_s27 + $0xf88] sm:$0xff]  }
 0x1b9   : > { %8150 = vmatpush3.bf16.msra.mxu0 %v8954_v45  ;;  %v9002_v45 = vld [vmem:[%s9267_s27 + $0xe08] sm:$0xff]  }
 0x1ba   : > { %8172 = vmatpush3.bf16.msra.mxu1 %v8958_v50  ;;  %8179 = vmatprep.subr.bf16.mxu0 %v8959_v51  ;;  %v9007_v50 = vld [vmem:[%s9267_s27 + $0xed0] sm:$0xff]  }
 0x1bb   : > { %8201 = vmatprep.subr.bf16.mxu1 %v8963_v56  ;;  %v9008_v51 = vld [vmem:[%s9267_s27 + $0xe90] sm:$0xff]   ;;  %v9013_v56 = vld [vmem:[%s9267_s27 + $0xe60] sm:$0xff]  }
 0x1bc   : > { %6308 = vmatmul.mubr.bf16.vlgmr.msra.gmra.mrb[48].mxu0 %v6977_v48  ;;  %v9005_v48 = vld [vmem:[%s9267_s27 + $0xe50] sm:$0xff]  }
 0x1bd   : > { %8180 = vmatpush3.bf16.msra.mxu0 %v8962_v55  ;;  %6348 = vmatmul.mubr.bf16.vlgmr.msra.gmra.mrb[48].mxu1 %v6979_v53  ;;  %v9010_v53 = vld [vmem:[%s9267_s27 + $0xe18] sm:$0xff]  }
 0x1be   : > { %8202 = vmatpush3.bf16.msra.mxu1 %v8964_v57  ;;  %8181 = vmatprep.subr.bf16.mxu0 %v8965_v58  ;;  %v9012_v55 = vld [vmem:[%s9267_s27 + $0xe98] sm:$0xff]   ;;  %v9014_v57 = vld [vmem:[%s9267_s27 + $0xe20] sm:$0xff]  }
 0x1bf   : > { %8203 = vmatprep.subr.bf16.mxu1 %v8967_v60  ;;  %6387 = vmatprep.mubr.bf16.mxu0 %v6982_v35  ;;  %v9042_v35 = vld [vmem:[%s9267_s27 + $0xf10] sm:$0xff]  }
 0x1c0   : > { %6427 = vmatprep.mubr.bf16.mxu1 %v6984_v40  ;;  %v9047_v40 = vld [vmem:[%s9267_s27 + $0xfd8] sm:$0xff]  }
 0x1c1   : > { %8182 = vmatpush3.bf16.msra.mxu0 %v8966_v59  ;;  %v9015_v59 = vld [vmem:[%s9267_s27 + $0xee0] sm:$0xff]  }
 0x1c2   : > { %8204 = vmatpush3.bf16.msra.mxu1 %v8968_v61  ;;  %8183 = vmatprep.subr.bf16.mxu0 %v8969_v62  ;;  %v9016_v61 = vld [vmem:[%s9267_s27 + $0xea0] sm:$0xff]  }
 0x1c3   : > { %8205 = vmatprep.subr.bf16.mxu1 %v8971_v0  ;;  %v9017_v0 = vld [vmem:[%s9267_s27 + $0xe68] sm:$0xff]  }
 0x1c5   : > { %8184 = vmatpush3.bf16.msra.mxu0 %v8970_v63 }
 0x1c6   : > { %8206 = vmatpush3.bf16.msra.mxu1 %v8972_v1  ;;  %8185 = vmatprep.subr.bf16.mxu0 %v8973_v2 }
 0x1c7   : > { %8207 = vmatprep.subr.bf16.mxu1 %v8975_v4 }
 0x1c9   : > { %8186 = vmatpush3.bf16.msra.mxu0 %v8974_v3  ;;  %v9018_v3 = vld [vmem:[%s9267_s27 + $0xe28] sm:$0xff]  }
 0x1ca   : > { %8208 = vmatpush3.bf16.msra.mxu1 %v8976_v5  ;;  %8187 = vmatprep.subr.bf16.mxu0 %v8977_v6  ;;  %v9019_v6 = vld [vmem:[%s9267_s27 + $0xee8] sm:$0xff]  }
 0x1cb   : > { %8209 = vmatprep.subr.bf16.mxu1 %v8979_v10  ;;  %v9021_v10 = vld [vmem:[%s9267_s27 + $0xe70] sm:$0xff]  }
 0x1cd   : > { %8188 = vmatpush3.bf16.msra.mxu0 %v8978_v8  ;;  %v9020_v8 = vld [vmem:[%s9267_s27 + $0xea8] sm:$0xff]  }
 0x1ce   : > { %8210 = vmatpush3.bf16.msra.mxu1 %v8980_v13  ;;  %8189 = vmatprep.subr.bf16.mxu0 %v8981_v16  ;;  %v9022_v13 = vld [vmem:[%s9267_s27 + $0xe30] sm:$0xff]   ;;  %v9025_v16 = vld [vmem:[%s9267_s27 + $0xe78] sm:$0xff]  }
 0x1cf   : > { %v7887_v7 = vpop.f32.mrb[24].mxu0  ;;  %8211 = vmatprep.subr.bf16.mxu1 %v8983_v21 }
 0x1d0   : > { %v7888_v9 = vpop.f32.mrb[25].mxu0  ;;  %v7909_v14 = vpop.f32.mrb[24].mxu1 }
 0x1d1   : > { %v7889_v11 = vadd.f32 %v7888_v9, %v7887_v7  ;;  %v7890_v12 = vpop.f32.mrb[26].mxu0  ;;  %v7910_v19 = vpop.f32.mrb[25].mxu1  ;;  %8190 = vmatpush3.bf16.msra.mxu0 %v8982_v18  ;;  %v9027_v18 = vld [vmem:[%s9267_s27 + $0xef8] sm:$0xff]  }
 0x1d2   : > { %v7891_v17 = vpop.f32.mrb[27].mxu0  ;;  %v7911_v20 = vadd.f32 %v7910_v19, %v7909_v14  ;;  %v7912_v22 = vpop.f32.mrb[26].mxu1  ;;  %8212 = vmatpush3.bf16.msra.mxu1 %v8984_v23  ;;  %8191 = vmatprep.subr.bf16.mxu0 %v8985_v26  ;;  %v9023_v14 = vld [vmem:[%s9267_s27 + $0xef0] sm:$0xff]   ;;  %v242_v19 = vld [vmem:[%s9262_s23 + $0xe0] sm:$0xff] }
 0x1d3   : > { %v5830_v15 = vadd.f32 %v7889_v11, %v9722_v39  ;;  %v7913_v24 = vpop.f32.mrb[27].mxu1  ;;  %8213 = vmatprep.subr.bf16.mxu1 %v8987_v28  ;;  %v6983_v39 = vcombine.low %v241_v38, %v241_v38  ;;  %v9026_v17 = vld [vmem:[%s9267_s27 + $0xe38] sm:$0xff]   ;;  %v6986_v21 = vcombine.high %v242_v19, %v242_v19  ;;  %v9031_v23 = vld [vmem:[%s9267_s27 + $0xf40] sm:$0xff]  }
 0x1d4   : > { %v9030_v22 = vld [vmem:[%s9267_s27 + $0xeb8] sm:$0xff]   ;;  %v243_v24 = vld [vmem:[%s9262_s23 + $0xe8] sm:$0xff]  ;;  %v9035_v28 = vld [vmem:[%s9267_s27 + $0xfc0] sm:$0xff]  }
 0x1d5   : > { %v9759_v25 = vadd.f32 %v7911_v20, %v5830_v15  ;;  %8192 = vmatpush3.bf16.msra.mxu0 %v8986_v27  ;;  %v9024_v15 = vld [vmem:[%s9267_s27 + $0xeb0] sm:$0xff]   ;;  %v6985_v20 = vcombine.low %v242_v19, %v242_v19  ;;  %v6988_v26 = vcombine.high %v243_v24, %v243_v24  ;;  %v9034_v27 = vld [vmem:[%s9267_s27 + $0xf00] sm:$0xff]   ;;  %v9045_v38 = vld [vmem:[%s9267_s27 + $0xf58] sm:$0xff]  }
 0x1d6   : > { %8214 = vmatpush3.bf16.msra.mxu1 %v8988_v29  ;;  %8193 = vmatprep.subr.bf16.mxu0 %v8989_v30  ;;  %v9036_v29 = vld [vmem:[%s9267_s27 + $0xf80] sm:$0xff]   ;;  %v9037_v30 = vld [vmem:[%s9267_s27 + $0xf48] sm:$0xff]  }
 0x1d7   : > { %8215 = vmatprep.subr.bf16.mxu1 %v8991_v32  ;;  %v9039_v32 = vld [vmem:[%s9267_s27 + $0xfc8] sm:$0xff]  }
 0x1d8   : > { %v9076_v19 = vld [vmem:[%s9267_s27 + $0x1088] sm:$0xff]  }
 0x1d9   : > { %8194 = vmatpush3.bf16.msra.mxu0 %v8990_v31  ;;  %v9038_v31 = vld [vmem:[%s9267_s27 + $0xf08] sm:$0xff]  }
 0x1da   : > { %8216 = vmatpush3.bf16.msra.mxu1 %v8994_v36  ;;  %8223 = vmatprep.subr.bf16.mxu0 %v8995_v37  ;;  %v9043_v36 = vld [vmem:[%s9267_s27 + $0xfd0] sm:$0xff]  }
 0x1db   : > { %8245 = vmatprep.subr.bf16.mxu1 %v8999_v42  ;;  %v9044_v37 = vld [vmem:[%s9267_s27 + $0xf90] sm:$0xff]   ;;  %v9049_v42 = vld [vmem:[%s9267_s27 + $0xf60] sm:$0xff]  }
 0x1dc   : > { %6388 = vmatmul.mubr.bf16.vlgmr.msra.gmra.mrb[52].mxu0 %v6981_v34  ;;  %v9041_v34 = vld [vmem:[%s9267_s27 + $0xf50] sm:$0xff]  }
 0x1dd   : > { %8224 = vmatpush3.bf16.msra.mxu0 %v8998_v41  ;;  %6428 = vmatmul.mubr.bf16.vlgmr.msra.gmra.mrb[52].mxu1 %v6983_v39  ;;  %v9046_v39 = vld [vmem:[%s9267_s27 + $0xf18] sm:$0xff]  }
 0x1de   : > { %8246 = vmatpush3.bf16.msra.mxu1 %v9000_v43  ;;  %8225 = vmatprep.subr.bf16.mxu0 %v9001_v44  ;;  %v9048_v41 = vld [vmem:[%s9267_s27 + $0xf98] sm:$0xff]   ;;  %v9050_v43 = vld [vmem:[%s9267_s27 + $0xf20] sm:$0xff]  }
 0x1df   : > { %8247 = vmatprep.subr.bf16.mxu1 %v9003_v46  ;;  %6467 = vmatprep.mubr.bf16.mxu0 %v6986_v21  ;;  %v9078_v21 = vld [vmem:[%s9267_s27 + $0x1010] sm:$0xff]  }
 0x1e0   : > { %6507 = vmatprep.mubr.bf16.mxu1 %v6988_v26  ;;  %v9083_v26 = vld [vmem:[%s9267_s27 + $0x10d8] sm:$0xff]  }
 0x1e1   : > { %8226 = vmatpush3.bf16.msra.mxu0 %v9002_v45  ;;  %v9051_v45 = vld [vmem:[%s9267_s27 + $0xfe0] sm:$0xff]  }
 0x1e2   : > { %8248 = vmatpush3.bf16.msra.mxu1 %v9004_v47  ;;  %8227 = vmatprep.subr.bf16.mxu0 %v9005_v48  ;;  %v9052_v47 = vld [vmem:[%s9267_s27 + $0xfa0] sm:$0xff]  }
 0x1e3   : > { %8249 = vmatprep.subr.bf16.mxu1 %v9007_v50  ;;  %v9053_v50 = vld [vmem:[%s9267_s27 + $0xf68] sm:$0xff]  }
 0x1e5   : > { %8228 = vmatpush3.bf16.msra.mxu0 %v9006_v49 }
 0x1e6   : > { %8250 = vmatpush3.bf16.msra.mxu1 %v9008_v51  ;;  %8229 = vmatprep.subr.bf16.mxu0 %v9009_v52 }
 0x1e7   : > { %8251 = vmatprep.subr.bf16.mxu1 %v9011_v54 }
 0x1e9   : > { %8230 = vmatpush3.bf16.msra.mxu0 %v9010_v53  ;;  %v9054_v53 = vld [vmem:[%s9267_s27 + $0xf28] sm:$0xff]  }
 0x1ea   : > { %8252 = vmatpush3.bf16.msra.mxu1 %v9012_v55  ;;  %8231 = vmatprep.subr.bf16.mxu0 %v9013_v56  ;;  %v9055_v56 = vld [vmem:[%s9267_s27 + $0xfe8] sm:$0xff]  }
 0x1eb   : > { %8253 = vmatprep.subr.bf16.mxu1 %v9015_v59 }
 0x1ed   : > { %8232 = vmatpush3.bf16.msra.mxu0 %v9014_v57 }
 0x1ee   : > { %8254 = vmatpush3.bf16.msra.mxu1 %v9016_v61  ;;  %8233 = vmatprep.subr.bf16.mxu0 %v9017_v0  ;;  %v9057_v61 = vld [vmem:[%s9267_s27 + $0xf70] sm:$0xff]  }
 0x1ef   : > { %v7931_v58 = vpop.f32.mrb[28].mxu0  ;;  %8255 = vmatprep.subr.bf16.mxu1 %v9019_v6  ;;  %v9059_v0 = vld [vmem:[%s9267_s27 + $0xff0] sm:$0xff]  }
 0x1f0   : > { %v7932_v60 = vpop.f32.mrb[29].mxu0  ;;  %v7953_v1 = vpop.f32.mrb[28].mxu1 }
 0x1f1   : > { %v7933_v62 = vadd.f32 %v7932_v60, %v7931_v58  ;;  %v7934_v63 = vpop.f32.mrb[30].mxu0  ;;  %v7954_v5 = vpop.f32.mrb[29].mxu1  ;;  %8234 = vmatpush3.bf16.msra.mxu0 %v9018_v3  ;;  %v9056_v58 = vld [vmem:[%s9267_s27 + $0xfa8] sm:$0xff]   ;;  %v9062_v3 = vld [vmem:[%s9267_s27 + $0xf38] sm:$0xff]  }
 0x1f2   : > { %v7935_v4 = vpop.f32.mrb[31].mxu0  ;;  %v7955_v7 = vadd.f32 %v7954_v5, %v7953_v1  ;;  %v7956_v9 = vpop.f32.mrb[30].mxu1  ;;  %8256 = vmatpush3.bf16.msra.mxu1 %v9020_v8  ;;  %8235 = vmatprep.subr.bf16.mxu0 %v9021_v10  ;;  %v9058_v63 = vld [vmem:[%s9267_s27 + $0xf30] sm:$0xff]   ;;  %v9066_v8 = vld [vmem:[%s9267_s27 + $0xfb8] sm:$0xff]  }
 0x1f3   : > { %v5910_v2 = vadd.f32 %v7933_v62, %v9759_v25  ;;  %v7957_v11 = vpop.f32.mrb[31].mxu1  ;;  %8257 = vmatprep.subr.bf16.mxu1 %v9023_v14  ;;  %v6987_v25 = vcombine.low %v243_v24, %v243_v24  ;;  %v9060_v1 = vld [vmem:[%s9267_s27 + $0xfb0] sm:$0xff]   ;;  %v9063_v4 = vld [vmem:[%s9267_s27 + $0xff8] sm:$0xff]   ;;  %v9067_v9 = vld [vmem:[%s9267_s27 + $0x1040] sm:$0xff]  }
 0x1f4   : > { %v244_v5 = vld [vmem:[%s9262_s23 + $0xf0] sm:$0xff]  ;;  %v245_v10 = vld [vmem:[%s9262_s23 + $0xf8] sm:$0xff]  ;;  %v9071_v14 = vld [vmem:[%s9267_s27 + $0x10c0] sm:$0xff]  }
 0x1f5   : > { %v9797_v12 = vadd.f32 %v7955_v7, %v5910_v2  ;;  %8236 = vmatpush3.bf16.msra.mxu0 %v9022_v13  ;;  %v9061_v2 = vld [vmem:[%s9267_s27 + $0xf78] sm:$0xff]   ;;  %v6989_v6 = vcombine.low %v244_v5, %v244_v5  ;;  %v6990_v7 = vcombine.high %v244_v5, %v244_v5  ;;  %v6991_v11 = vcombine.low %v245_v10, %v245_v10  ;;  %v9070_v13 = vld [vmem:[%s9267_s27 + $0x1000] sm:$0xff]   ;;  %v9112_v5 = vld [vmem:[%s9267_s27 + $0x1188] sm:$0xff]  }
 0x1f6   : > { %8258 = vmatpush3.bf16.msra.mxu1 %v9024_v15  ;;  %8237 = vmatprep.subr.bf16.mxu0 %v9025_v16  ;;  %v9072_v15 = vld [vmem:[%s9267_s27 + $0x1080] sm:$0xff]   ;;  %v9073_v16 = vld [vmem:[%s9267_s27 + $0x1048] sm:$0xff]   ;;  %v9081_v24 = vld [vmem:[%s9267_s27 + $0x1058] sm:$0xff]  }
 0x1f7   : > { %8259 = vmatprep.subr.bf16.mxu1 %v9027_v18  ;;  %v9075_v18 = vld [vmem:[%s9267_s27 + $0x10c8] sm:$0xff]  }
 0x1f9   : > { %8238 = vmatpush3.bf16.msra.mxu0 %v9026_v17  ;;  %v9074_v17 = vld [vmem:[%s9267_s27 + $0x1008] sm:$0xff]  }
 0x1fa   : > { %8260 = vmatpush3.bf16.msra.mxu1 %v9030_v22  ;;  %8267 = vmatprep.subr.bf16.mxu0 %v9031_v23  ;;  %v9079_v22 = vld [vmem:[%s9267_s27 + $0x10d0] sm:$0xff]  }
 0x1fb   : > { %8289 = vmatprep.subr.bf16.mxu1 %v9035_v28  ;;  %v9080_v23 = vld [vmem:[%s9267_s27 + $0x1090] sm:$0xff]   ;;  %v9085_v28 = vld [vmem:[%s9267_s27 + $0x1060] sm:$0xff]  }
 0x1fc   : > { %6468 = vmatmul.mubr.bf16.vlgmr.msra.gmra.mrb[56].mxu0 %v6985_v20  ;;  %v9077_v20 = vld [vmem:[%s9267_s27 + $0x1050] sm:$0xff]  }
 0x1fd   : > { %8268 = vmatpush3.bf16.msra.mxu0 %v9034_v27  ;;  %6508 = vmatmul.mubr.bf16.vlgmr.msra.gmra.mrb[56].mxu1 %v6987_v25  ;;  %v9082_v25 = vld [vmem:[%s9267_s27 + $0x1018] sm:$0xff]  }
 0x1fe   : > { %8290 = vmatpush3.bf16.msra.mxu1 %v9036_v29  ;;  %8269 = vmatprep.subr.bf16.mxu0 %v9037_v30  ;;  %v9084_v27 = vld [vmem:[%s9267_s27 + $0x1098] sm:$0xff]   ;;  %v9086_v30 = vld [vmem:[%s9267_s27 + $0x1020] sm:$0xff]  }
 0x1ff   : > { %8291 = vmatprep.subr.bf16.mxu1 %v9039_v32  ;;  %6547 = vmatprep.mubr.bf16.mxu0 %v6990_v7  ;;  %v9087_v32 = vld [vmem:[%s9267_s27 + $0x10e0] sm:$0xff]   ;;  %v9114_v7 = vld [vmem:[%s9267_s27 + $0x1110] sm:$0xff]  }
 0x201   : > { %8270 = vmatpush3.bf16.msra.mxu0 %v9038_v31 }
 0x202   : > { %8292 = vmatpush3.bf16.msra.mxu1 %v9040_v33  ;;  %8271 = vmatprep.subr.bf16.mxu0 %v9041_v34 }
 0x203   : > { %8293 = vmatprep.subr.bf16.mxu1 %v9043_v36 }
 0x205   : > { %8272 = vmatpush3.bf16.msra.mxu0 %v9042_v35  ;;  %v9088_v35 = vld [vmem:[%s9267_s27 + $0x10a0] sm:$0xff]  }
 0x206   : > { %8294 = vmatpush3.bf16.msra.mxu1 %v9044_v37  ;;  %8273 = vmatprep.subr.bf16.mxu0 %v9045_v38  ;;  %v9089_v38 = vld [vmem:[%s9267_s27 + $0x1068] sm:$0xff]  }
 0x207   : > { %8295 = vmatprep.subr.bf16.mxu1 %v9047_v40  ;;  %v9090_v40 = vld [vmem:[%s9267_s27 + $0x1028] sm:$0xff]  }
 0x209   : > { %8274 = vmatpush3.bf16.msra.mxu0 %v9046_v39 }
 0x20a   : > { %8296 = vmatpush3.bf16.msra.mxu1 %v9048_v41  ;;  %8275 = vmatprep.subr.bf16.mxu0 %v9049_v42 }
 0x20b   : > { %8297 = vmatprep.subr.bf16.mxu1 %v9051_v45  ;;  %v9092_v45 = vld [vmem:[%s9267_s27 + $0x10a8] sm:$0xff]  }
 0x20d   : > { %8276 = vmatpush3.bf16.msra.mxu0 %v9050_v43  ;;  %v9091_v43 = vld [vmem:[%s9267_s27 + $0x10e8] sm:$0xff]  }
 0x20e   : > { %8298 = vmatpush3.bf16.msra.mxu1 %v9052_v47  ;;  %8277 = vmatprep.subr.bf16.mxu0 %v9053_v50  ;;  %v9095_v50 = vld [vmem:[%s9267_s27 + $0x10f0] sm:$0xff]  }
 0x20f   : > { %v7975_v44 = vpop.f32.mrb[32].mxu0  ;;  %8299 = vmatprep.subr.bf16.mxu1 %v9055_v56 }
 0x210   : > { %v7976_v46 = vpop.f32.mrb[33].mxu0  ;;  %v7997_v51 = vpop.f32.mrb[32].mxu1 }
 0x211   : > { %v7977_v48 = vadd.f32 %v7976_v46, %v7975_v44  ;;  %v7978_v49 = vpop.f32.mrb[34].mxu0  ;;  %v7998_v55 = vpop.f32.mrb[33].mxu1  ;;  %8278 = vmatpush3.bf16.msra.mxu0 %v9054_v53  ;;  %v9098_v53 = vld [vmem:[%s9267_s27 + $0x1038] sm:$0xff]  }
 0x212   : > { %v7979_v54 = vpop.f32.mrb[35].mxu0  ;;  %v7999_v57 = vadd.f32 %v7998_v55, %v7997_v51  ;;  %v8000_v59 = vpop.f32.mrb[34].mxu1  ;;  %8300 = vmatpush3.bf16.msra.mxu1 %v9056_v58  ;;  %8279 = vmatprep.subr.bf16.mxu0 %v9057_v61  ;;  %v9094_v49 = vld [vmem:[%s9267_s27 + $0x1030] sm:$0xff]   ;;  %v246_v55 = vld [vmem:[%s9262_s23 + $0x100] sm:$0xff]  ;;  %v9102_v58 = vld [vmem:[%s9267_s27 + $0x10b8] sm:$0xff]  }
 0x213   : > { %v5990_v52 = vadd.f32 %v7977_v48, %v9797_v12  ;;  %v8001_v62 = vpop.f32.mrb[35].mxu1  ;;  %8301 = vmatprep.subr.bf16.mxu1 %v9059_v0  ;;  %v6992_v12 = vcombine.high %v245_v10, %v245_v10  ;;  %v9093_v48 = vld [vmem:[%s9267_s27 + $0x1070] sm:$0xff]   ;;  %v9099_v54 = vld [vmem:[%s9267_s27 + $0x10f8] sm:$0xff]   ;;  %v6993_v56 = vcombine.low %v246_v55, %v246_v55  ;;  %v9103_v59 = vld [vmem:[%s9267_s27 + $0x1140] sm:$0xff]  }
 0x214   : > { %v9096_v51 = vld [vmem:[%s9267_s27 + $0x10b0] sm:$0xff]   ;;  %v9107_v0 = vld [vmem:[%s9267_s27 + $0x11c0] sm:$0xff]   ;;  %v9117_v10 = vld [vmem:[%s9267_s27 + $0x1158] sm:$0xff]  }
 0x215   : > { %v9833_v60 = vadd.f32 %v7999_v57, %v5990_v52  ;;  %8280 = vmatpush3.bf16.msra.mxu0 %v9058_v63  ;;  %6587 = vmatprep.mubr.bf16.mxu1 %v6992_v12  ;;  %v9097_v52 = vld [vmem:[%s9267_s27 + $0x1078] sm:$0xff]   ;;  %v6994_v57 = vcombine.high %v246_v55, %v246_v55  ;;  %v9106_v63 = vld [vmem:[%s9267_s27 + $0x1100] sm:$0xff]   ;;  %v9147_v55 = vld [vmem:[%s9267_s27 + $0x1250] sm:$0xff]  }
 0x216   : > { %8302 = vmatpush3.bf16.msra.mxu1 %v9060_v1  ;;  %8281 = vmatprep.subr.bf16.mxu0 %v9061_v2  ;;  %v9108_v1 = vld [vmem:[%s9267_s27 + $0x1180] sm:$0xff]   ;;  %v9109_v2 = vld [vmem:[%s9267_s27 + $0x1148] sm:$0xff]   ;;  %v9119_v12 = vld [vmem:[%s9267_s27 + $0x11d8] sm:$0xff]  }
 0x217   : > { %8303 = vmatprep.subr.bf16.mxu1 %v9063_v4  ;;  %v9111_v4 = vld [vmem:[%s9267_s27 + $0x11c8] sm:$0xff]  }
 0x219   : > { %8282 = vmatpush3.bf16.msra.mxu0 %v9062_v3  ;;  %v9110_v3 = vld [vmem:[%s9267_s27 + $0x1108] sm:$0xff]  }
 0x21a   : > { %8304 = vmatpush3.bf16.msra.mxu1 %v9066_v8  ;;  %8311 = vmatprep.subr.bf16.mxu0 %v9067_v9  ;;  %v9115_v8 = vld [vmem:[%s9267_s27 + $0x11d0] sm:$0xff]  }
 0x21b   : > { %8333 = vmatprep.subr.bf16.mxu1 %v9071_v14  ;;  %v9116_v9 = vld [vmem:[%s9267_s27 + $0x1190] sm:$0xff]   ;;  %v9121_v14 = vld [vmem:[%s9267_s27 + $0x1160] sm:$0xff]  }
 0x21c   : > { %6548 = vmatmul.mubr.bf16.vlgmr.msra.gmra.mrb[60].mxu0 %v6989_v6  ;;  %v9113_v6 = vld [vmem:[%s9267_s27 + $0x1150] sm:$0xff]  }
 0x21d   : > { %8312 = vmatpush3.bf16.msra.mxu0 %v9070_v13  ;;  %6588 = vmatmul.mubr.bf16.vlgmr.msra.gmra.mrb[60].mxu1 %v6991_v11  ;;  %v9118_v11 = vld [vmem:[%s9267_s27 + $0x1118] sm:$0xff]  }
 0x21e   : > { %8334 = vmatpush3.bf16.msra.mxu1 %v9072_v15  ;;  %8313 = vmatprep.subr.bf16.mxu0 %v9073_v16  ;;  %v9120_v13 = vld [vmem:[%s9267_s27 + $0x1198] sm:$0xff]   ;;  %v9122_v15 = vld [vmem:[%s9267_s27 + $0x1120] sm:$0xff]  }
 0x21f   : > { %8335 = vmatprep.subr.bf16.mxu1 %v9075_v18  ;;  %6627 = vmatprep.mubr.bf16.mxu0 %v6994_v57  ;;  %v9149_v57 = vld [vmem:[%s9267_s27 + $0x1290] sm:$0xff]  }
 0x221   : > { %8314 = vmatpush3.bf16.msra.mxu0 %v9074_v17  ;;  %v9123_v17 = vld [vmem:[%s9267_s27 + $0x11e0] sm:$0xff]  }
 0x222   : > { %8336 = vmatpush3.bf16.msra.mxu1 %v9076_v19  ;;  %8315 = vmatprep.subr.bf16.mxu0 %v9077_v20  ;;  %v9124_v19 = vld [vmem:[%s9267_s27 + $0x11a0] sm:$0xff]  }
 0x223   : > { %8337 = vmatprep.subr.bf16.mxu1 %v9079_v22  ;;  %v9125_v22 = vld [vmem:[%s9267_s27 + $0x1168] sm:$0xff]  }
 0x225   : > { %8316 = vmatpush3.bf16.msra.mxu0 %v9078_v21 }
 0x226   : > { %8338 = vmatpush3.bf16.msra.mxu1 %v9080_v23  ;;  %8317 = vmatprep.subr.bf16.mxu0 %v9081_v24 }
 0x227   : > { %8339 = vmatprep.subr.bf16.mxu1 %v9083_v26 }
 0x229   : > { %8318 = vmatpush3.bf16.msra.mxu0 %v9082_v25  ;;  %v9126_v25 = vld [vmem:[%s9267_s27 + $0x1128] sm:$0xff]  }
 0x22a   : > { %8340 = vmatpush3.bf16.msra.mxu1 %v9084_v27  ;;  %8319 = vmatprep.subr.bf16.mxu0 %v9085_v28  ;;  %v9127_v28 = vld [vmem:[%s9267_s27 + $0x11e8] sm:$0xff]  }
 0x22b   : > { %8341 = vmatprep.subr.bf16.mxu1 %v9087_v32  ;;  %v9129_v32 = vld [vmem:[%s9267_s27 + $0x1170] sm:$0xff]  }
 0x22d   : > { %8320 = vmatpush3.bf16.msra.mxu0 %v9086_v30  ;;  %v9128_v30 = vld [vmem:[%s9267_s27 + $0x11a8] sm:$0xff]  }
 0x22e   : > { %8342 = vmatpush3.bf16.msra.mxu1 %v9088_v35  ;;  %8321 = vmatprep.subr.bf16.mxu0 %v9089_v38  ;;  %v9130_v35 = vld [vmem:[%s9267_s27 + $0x1130] sm:$0xff]   ;;  %v9133_v38 = vld [vmem:[%s9267_s27 + $0x1178] sm:$0xff]  }
 0x22f   : > { %v8019_v29 = vpop.f32.mrb[36].mxu0  ;;  %8343 = vmatprep.subr.bf16.mxu1 %v9091_v43 }
 0x230   : > { %v8020_v31 = vpop.f32.mrb[37].mxu0  ;;  %v8041_v36 = vpop.f32.mrb[36].mxu1 }
 0x231   : > { %v8021_v33 = vadd.f32 %v8020_v31, %v8019_v29  ;;  %v8022_v34 = vpop.f32.mrb[38].mxu0  ;;  %v8042_v41 = vpop.f32.mrb[37].mxu1  ;;  %8322 = vmatpush3.bf16.msra.mxu0 %v9090_v40  ;;  %v9135_v40 = vld [vmem:[%s9267_s27 + $0x11f8] sm:$0xff]  }
 0x232   : > { %v8023_v39 = vpop.f32.mrb[39].mxu0  ;;  %v8043_v42 = vadd.f32 %v8042_v41, %v8041_v36  ;;  %v8044_v44 = vpop.f32.mrb[38].mxu1  ;;  %8344 = vmatpush3.bf16.msra.mxu1 %v9092_v45  ;;  %8323 = vmatprep.subr.bf16.mxu0 %v9093_v48  ;;  %v9131_v36 = vld [vmem:[%s9267_s27 + $0x11f0] sm:$0xff]   ;;  %v9139_v45 = vld [vmem:[%s9267_s27 + $0x1240] sm:$0xff]  }
 0x233   : > { %v6070_v37 = vadd.f32 %v8021_v33, %v9833_v60  ;;  %v8045_v46 = vpop.f32.mrb[39].mxu1  ;;  %8345 = vmatprep.subr.bf16.mxu1 %v9095_v50  ;;  %v247_v60 = vld [vmem:[%s9262_s23 + $0x108] sm:$0xff]  ;;  %v9134_v39 = vld [vmem:[%s9267_s27 + $0x1138] sm:$0xff]   ;;  %v248_v41 = vld [vmem:[%s9262_s23 + $0x110] sm:$0xff] }
 0x234   : > { %v6995_v61 = vcombine.low %v247_v60, %v247_v60  ;;  %v6996_v62 = vcombine.high %v247_v60, %v247_v60  ;;  %v6998_v43 = vcombine.high %v248_v41, %v248_v41  ;;  %v9138_v44 = vld [vmem:[%s9267_s27 + $0x11b8] sm:$0xff]   ;;  %v9143_v50 = vld [vmem:[%s9267_s27 + $0x1280] sm:$0xff]  }
 0x235   : > { %v9870_v47 = vadd.f32 %v8043_v42, %v6070_v37  ;;  %8324 = vmatpush3.bf16.msra.mxu0 %v9094_v49  ;;  %v9132_v37 = vld [vmem:[%s9267_s27 + $0x11b0] sm:$0xff]   ;;  %v6997_v42 = vcombine.low %v248_v41, %v248_v41  ;;  %v249_v46 = vld [vmem:[%s9262_s23 + $0x118] sm:$0xff]  ;;  %v9142_v49 = vld [vmem:[%s9267_s27 + $0x1200] sm:$0xff]  }
 0x236   : > { %8346 = vmatpush3.bf16.msra.mxu1 %v9096_v51  ;;  %8325 = vmatprep.subr.bf16.mxu0 %v9097_v52  ;;  %v7000_v48 = vcombine.high %v249_v46, %v249_v46  ;;  %v9144_v51 = vld [vmem:[%s9267_s27 + $0x1248] sm:$0xff]   ;;  %v9209_v52 = vmov 0.0   ;;  %v9153_v60 = vld [vmem:[%s9267_s27 + $0x1260] sm:$0xff]  }
 0x237   : > { %8347 = vmatprep.subr.bf16.mxu1 %v9099_v54  ;;  %6667 = vmatprep.mubr.bf16.mxu1 %v6996_v62  ;;  %v9146_v54 = vld [vmem:[%s9267_s27 + $0x1288] sm:$0xff]   ;;  %v9154_v62 = vld [vmem:[%s9267_s27 + $0x1220] sm:$0xff]  }
 0x239   : > { %8326 = vmatpush3.bf16.msra.mxu0 %v9098_v53  ;;  %v9145_v53 = vld [vmem:[%s9267_s27 + $0x1208] sm:$0xff]  }
 0x23a   : > { %8348 = vmatpush3.bf16.msra.mxu1 %v9102_v58  ;;  %8355 = vmatprep.subr.bf16.mxu0 %v9103_v59  ;;  %v9150_v58 = vld [vmem:[%s9267_s27 + $0x1258] sm:$0xff]  }
 0x23b   : > { %8377 = vmatprep.subr.bf16.mxu1 %v9107_v0  ;;  %v9151_v59 = vld [vmem:[%s9267_s27 + $0x1218] sm:$0xff]  }
 0x23c   : > { %6628 = vmatmul.mubr.bf16.vlgmr.msra.gmra.mrb[64].mxu0 %v6993_v56  ;;  %v9148_v56 = vld [vmem:[%s9267_s27 + $0x1210] sm:$0xff]  }
 0x23d   : > { %8356 = vmatpush3.bf16.msra.mxu0 %v9106_v63  ;;  %6668 = vmatmul.mubr.bf16.vlgmr.msra.gmra.mrb[64].mxu1 %v6995_v61  ;;  %v9152_v61 = vld [vmem:[%s9267_s27 + $0x1298] sm:$0xff]   ;;  %v9156_v63 = vld [vmem:[%s9267_s27 + $0x1268] sm:$0xff]  }
 0x23e   : > { %8378 = vmatpush3.bf16.msra.mxu1 %v9108_v1  ;;  %8357 = vmatprep.subr.bf16.mxu0 %v9109_v2  ;;  %v9155_v1 = vld [vmem:[%s9267_s27 + $0x12a0] sm:$0xff]  }
 0x23f   : > { %8379 = vmatprep.subr.bf16.mxu1 %v9111_v4  ;;  %6707 = vmatprep.mubr.bf16.mxu0 %v6998_v43 }
 0x240   : > { %6747 = vmatprep.mubr.bf16.mxu1 %v7000_v48 }
 0x241   : > { %8358 = vmatpush3.bf16.msra.mxu0 %v9110_v3 }
 0x242   : > { %8380 = vmatpush3.bf16.msra.mxu1 %v9112_v5  ;;  %8359 = vmatprep.subr.bf16.mxu0 %v9113_v6  ;;  %v9157_v6 = vld [vmem:[%s9267_s27 + $0x1228] sm:$0xff]  }
 0x243   : > { %8381 = vmatprep.subr.bf16.mxu1 %v9115_v8 }
 0x245   : > { %8360 = vmatpush3.bf16.msra.mxu0 %v9114_v7  ;;  %v9159_v7 = vld [vmem:[%s9267_s27 + $0x1270] sm:$0xff]  }
 0x246   : > { %8382 = vmatpush3.bf16.msra.mxu1 %v9116_v9  ;;  %8361 = vmatprep.subr.bf16.mxu0 %v9117_v10 }
 0x247   : > { %8383 = vmatprep.subr.bf16.mxu1 %v9119_v12  ;;  %v9158_v12 = vld [vmem:[%s9267_s27 + $0x12a8] sm:$0xff]  }
 0x249   : > { %8362 = vmatpush3.bf16.msra.mxu0 %v9118_v11 }
 0x24a   : > { %8384 = vmatpush3.bf16.msra.mxu1 %v9120_v13  ;;  %8363 = vmatprep.subr.bf16.mxu0 %v9121_v14 }
 0x24b   : > { %8385 = vmatprep.subr.bf16.mxu1 %v9123_v17  ;;  %v250_v17 = vld [vmem:[%s9262_s23 + $0x120] sm:$0xff] }
 0x24d   : > { %8364 = vmatpush3.bf16.msra.mxu0 %v9122_v15  ;;  %v9160_v15 = vld [vmem:[%s9267_s27 + $0x1230] sm:$0xff]  }
 0x24e   : > { %8386 = vmatpush3.bf16.msra.mxu1 %v9124_v19  ;;  %8365 = vmatprep.subr.bf16.mxu0 %v9125_v22  ;;  %v7002_v19 = vcombine.high %v250_v17, %v250_v17  ;;  %v9166_v22 = vld [vmem:[%s9267_s27 + $0x12b8] sm:$0xff]  }
 0x24f   : > { %v8063_v16 = vpop.f32.mrb[40].mxu0  ;;  %8387 = vmatprep.subr.bf16.mxu1 %v9127_v28 }
 0x250   : > { %v8064_v18 = vpop.f32.mrb[41].mxu0  ;;  %v8085_v23 = vpop.f32.mrb[40].mxu1 }
 0x251   : > { %v8065_v20 = vadd.f32 %v8064_v18, %v8063_v16  ;;  %v8066_v21 = vpop.f32.mrb[42].mxu0  ;;  %v8086_v27 = vpop.f32.mrb[41].mxu1  ;;  %8366 = vmatpush3.bf16.msra.mxu0 %v9126_v25  ;;  %v9162_v18 = vld [vmem:[%s9267_s27 + $0x1278] sm:$0xff]  }
 0x252   : > { %v8067_v26 = vpop.f32.mrb[43].mxu0  ;;  %v8087_v29 = vadd.f32 %v8086_v27, %v8085_v23  ;;  %v8088_v31 = vpop.f32.mrb[42].mxu1  ;;  %8388 = vmatpush3.bf16.msra.mxu1 %v9128_v30  ;;  %8367 = vmatprep.subr.bf16.mxu0 %v9129_v32  ;;  %v9163_v21 = vld [vmem:[%s9267_s27 + $0x1238] sm:$0xff]   ;;  %v7001_v23 = vcombine.low %v250_v17, %v250_v17 }
 0x253   : > { %v6150_v24 = vadd.f32 %v8065_v20, %v9870_v47  ;;  %v8089_v33 = vpop.f32.mrb[43].mxu1  ;;  %8389 = vmatprep.subr.bf16.mxu1 %v9131_v36  ;;  %v6999_v47 = vcombine.low %v249_v46, %v249_v46  ;;  %v9161_v20 = vld [vmem:[%s9267_s27 + $0x12b0] sm:$0xff]  }
 0x255   : > { %v9908_v34 = vadd.f32 %v8087_v29, %v6150_v24  ;;  %8368 = vmatpush3.bf16.msra.mxu0 %v9130_v35  ;;  %v9167_v24 = vld [vmem:[%s9262_s23 + $0x128] ss:$0 sps:$4 sm:$0xff]  }
 0x256   : > { %8390 = vmatpush3.bf16.msra.mxu1 %v9132_v37  ;;  %8369 = vmatprep.subr.bf16.mxu0 %v9133_v38 }
 0x257   : > { %8391 = vmatprep.subr.bf16.mxu1 %v9135_v40 }
 0x259   : > { %8370 = vmatpush3.bf16.msra.mxu0 %v9134_v39 }
 0x25a   : > { %8392 = vmatpush3.bf16.msra.mxu1 %v9138_v44  ;;  %8399 = vmatprep.subr.bf16.mxu0 %v9139_v45 }
 0x25b   : > { %8430 = vmatprep.subr.bf16.mxu1 %v9209_v52 }
 0x25c   : > { %6708 = vmatmul.mubr.bf16.vlgmr.msra.gmra.mrb[68].mxu0 %v6997_v42 }
 0x25d   : > { %8400 = vmatpush3.bf16.msra.mxu0 %v9142_v49  ;;  %6748 = vmatmul.mubr.bf16.vlgmr.msra.gmra.mrb[68].mxu1 %v6999_v47 }
 0x25e   : > { %8431 = vmatpush3.bf16.msra.mxu1 %v9143_v50  ;;  %8401 = vmatprep.subr.bf16.mxu0 %v9144_v51 }
 0x25f   : > { %8432 = vmatprep.subr.bf16.mxu1 %v9209_v52  ;;  %8446 = vmatprep.mubr.msk.bf16.mxu1 %vm9210_vm1, %v9209_v52 }
 0x260   : > { %6787 = vmatprep.mubr.bf16.mxu0 %v7002_v19 }
 0x261   : > { %8402 = vmatpush3.bf16.msra.mxu0 %v9145_v53 }
 0x262   : > { %8403 = vmatprep.subr.bf16.mxu0 %v9147_v55  ;;  %8433 = vmatpush3.bf16.msra.mxu1 %v9146_v54 }
 0x263   : > { %8434 = vmatprep.subr.bf16.mxu1 %v9209_v52 }
 0x265   : > { %8404 = vmatpush3.bf16.msra.mxu0 %v9148_v56 }
 0x266   : > { %8405 = vmatprep.subr.bf16.mxu0 %v9150_v58  ;;  %8435 = vmatpush3.bf16.msra.mxu1 %v9149_v57 }
 0x267   : > { %8436 = vmatprep.subr.bf16.mxu1 %v9209_v52 }
 0x269   : > { %8406 = vmatpush3.bf16.msra.mxu0 %v9151_v59 }
 0x26a   : > { %8407 = vmatprep.subr.bf16.mxu0 %v9153_v60  ;;  %8437 = vmatpush3.bf16.msra.mxu1 %v9152_v61 }
 0x26b   : > { %8438 = vmatprep.subr.bf16.mxu1 %v9209_v52 }
 0x26d   : > { %8408 = vmatpush3.bf16.msra.mxu0 %v9154_v62 }
 0x26e   : > { %8409 = vmatprep.subr.bf16.mxu0 %v9156_v63  ;;  %8439 = vmatpush3.bf16.msra.mxu1 %v9155_v1 }
 0x26f   : > { %v8107_v0 = vpop.f32.mrb[44].mxu0  ;;  %8440 = vmatprep.subr.bf16.mxu1 %v9209_v52 }
 0x270   : > { %v8108_v2 = vpop.f32.mrb[45].mxu0  ;;  %v8129_v5 = vpop.f32.mrb[44].mxu1 }
 0x271   : > { %v8109_v3 = vadd.f32 %v8108_v2, %v8107_v0  ;;  %v8110_v4 = vpop.f32.mrb[46].mxu0  ;;  %v8130_v9 = vpop.f32.mrb[45].mxu1  ;;  %8410 = vmatpush3.bf16.msra.mxu0 %v9157_v6 }
 0x272   : > { %v8111_v8 = vpop.f32.mrb[47].mxu0  ;;  %v8131_v11 = vadd.f32 %v8130_v9, %v8129_v5  ;;  %v8132_v13 = vpop.f32.mrb[46].mxu1  ;;  %8411 = vmatprep.subr.bf16.mxu0 %v9159_v7  ;;  %8441 = vmatpush3.bf16.msra.mxu1 %v9158_v12 }
 0x273   : > { %v6230_v10 = vadd.f32 %v8109_v3, %v9908_v34  ;;  %v8133_v14 = vpop.f32.mrb[47].mxu1  ;;  %8442 = vmatprep.subr.bf16.mxu1 %v9209_v52 }
 0x275   : > { %v6270_v16 = vadd.f32 %v8131_v11, %v6230_v10  ;;  %8412 = vmatpush3.bf16.msra.mxu0 %v9160_v15 }
 0x276   : > { %8413 = vmatprep.subr.bf16.mxu0 %v9162_v18  ;;  %8443 = vmatpush3.bf16.msra.mxu1 %v9161_v20 }
 0x277   : > { %8444 = vmatprep.subr.bf16.mxu1 %v9209_v52 }
 0x279   : > { %8414 = vmatpush3.bf16.msra.mxu0 %v9163_v21 }
 0x27a   : > { %8445 = vmatpush3.bf16.msra.mxu1 %v9166_v22 }
 0x27c   : > { %6788 = vmatmul.mubr.bf16.vlgmr.msra.gmra.mrb[72].mxu0 %v7001_v23 }
 0x27d   : > { %8447 = vmatmul.mubr.bf16.vlgmr.msra.gmra.mrb[72].mxu1 %v9167_v24 }
 0x28f   : > { %v8151_v25 = vpop.f32.mrb[48].mxu0 }
 0x290   : > { %v8152_v26 = vpop.f32.mrb[49].mxu0  ;;  %v8173_v29 = vpop.f32.mrb[48].mxu1 }
 0x291   : > { %v8153_v27 = vadd.f32 %v8152_v26, %v8151_v25  ;;  %v8154_v28 = vpop.f32.mrb[50].mxu0  ;;  %v8174_v32 = vpop.f32.mrb[49].mxu1 }
 0x292   : > { %v8155_v30 = vpop.f32.mrb[51].mxu0  ;;  %v8175_v33 = vadd.f32 %v8174_v32, %v8173_v29  ;;  %v8176_v34 = vpop.f32.mrb[50].mxu1 }
 0x293   : > { %v6310_v31 = vadd.f32 %v8153_v27, %v6270_v16  ;;  %v8177_v35 = vpop.f32.mrb[51].mxu1 }
 0x295   : > { %v6350_v36 = vadd.f32 %v8175_v33, %v6310_v31 }
 0x2af   : > { %v8195_v37 = vpop.f32.mrb[52].mxu0 }
 0x2b0   : > { %v8196_v38 = vpop.f32.mrb[53].mxu0  ;;  %v8217_v41 = vpop.f32.mrb[52].mxu1 }
 0x2b1   : > { %v8197_v39 = vadd.f32 %v8196_v38, %v8195_v37  ;;  %v8198_v40 = vpop.f32.mrb[54].mxu0  ;;  %v8218_v43 = vpop.f32.mrb[53].mxu1 }
 0x2b2   : > { %v8199_v42 = vpop.f32.mrb[55].mxu0  ;;  %v8219_v45 = vadd.f32 %v8218_v43, %v8217_v41  ;;  %v8220_v46 = vpop.f32.mrb[54].mxu1 }
 0x2b3   : > { %v6390_v44 = vadd.f32 %v8197_v39, %v6350_v36  ;;  %v8221_v47 = vpop.f32.mrb[55].mxu1  ;;  %v213_v42 = vld [vmem:[#allocation2] sm:$0xff] }
 0x2b5   : > { %v6430_v48 = vadd.f32 %v8219_v45, %v6390_v44 }
 0x2cf   : > { %v8239_v49 = vpop.f32.mrb[56].mxu0 }
 0x2d0   : > { %v8240_v50 = vpop.f32.mrb[57].mxu0  ;;  %v8261_v53 = vpop.f32.mrb[56].mxu1 }
 0x2d1   : > { %v8241_v51 = vadd.f32 %v8240_v50, %v8239_v49  ;;  %v8242_v52 = vpop.f32.mrb[58].mxu0  ;;  %v8262_v55 = vpop.f32.mrb[57].mxu1 }
 0x2d2   : > { %v8243_v54 = vpop.f32.mrb[59].mxu0  ;;  %v8263_v57 = vadd.f32 %v8262_v55, %v8261_v53  ;;  %v8264_v58 = vpop.f32.mrb[58].mxu1 }
 0x2d3   : > { %v6470_v56 = vadd.f32 %v8241_v51, %v6430_v48  ;;  %v8265_v59 = vpop.f32.mrb[59].mxu1 }
 0x2d5   : > { %v6510_v60 = vadd.f32 %v8263_v57, %v6470_v56 }
 0x2ef   : > { %v8283_v61 = vpop.f32.mrb[60].mxu0 }
 0x2f0   : > { %v8284_v62 = vpop.f32.mrb[61].mxu0  ;;  %v8305_v1 = vpop.f32.mrb[60].mxu1 }
 0x2f1   : > { %v8285_v63 = vadd.f32 %v8284_v62, %v8283_v61  ;;  %v8286_v0 = vpop.f32.mrb[62].mxu0  ;;  %v8306_v4 = vpop.f32.mrb[61].mxu1 }
 0x2f2   : > { %v8287_v2 = vpop.f32.mrb[63].mxu0  ;;  %v8307_v5 = vadd.f32 %v8306_v4, %v8305_v1  ;;  %v8308_v6 = vpop.f32.mrb[62].mxu1 }
 0x2f3   : > { %v6550_v3 = vadd.f32 %v8285_v63, %v6510_v60  ;;  %v8309_v7 = vpop.f32.mrb[63].mxu1 }
 0x2f5   : > { %v6590_v8 = vadd.f32 %v8307_v5, %v6550_v3 }
 0x30f   : > { %v8327_v9 = vpop.f32.mrb[64].mxu0 }
 0x310   : > { %v8328_v10 = vpop.f32.mrb[65].mxu0  ;;  %v8349_v13 = vpop.f32.mrb[64].mxu1 }
 0x311   : > { %v8329_v11 = vadd.f32 %v8328_v10, %v8327_v9  ;;  %v8330_v12 = vpop.f32.mrb[66].mxu0  ;;  %v8350_v15 = vpop.f32.mrb[65].mxu1 }
 0x312   : > { %v8331_v14 = vpop.f32.mrb[67].mxu0  ;;  %v8351_v17 = vadd.f32 %v8350_v15, %v8349_v13  ;;  %v8352_v18 = vpop.f32.mrb[66].mxu1 }
 0x313   : > { %v6630_v16 = vadd.f32 %v8329_v11, %v6590_v8  ;;  %v8353_v19 = vpop.f32.mrb[67].mxu1 }
 0x315   : > { %v6670_v20 = vadd.f32 %v8351_v17, %v6630_v16 }
 0x32f   : > { %v8371_v21 = vpop.f32.mrb[68].mxu0 }
 0x330   : > { %v8372_v22 = vpop.f32.mrb[69].mxu0  ;;  %v8393_v25 = vpop.f32.mrb[68].mxu1 }
 0x331   : > { %v8373_v23 = vadd.f32 %v8372_v22, %v8371_v21  ;;  %v8374_v24 = vpop.f32.mrb[70].mxu0  ;;  %v8394_v27 = vpop.f32.mrb[69].mxu1 }
 0x332   : > { %v8375_v26 = vpop.f32.mrb[71].mxu0  ;;  %v8395_v29 = vadd.f32 %v8394_v27, %v8393_v25  ;;  %v8396_v30 = vpop.f32.mrb[70].mxu1 }
 0x333   : > { %v6710_v28 = vadd.f32 %v8373_v23, %v6670_v20  ;;  %v8397_v31 = vpop.f32.mrb[71].mxu1 }
 0x335   : > { %v6750_v32 = vadd.f32 %v8395_v29, %v6710_v28 }
 0x34f   : > { %v8415_v33 = vpop.f32.mrb[72].mxu0 }
 0x350   : > { %v8416_v34 = vpop.f32.mrb[73].mxu0  ;;  %v6829_v37 = vpop.f32.mrb[72].mxu1 }
 0x351   : > { %v8417_v35 = vadd.f32 %v8416_v34, %v8415_v33  ;;  %v8418_v36 = vpop.f32.mrb[74].mxu0  ;;  %v8448_v39 = vpop.f32.mrb[73].mxu1 }
 0x352   : > { %v8419_v38 = vpop.f32.mrb[75].mxu0  ;;  %v6832_v41 = vpop.f32.mrb[74].mxu1 }
 0x353   : > { %v6790_v40 = vadd.f32 %v8417_v35, %v6750_v32  ;;  %v8449_v43 = vpop.f32.mrb[75].mxu1  ;;  %6841 = sbr.rel (%p7604_p9) target bundleno = 866 (0x362), region = 36 }
 0x355   : > { %v6830_v44 = vadd.f32 %v6829_v37, %v6790_v40 }
 0x357   : > { %v6835_v45 = vadd.f32 %v6830_v44, %v213_v42 }
 0x359   : > { %6837 = vst.msk [vmem:[#allocation2] sm:$0xff] %vm6836_vm2, %v6835_v45 }
 0x360   : > { %v6842_v46 = vld [vmem:[#allocation2] sm:$0xff] }
 0x361   : > { %6843 = vst.msk [vmem:[%s9272_s3] sm:$0xff] %vm6836_vm2, %v6842_v46 }
 0x362 PF: > { %s12_s13 = sadd.s32 1, %s9206_s13   ;;  %s9975_s9 = smov %s9198_s11 }
 0x363   : > { %p9_p10 = scmp.ge.s32.totalorder %s12_s13, 8   ;;  %s9976_s10 = smov %s9202_s12 }
 0x364   : > { %s9977_s11 = smov %s9980_s14  ;;  %s9978_s12 = smov %s9984_s15 }
 0x365   :  { %11 = sbr.rel (!%p9_p10) target bundleno = 3 (0x3), region = 69 }

</bundles_post_ra>
